<compile_context>
chip_gen: v7x
topology: tpu7x:2x2x1
jax: 0.10.0
libtpu: 0.0.40
codegen_flags: <defaults>
</compile_context>

<pallas_src>
import functools

import jax
import jax.numpy as jnp
from jax import lax
from jax.experimental import pallas as pl
from jax.experimental.pallas import tpu as pltpu

NEG_SLOPE = 0.01  # PyTorch LeakyReLU default negative_slope

_TAPS = tuple((dy, dx) for dy in range(3) for dx in range(3))


# ------------------------------ fused kernel --------------------------------

def _res_conv_fused_kernel(x_ref, w1_ref, b1_ref, w2_ref, b2_ref,
                           wc_ref, bc_ref, weca_ref,
                           o_ref,
                           xp_ref, y1p_ref, p_ref,
                           *, change_c):
    """Fused conv3x3 -> LeakyReLU -> conv3x3 -> ECA gate -> (+ identity).

    Per grid step (one batch element):
      x_ref    : (1, H, W, Cin)   input block (VMEM)
      w1_ref   : (9*Cin, C)       conv_1 weights, taps folded into K
      b1_ref   : (1, C)
      w2_ref   : (9*C, C)         conv_2 weights, taps folded into K
      b2_ref   : (1, C)
      wc_ref   : (Cin, C)         1x1 conv for the identity branch
      bc_ref   : (1, C)
      weca_ref : (3,) f32 SMEM    ECA Conv1d(k=3, pad=1, no bias) weights
      o_ref    : (1, H, W, C)
    VMEM scratch (f32):
      xp_ref   : (H+2, W+2, Cin)        zero-padded input (in-kernel halo)
      y1p_ref  : (H+2, W+2, C)          zero-padded conv_1 output
      p_ref    : (H*W, 9*max(Cin, C))   shared im2col buffer for both convs
    """
    _, H, W, C = o_ref.shape
    Cin = x_ref.shape[-1]
    HW = H * W

    # ---- halo: zero-pad the input inside VMEM (no HBM-side jnp.pad) --------
    # NOTE: the full zero-fill runs every step on purpose — the batch grid axis
    # is "parallel", so a one-time pl.when(program_id==0) init would be unsafe
    # when the grid is sharded across TensorCores.
    xp_ref[...] = jnp.zeros_like(xp_ref)
    x3 = x_ref[0].astype(jnp.float32)            # (H, W, Cin)
    xp_ref[1:H + 1, 1:W + 1, :] = x3

    # ---- conv_1: im2col, then one fat (H*W, 9*Cin) @ (9*Cin, C) matmul -----
    # (W is a multiple of 8 here, so the (H,W,Cin)->(H*W,Cin) reshapes are
    #  layout-compatible and essentially metadata-only.)
    for t, (dy, dx) in enumerate(_TAPS):
        p_ref[:, t * Cin:(t + 1) * Cin] = (
            xp_ref[dy:dy + H, dx:dx + W, :].reshape(HW, Cin))
    y1 = jnp.dot(p_ref[:, :9 * Cin], w1_ref[...].astype(jnp.float32),
                 preferred_element_type=jnp.float32)
    y1 = y1 + b1_ref[...].astype(jnp.float32)
    y1 = jnp.where(y1 >= 0, y1, NEG_SLOPE * y1)          # LeakyReLU(0.01)

    # ---- conv_2: same trick on the conv_1 output (reusing p_ref) ------------
    y1p_ref[...] = jnp.zeros_like(y1p_ref)
    y1p_ref[1:H + 1, 1:W + 1, :] = y1.reshape(H, W, C)
    for t, (dy, dx) in enumerate(_TAPS):
        p_ref[:, t * C:(t + 1) * C] = (
            y1p_ref[dy:dy + H, dx:dx + W, :].reshape(HW, C))
    y2 = jnp.dot(p_ref[:, :9 * C], w2_ref[...].astype(jnp.float32),
                 preferred_element_type=jnp.float32)
    y2 = y2 + b2_ref[...].astype(jnp.float32)

    # ---- ECA: global avg pool -> k=3 channel conv (3 SMEM scalars) -> sigmoid
    m = jnp.mean(y2, axis=0, keepdims=True)               # (1, C)
    w0 = weca_ref[0]
    w1e = weca_ref[1]
    w2e = weca_ref[2]
    col = lax.broadcasted_iota(jnp.int32, (C, C), 1)
    row = lax.broadcasted_iota(jnp.int32, (C, C), 0)
    diff = col - row
    # PyTorch Conv1d cross-correlation: gate[c] = w0*m[c-1] + w1*m[c] + w2*m[c+1]
    t_mat = (jnp.where(diff == 1, w0, 0.0)
             + jnp.where(diff == 0, w1e, 0.0)
             + jnp.where(diff == -1, w2e, 0.0)).astype(jnp.float32)
    gate = jax.nn.sigmoid(jnp.dot(m, t_mat, preferred_element_type=jnp.float32))

    # ---- identity branch (1x1 conv only if in_c != out_c), residual add -----
    x_flat = x3.reshape(HW, Cin)
    if change_c:
        ident = jnp.dot(x_flat, wc_ref[...].astype(jnp.float32),
                        preferred_element_type=jnp.float32)
        ident = ident + bc_ref[...].astype(jnp.float32)
    else:
        ident = x_flat

    out = y2 * gate + ident
    o_ref[...] = out.reshape(1, H, W, C).astype(o_ref.dtype)


# ------------------------------ pallas_call glue ----------------------------

def res_conv_fixed_fused(x_nhwc, params):
    N, H, W, Cin = x_nhwc.shape
    C = params["b1"].shape[-1]
    change_c = (Cin != C)
    pk = 9 * max(Cin, C)            # shared im2col width

    # Fold the 3x3 taps into the contraction dim (free XLA reshape, no copy).
    w1 = params["w1"].reshape(9 * Cin, C)
    w2 = params["w2"].reshape(9 * C, C)

    kernel = functools.partial(_res_conv_fused_kernel, change_c=change_c)
    return pl.pallas_call(
        kernel,
        out_shape=jax.ShapeDtypeStruct((N, H, W, C), x_nhwc.dtype),
        grid=(N,),
        in_specs=[
            pl.BlockSpec((1, H, W, Cin), lambda n: (n, 0, 0, 0)),      # x
            pl.BlockSpec((9 * Cin, C), lambda n: (0, 0)),              # w1 (folded)
            pl.BlockSpec((1, C), lambda n: (0, 0)),                    # b1
            pl.BlockSpec((9 * C, C), lambda n: (0, 0)),                # w2 (folded)
            pl.BlockSpec((1, C), lambda n: (0, 0)),                    # b2
            pl.BlockSpec((Cin, C), lambda n: (0, 0)),                  # wc (1x1)
            pl.BlockSpec((1, C), lambda n: (0, 0)),                    # bc
            pl.BlockSpec(memory_space=pltpu.MemorySpace.SMEM),         # w_eca (3,)
        ],
        out_specs=pl.BlockSpec((1, H, W, C), lambda n: (n, 0, 0, 0)),
        scratch_shapes=[
            pltpu.VMEM((H + 2, W + 2, Cin), jnp.float32),  # padded input
            pltpu.VMEM((H + 2, W + 2, C), jnp.float32),    # padded conv_1 output
            pltpu.VMEM((H * W, pk), jnp.float32),          # shared im2col buffer
        ],
        compiler_params=pltpu.CompilerParams(
            dimension_semantics=("parallel",),
            vmem_limit_bytes=32 * 1024 * 1024,
        ),
    )(x_nhwc, w1, params["b1"], w2, params["b2"],
      params["wc"], params["bc"], params["w_eca"])


# ------------------------------ parameters ----------------------------------

def init_params(key, in_c, out_c, k_size=3):
    ks = jax.random.split(key, 7)
    return {
        "w1": jax.random.normal(ks[0], (3, 3, in_c, out_c), jnp.float32) * 0.1,
        "b1": jax.random.normal(ks[1], (1, out_c), jnp.float32) * 0.1,
        "w2": jax.random.normal(ks[2], (3, 3, out_c, out_c), jnp.float32) * 0.1,
        "b2": jax.random.normal(ks[3], (1, out_c), jnp.float32) * 0.1,
        "wc": jax.random.normal(ks[4], (in_c, out_c), jnp.float32) * 0.1,
        "bc": jax.random.normal(ks[5], (1, out_c), jnp.float32) * 0.1,
        "w_eca": jax.random.normal(ks[6], (k_size,), jnp.float32) * 0.5,
    }


# ------------------------------ forward pass ---------------------------------

def res_conv_fixed_forward(x_nchw, params):
    x = jnp.transpose(x_nchw, (0, 2, 3, 1))      # NCHW -> NHWC
    out = res_conv_fixed_fused(x, params)        # one fused kernel
    return jnp.transpose(out, (0, 3, 1, 2))      # NHWC -> NCHW


# ------------------------------ pure-JAX reference ---------------------------

def reference_forward(x_nchw, params):
    x = jnp.transpose(x_nchw, (0, 2, 3, 1))
    dn = ("NHWC", "HWIO", "NHWC")
    y = lax.conv_general_dilated(x, params["w1"], (1, 1), "SAME",
                                 dimension_numbers=dn) + params["b1"].reshape(1, 1, 1, -1)
    y = jnp.where(y >= 0, y, NEG_SLOPE * y)
    y = lax.conv_general_dilated(y, params["w2"], (1, 1), "SAME",
                                 dimension_numbers=dn) + params["b2"].reshape(1, 1, 1, -1)
    # ECA: global avg pool + Conv1d(k=3, pad=1, no bias) over channels + sigmoid
    m = jnp.mean(y, axis=(1, 2))                              # (N, C)
    mp = jnp.pad(m, ((0, 0), (1, 1)))
    w = params["w_eca"]
    gate = jax.nn.sigmoid(w[0] * mp[:, :-2] + w[1] * mp[:, 1:-1] + w[2] * mp[:, 2:])
    y = y * gate[:, None, None, :]
    if x.shape[-1] != y.shape[-1]:
        identity = jnp.einsum("nhwi,io->nhwo", x, params["wc"]) + params["bc"].reshape(1, 1, 1, -1)
    else:
        identity = x
    return jnp.transpose(y + identity, (0, 3, 1, 2))


# ---------------------------------- main -------------------------------------

if __name__ == "__main__":
    key = jax.random.PRNGKey(0)
    kx, kp, kx2, kp2 = jax.random.split(key, 4)

    # Case 1: in_c != out_c (exercises the 1x1 identity conv branch).
    in_c, out_c = 4, 8
    x = jax.random.normal(kx, (2, in_c, 16, 16), jnp.float32)   # NCHW, like PyTorch
    params = init_params(kp, in_c, out_c)
    fwd = jax.jit(res_conv_fixed_forward)
    out = jax.block_until_ready(fwd(x, params))
    ref = reference_forward(x, params)
    assert out.shape == (2, out_c, 16, 16), out.shape
    err1 = float(jnp.max(jnp.abs(out - ref)))
    assert jnp.allclose(out, ref, atol=1e-4, rtol=1e-4), err1

    # Case 2: in_c == out_c (exercises the pass-through identity branch).
    c2 = 8
    x2 = jax.random.normal(kx2, (2, c2, 16, 16), jnp.float32)
    params2 = init_params(kp2, c2, c2)
    out2 = jax.block_until_ready(jax.jit(res_conv_fixed_forward)(x2, params2))
    ref2 = reference_forward(x2, params2)
    assert out2.shape == (2, c2, 16, 16), out2.shape
    err2 = float(jnp.max(jnp.abs(out2 - ref2)))
    assert jnp.allclose(out2, ref2, atol=1e-4, rtol=1e-4), err2

    print("KERNEL_OK")
</pallas_src>

<mosaic_0001>
module attributes {stable_mosaic.version = 11 : i64} {
  func.func @_res_conv_fused_kernel(%arg0: i32, %arg1: memref<1x16x16x4xf32, #tpu.memory_space<vmem>>, %arg2: memref<36x8xf32, #tpu.memory_space<vmem>>, %arg3: memref<1x8xf32, #tpu.memory_space<vmem>>, %arg4: memref<72x8xf32, #tpu.memory_space<vmem>>, %arg5: memref<1x8xf32, #tpu.memory_space<vmem>>, %arg6: memref<4x8xf32, #tpu.memory_space<vmem>>, %arg7: memref<1x8xf32, #tpu.memory_space<vmem>>, %arg8: memref<3xf32, #tpu.memory_space<smem>>, %arg9: memref<1x16x16x8xf32, #tpu.memory_space<vmem>>, %arg10: memref<18x18x4xf32, #tpu.memory_space<vmem>>, %arg11: memref<18x18x8xf32, #tpu.memory_space<vmem>>, %arg12: memref<256x72xf32, #tpu.memory_space<vmem>>) attributes {dimension_semantics = [#tpu.dimension_semantics<parallel>], iteration_bounds = array<i64: 2>, scalar_prefetch = 0 : i64, scratch_operands = 3 : i64, tpu.core_type = #tpu.core_type<tc>, window_params = [{transform_indices = @transform_0, window_bounds = array<i64: 1, 16, 16, 4>}, {pipeline_mode = #tpu.pipeline_mode<synchronous>, transform_indices = @transform_1, window_bounds = array<i64: 36, 8>}, {pipeline_mode = #tpu.pipeline_mode<synchronous>, transform_indices = @transform_2, window_bounds = array<i64: 1, 8>}, {pipeline_mode = #tpu.pipeline_mode<synchronous>, transform_indices = @transform_3, window_bounds = array<i64: 72, 8>}, {pipeline_mode = #tpu.pipeline_mode<synchronous>, transform_indices = @transform_4, window_bounds = array<i64: 1, 8>}, {pipeline_mode = #tpu.pipeline_mode<synchronous>, transform_indices = @transform_5, window_bounds = array<i64: 4, 8>}, {pipeline_mode = #tpu.pipeline_mode<synchronous>, transform_indices = @transform_6, window_bounds = array<i64: 1, 8>}, {transform_indices = @transform_7, window_bounds = array<i64: 3>}, {transform_indices = @transform_8, window_bounds = array<i64: 1, 16, 16, 8>}]} {
    %cst = arith.constant 0.000000e+00 : f32
    %0 = vector.broadcast %cst : f32 to vector<18x18x4xf32>
    %c0 = arith.constant 0 : index
    %c0_0 = arith.constant 0 : index
    %c0_1 = arith.constant 0 : index
    %1 = vector.load %arg10[%c0, %c0_0, %c0_1] : memref<18x18x4xf32, #tpu.memory_space<vmem>>, vector<18x18x4xf32>
    tpu.vector_store %arg10[%c0, %c0_0, %c0_1], %0 {strides = array<i32>} : memref<18x18x4xf32, #tpu.memory_space<vmem>>, vector<18x18x4xf32>,
    %c0_2 = arith.constant 0 : index
    %c0_3 = arith.constant 0 : index
    %c0_4 = arith.constant 0 : index
    %c0_5 = arith.constant 0 : index
    %2 = vector.load %arg1[%c0_2, %c0_3, %c0_4, %c0_5] : memref<1x16x16x4xf32, #tpu.memory_space<vmem>>, vector<1x16x16x4xf32>
    %3 = vector.shape_cast %2 : vector<1x16x16x4xf32> to vector<16x16x4xf32>
    %c1 = arith.constant 1 : index
    %c1_6 = arith.constant 1 : index
    %c0_7 = arith.constant 0 : index
    %4 = vector.load %arg10[%c1, %c1_6, %c0_7] : memref<18x18x4xf32, #tpu.memory_space<vmem>>, vector<16x16x4xf32>
    tpu.vector_store %arg10[%c1, %c1_6, %c0_7], %3 {strides = array<i32>} : memref<18x18x4xf32, #tpu.memory_space<vmem>>, vector<16x16x4xf32>,
    %c0_8 = arith.constant 0 : index
    %c0_9 = arith.constant 0 : index
    %c0_10 = arith.constant 0 : index
    %5 = vector.load %arg10[%c0_8, %c0_9, %c0_10] : memref<18x18x4xf32, #tpu.memory_space<vmem>>, vector<16x16x4xf32>
    %6 = vector.shape_cast %5 : vector<16x16x4xf32> to vector<256x4xf32>
    %c0_11 = arith.constant 0 : index
    %c0_12 = arith.constant 0 : index
    %7 = vector.load %arg12[%c0_11, %c0_12] : memref<256x72xf32, #tpu.memory_space<vmem>>, vector<256x4xf32>
    tpu.vector_store %arg12[%c0_11, %c0_12], %6 {strides = array<i32>} : memref<256x72xf32, #tpu.memory_space<vmem>>, vector<256x4xf32>,
    %c0_13 = arith.constant 0 : index
    %c1_14 = arith.constant 1 : index
    %c0_15 = arith.constant 0 : index
    %8 = vector.load %arg10[%c0_13, %c1_14, %c0_15] : memref<18x18x4xf32, #tpu.memory_space<vmem>>, vector<16x16x4xf32>
    %9 = vector.shape_cast %8 : vector<16x16x4xf32> to vector<256x4xf32>
    %c0_16 = arith.constant 0 : index
    %c4 = arith.constant 4 : index
    %10 = vector.load %arg12[%c0_16, %c4] : memref<256x72xf32, #tpu.memory_space<vmem>>, vector<256x4xf32>
    tpu.vector_store %arg12[%c0_16, %c4], %9 {strides = array<i32>} : memref<256x72xf32, #tpu.memory_space<vmem>>, vector<256x4xf32>,
    %c0_17 = arith.constant 0 : index
    %c2 = arith.constant 2 : index
    %c0_18 = arith.constant 0 : index
    %11 = vector.load %arg10[%c0_17, %c2, %c0_18] : memref<18x18x4xf32, #tpu.memory_space<vmem>>, vector<16x16x4xf32>
    %12 = vector.shape_cast %11 : vector<16x16x4xf32> to vector<256x4xf32>
    %c0_19 = arith.constant 0 : index
    %c8 = arith.constant 8 : index
    %13 = vector.load %arg12[%c0_19, %c8] : memref<256x72xf32, #tpu.memory_space<vmem>>, vector<256x4xf32>
    tpu.vector_store %arg12[%c0_19, %c8], %12 {strides = array<i32>} : memref<256x72xf32, #tpu.memory_space<vmem>>, vector<256x4xf32>,
    %c1_20 = arith.constant 1 : index
    %c0_21 = arith.constant 0 : index
    %c0_22 = arith.constant 0 : index
    %14 = vector.load %arg10[%c1_20, %c0_21, %c0_22] : memref<18x18x4xf32, #tpu.memory_space<vmem>>, vector<16x16x4xf32>
    %15 = vector.shape_cast %14 : vector<16x16x4xf32> to vector<256x4xf32>
    %c0_23 = arith.constant 0 : index
    %c12 = arith.constant 12 : index
    %16 = vector.load %arg12[%c0_23, %c12] : memref<256x72xf32, #tpu.memory_space<vmem>>, vector<256x4xf32>
    tpu.vector_store %arg12[%c0_23, %c12], %15 {strides = array<i32>} : memref<256x72xf32, #tpu.memory_space<vmem>>, vector<256x4xf32>,
    %c1_24 = arith.constant 1 : index
    %c1_25 = arith.constant 1 : index
    %c0_26 = arith.constant 0 : index
    %17 = vector.load %arg10[%c1_24, %c1_25, %c0_26] : memref<18x18x4xf32, #tpu.memory_space<vmem>>, vector<16x16x4xf32>
    %18 = vector.shape_cast %17 : vector<16x16x4xf32> to vector<256x4xf32>
    %c0_27 = arith.constant 0 : index
    %c16 = arith.constant 16 : index
    %19 = vector.load %arg12[%c0_27, %c16] : memref<256x72xf32, #tpu.memory_space<vmem>>, vector<256x4xf32>
    tpu.vector_store %arg12[%c0_27, %c16], %18 {strides = array<i32>} : memref<256x72xf32, #tpu.memory_space<vmem>>, vector<256x4xf32>,
    %c1_28 = arith.constant 1 : index
    %c2_29 = arith.constant 2 : index
    %c0_30 = arith.constant 0 : index
    %20 = vector.load %arg10[%c1_28, %c2_29, %c0_30] : memref<18x18x4xf32, #tpu.memory_space<vmem>>, vector<16x16x4xf32>
    %21 = vector.shape_cast %20 : vector<16x16x4xf32> to vector<256x4xf32>
    %c0_31 = arith.constant 0 : index
    %c20 = arith.constant 20 : index
    %22 = vector.load %arg12[%c0_31, %c20] : memref<256x72xf32, #tpu.memory_space<vmem>>, vector<256x4xf32>
    tpu.vector_store %arg12[%c0_31, %c20], %21 {strides = array<i32>} : memref<256x72xf32, #tpu.memory_space<vmem>>, vector<256x4xf32>,
    %c2_32 = arith.constant 2 : index
    %c0_33 = arith.constant 0 : index
    %c0_34 = arith.constant 0 : index
    %23 = vector.load %arg10[%c2_32, %c0_33, %c0_34] : memref<18x18x4xf32, #tpu.memory_space<vmem>>, vector<16x16x4xf32>
    %24 = vector.shape_cast %23 : vector<16x16x4xf32> to vector<256x4xf32>
    %c0_35 = arith.constant 0 : index
    %c24 = arith.constant 24 : index
    %25 = vector.load %arg12[%c0_35, %c24] : memref<256x72xf32, #tpu.memory_space<vmem>>, vector<256x4xf32>
    tpu.vector_store %arg12[%c0_35, %c24], %24 {strides = array<i32>} : memref<256x72xf32, #tpu.memory_space<vmem>>, vector<256x4xf32>,
    %c2_36 = arith.constant 2 : index
    %c1_37 = arith.constant 1 : index
    %c0_38 = arith.constant 0 : index
    %26 = vector.load %arg10[%c2_36, %c1_37, %c0_38] : memref<18x18x4xf32, #tpu.memory_space<vmem>>, vector<16x16x4xf32>
    %27 = vector.shape_cast %26 : vector<16x16x4xf32> to vector<256x4xf32>
    %c0_39 = arith.constant 0 : index
    %c28 = arith.constant 28 : index
    %28 = vector.load %arg12[%c0_39, %c28] : memref<256x72xf32, #tpu.memory_space<vmem>>, vector<256x4xf32>
    tpu.vector_store %arg12[%c0_39, %c28], %27 {strides = array<i32>} : memref<256x72xf32, #tpu.memory_space<vmem>>, vector<256x4xf32>,
    %c2_40 = arith.constant 2 : index
    %c2_41 = arith.constant 2 : index
    %c0_42 = arith.constant 0 : index
    %29 = vector.load %arg10[%c2_40, %c2_41, %c0_42] : memref<18x18x4xf32, #tpu.memory_space<vmem>>, vector<16x16x4xf32>
    %30 = vector.shape_cast %29 : vector<16x16x4xf32> to vector<256x4xf32>
    %c0_43 = arith.constant 0 : index
    %c32 = arith.constant 32 : index
    %31 = vector.load %arg12[%c0_43, %c32] : memref<256x72xf32, #tpu.memory_space<vmem>>, vector<256x4xf32>
    tpu.vector_store %arg12[%c0_43, %c32], %30 {strides = array<i32>} : memref<256x72xf32, #tpu.memory_space<vmem>>, vector<256x4xf32>,
    %c0_44 = arith.constant 0 : index
    %c0_45 = arith.constant 0 : index
    %32 = vector.load %arg12[%c0_44, %c0_45] : memref<256x72xf32, #tpu.memory_space<vmem>>, vector<256x36xf32>
    %c0_46 = arith.constant 0 : index
    %c0_47 = arith.constant 0 : index
    %33 = vector.load %arg2[%c0_46, %c0_47] : memref<36x8xf32, #tpu.memory_space<vmem>>, vector<36x8xf32>
    %cst_48 = arith.constant dense<0.000000e+00> : vector<256x8xf32>
    %34 = tpu.matmul %32, %33, %cst_48 {dimension_numbers = #tpu.dot_dimension_numbers<[1], [0], [0], [1], [0, 0, 1, 1], [], []>} : vector<256x36xf32>, vector<36x8xf32>, vector<256x8xf32> -> vector<256x8xf32>
    %c0_49 = arith.constant 0 : index
    %c0_50 = arith.constant 0 : index
    %35 = vector.load %arg3[%c0_49, %c0_50] : memref<1x8xf32, #tpu.memory_space<vmem>>, vector<1x8xf32>
    %36 = vector.broadcast %35 : vector<1x8xf32> to vector<256x8xf32>
    %37 = arith.addf %34, %36 : vector<256x8xf32>
    %cst_51 = arith.constant 0.000000e+00 : f32
    %38 = vector.broadcast %cst_51 : f32 to vector<256x8xf32>
    %39 = arith.cmpf oge, %37, %38 : vector<256x8xf32>
    %cst_52 = arith.constant 0.00999999977 : f32
    %40 = vector.broadcast %cst_52 : f32 to vector<256x8xf32>
    %41 = arith.mulf %40, %37 : vector<256x8xf32>
    %42 = arith.select %39, %37, %41 : vector<256x8xi1>, vector<256x8xf32>
    %cst_53 = arith.constant 0.000000e+00 : f32
    %43 = vector.broadcast %cst_53 : f32 to vector<18x18x8xf32>
    %c0_54 = arith.constant 0 : index
    %c0_55 = arith.constant 0 : index
    %c0_56 = arith.constant 0 : index
    %44 = vector.load %arg11[%c0_54, %c0_55, %c0_56] : memref<18x18x8xf32, #tpu.memory_space<vmem>>, vector<18x18x8xf32>
    tpu.vector_store %arg11[%c0_54, %c0_55, %c0_56], %43 {strides = array<i32>} : memref<18x18x8xf32, #tpu.memory_space<vmem>>, vector<18x18x8xf32>,
    %45 = vector.shape_cast %42 : vector<256x8xf32> to vector<16x16x8xf32>
    %c1_57 = arith.constant 1 : index
    %c1_58 = arith.constant 1 : index
    %c0_59 = arith.constant 0 : index
    %46 = vector.load %arg11[%c1_57, %c1_58, %c0_59] : memref<18x18x8xf32, #tpu.memory_space<vmem>>, vector<16x16x8xf32>
    tpu.vector_store %arg11[%c1_57, %c1_58, %c0_59], %45 {strides = array<i32>} : memref<18x18x8xf32, #tpu.memory_space<vmem>>, vector<16x16x8xf32>,
    %c0_60 = arith.constant 0 : index
    %c0_61 = arith.constant 0 : index
    %c0_62 = arith.constant 0 : index
    %47 = vector.load %arg11[%c0_60, %c0_61, %c0_62] : memref<18x18x8xf32, #tpu.memory_space<vmem>>, vector<16x16x8xf32>
    %48 = vector.shape_cast %47 : vector<16x16x8xf32> to vector<256x8xf32>
    %c0_63 = arith.constant 0 : index
    %c0_64 = arith.constant 0 : index
    %49 = vector.load %arg12[%c0_63, %c0_64] : memref<256x72xf32, #tpu.memory_space<vmem>>, vector<256x8xf32>
    tpu.vector_store %arg12[%c0_63, %c0_64], %48 {strides = array<i32>} : memref<256x72xf32, #tpu.memory_space<vmem>>, vector<256x8xf32>,
    %c0_65 = arith.constant 0 : index
    %c1_66 = arith.constant 1 : index
    %c0_67 = arith.constant 0 : index
    %50 = vector.load %arg11[%c0_65, %c1_66, %c0_67] : memref<18x18x8xf32, #tpu.memory_space<vmem>>, vector<16x16x8xf32>
    %51 = vector.shape_cast %50 : vector<16x16x8xf32> to vector<256x8xf32>
    %c0_68 = arith.constant 0 : index
    %c8_69 = arith.constant 8 : index
    %52 = vector.load %arg12[%c0_68, %c8_69] : memref<256x72xf32, #tpu.memory_space<vmem>>, vector<256x8xf32>
    tpu.vector_store %arg12[%c0_68, %c8_69], %51 {strides = array<i32>} : memref<256x72xf32, #tpu.memory_space<vmem>>, vector<256x8xf32>,
    %c0_70 = arith.constant 0 : index
    %c2_71 = arith.constant 2 : index
    %c0_72 = arith.constant 0 : index
    %53 = vector.load %arg11[%c0_70, %c2_71, %c0_72] : memref<18x18x8xf32, #tpu.memory_space<vmem>>, vector<16x16x8xf32>
    %54 = vector.shape_cast %53 : vector<16x16x8xf32> to vector<256x8xf32>
    %c0_73 = arith.constant 0 : index
    %c16_74 = arith.constant 16 : index
    %55 = vector.load %arg12[%c0_73, %c16_74] : memref<256x72xf32, #tpu.memory_space<vmem>>, vector<256x8xf32>
    tpu.vector_store %arg12[%c0_73, %c16_74], %54 {strides = array<i32>} : memref<256x72xf32, #tpu.memory_space<vmem>>, vector<256x8xf32>,
    %c1_75 = arith.constant 1 : index
    %c0_76 = arith.constant 0 : index
    %c0_77 = arith.constant 0 : index
    %56 = vector.load %arg11[%c1_75, %c0_76, %c0_77] : memref<18x18x8xf32, #tpu.memory_space<vmem>>, vector<16x16x8xf32>
    %57 = vector.shape_cast %56 : vector<16x16x8xf32> to vector<256x8xf32>
    %c0_78 = arith.constant 0 : index
    %c24_79 = arith.constant 24 : index
    %58 = vector.load %arg12[%c0_78, %c24_79] : memref<256x72xf32, #tpu.memory_space<vmem>>, vector<256x8xf32>
    tpu.vector_store %arg12[%c0_78, %c24_79], %57 {strides = array<i32>} : memref<256x72xf32, #tpu.memory_space<vmem>>, vector<256x8xf32>,
    %c1_80 = arith.constant 1 : index
    %c1_81 = arith.constant 1 : index
    %c0_82 = arith.constant 0 : index
    %59 = vector.load %arg11[%c1_80, %c1_81, %c0_82] : memref<18x18x8xf32, #tpu.memory_space<vmem>>, vector<16x16x8xf32>
    %60 = vector.shape_cast %59 : vector<16x16x8xf32> to vector<256x8xf32>
    %c0_83 = arith.constant 0 : index
    %c32_84 = arith.constant 32 : index
    %61 = vector.load %arg12[%c0_83, %c32_84] : memref<256x72xf32, #tpu.memory_space<vmem>>, vector<256x8xf32>
    tpu.vector_store %arg12[%c0_83, %c32_84], %60 {strides = array<i32>} : memref<256x72xf32, #tpu.memory_space<vmem>>, vector<256x8xf32>,
    %c1_85 = arith.constant 1 : index
    %c2_86 = arith.constant 2 : index
    %c0_87 = arith.constant 0 : index
    %62 = vector.load %arg11[%c1_85, %c2_86, %c0_87] : memref<18x18x8xf32, #tpu.memory_space<vmem>>, vector<16x16x8xf32>
    %63 = vector.shape_cast %62 : vector<16x16x8xf32> to vector<256x8xf32>
    %c0_88 = arith.constant 0 : index
    %c40 = arith.constant 40 : index
    %64 = vector.load %arg12[%c0_88, %c40] : memref<256x72xf32, #tpu.memory_space<vmem>>, vector<256x8xf32>
    tpu.vector_store %arg12[%c0_88, %c40], %63 {strides = array<i32>} : memref<256x72xf32, #tpu.memory_space<vmem>>, vector<256x8xf32>,
    %c2_89 = arith.constant 2 : index
    %c0_90 = arith.constant 0 : index
    %c0_91 = arith.constant 0 : index
    %65 = vector.load %arg11[%c2_89, %c0_90, %c0_91] : memref<18x18x8xf32, #tpu.memory_space<vmem>>, vector<16x16x8xf32>
    %66 = vector.shape_cast %65 : vector<16x16x8xf32> to vector<256x8xf32>
    %c0_92 = arith.constant 0 : index
    %c48 = arith.constant 48 : index
    %67 = vector.load %arg12[%c0_92, %c48] : memref<256x72xf32, #tpu.memory_space<vmem>>, vector<256x8xf32>
    tpu.vector_store %arg12[%c0_92, %c48], %66 {strides = array<i32>} : memref<256x72xf32, #tpu.memory_space<vmem>>, vector<256x8xf32>,
    %c2_93 = arith.constant 2 : index
    %c1_94 = arith.constant 1 : index
    %c0_95 = arith.constant 0 : index
    %68 = vector.load %arg11[%c2_93, %c1_94, %c0_95] : memref<18x18x8xf32, #tpu.memory_space<vmem>>, vector<16x16x8xf32>
    %69 = vector.shape_cast %68 : vector<16x16x8xf32> to vector<256x8xf32>
    %c0_96 = arith.constant 0 : index
    %c56 = arith.constant 56 : index
    %70 = vector.load %arg12[%c0_96, %c56] : memref<256x72xf32, #tpu.memory_space<vmem>>, vector<256x8xf32>
    tpu.vector_store %arg12[%c0_96, %c56], %69 {strides = array<i32>} : memref<256x72xf32, #tpu.memory_space<vmem>>, vector<256x8xf32>,
    %c2_97 = arith.constant 2 : index
    %c2_98 = arith.constant 2 : index
    %c0_99 = arith.constant 0 : index
    %71 = vector.load %arg11[%c2_97, %c2_98, %c0_99] : memref<18x18x8xf32, #tpu.memory_space<vmem>>, vector<16x16x8xf32>
    %72 = vector.shape_cast %71 : vector<16x16x8xf32> to vector<256x8xf32>
    %c0_100 = arith.constant 0 : index
    %c64 = arith.constant 64 : index
    %73 = vector.load %arg12[%c0_100, %c64] : memref<256x72xf32, #tpu.memory_space<vmem>>, vector<256x8xf32>
    tpu.vector_store %arg12[%c0_100, %c64], %72 {strides = array<i32>} : memref<256x72xf32, #tpu.memory_space<vmem>>, vector<256x8xf32>,
    %c0_101 = arith.constant 0 : index
    %c0_102 = arith.constant 0 : index
    %74 = vector.load %arg12[%c0_101, %c0_102] : memref<256x72xf32, #tpu.memory_space<vmem>>, vector<256x72xf32>
    %c0_103 = arith.constant 0 : index
    %c0_104 = arith.constant 0 : index
    %75 = vector.load %arg4[%c0_103, %c0_104] : memref<72x8xf32, #tpu.memory_space<vmem>>, vector<72x8xf32>
    %cst_105 = arith.constant dense<0.000000e+00> : vector<256x8xf32>
    %76 = tpu.matmul %74, %75, %cst_105 {dimension_numbers = #tpu.dot_dimension_numbers<[1], [0], [0], [1], [0, 0, 1, 1], [], []>} : vector<256x72xf32>, vector<72x8xf32>, vector<256x8xf32> -> vector<256x8xf32>
    %c0_106 = arith.constant 0 : index
    %c0_107 = arith.constant 0 : index
    %77 = vector.load %arg5[%c0_106, %c0_107] : memref<1x8xf32, #tpu.memory_space<vmem>>, vector<1x8xf32>
    %78 = vector.broadcast %77 : vector<1x8xf32> to vector<256x8xf32>
    %79 = arith.addf %76, %78 : vector<256x8xf32>
    %cst_108 = arith.constant dense<0.000000e+00> : vector<8xf32>
    %80 = vector.multi_reduction <add>, %79, %cst_108 [0] : vector<256x8xf32> to vector<8xf32>
    %81 = vector.shape_cast %80 : vector<8xf32> to vector<1x8xf32>
    %cst_109 = arith.constant 2.560000e+02 : f32
    %82 = vector.broadcast %cst_109 : f32 to vector<1x8xf32>
    %83 = arith.divf %81, %82 : vector<1x8xf32>
    %c0_110 = arith.constant 0 : index
    %84 = memref.load %arg8[%c0_110] : memref<3xf32, #tpu.memory_space<smem>>
    %c1_111 = arith.constant 1 : index
    %85 = memref.load %arg8[%c1_111] : memref<3xf32, #tpu.memory_space<smem>>
    %c2_112 = arith.constant 2 : index
    %86 = memref.load %arg8[%c2_112] : memref<3xf32, #tpu.memory_space<smem>>
    %87 = tpu.iota {dimensions = array<i32: 1>} : vector<8x8xi32>
    %88 = tpu.iota {dimensions = array<i32: 0>} : vector<8x8xi32>
    %89 = arith.subi %87, %88 : vector<8x8xi32>
    %c1_i32 = arith.constant 1 : i32
    %90 = vector.broadcast %c1_i32 : i32 to vector<8x8xi32>
    %91 = arith.cmpi eq, %89, %90 : vector<8x8xi32>
    %cst_113 = arith.constant 0.000000e+00 : f32
    %92 = vector.broadcast %84 : f32 to vector<8x8xf32>
    %93 = vector.broadcast %cst_113 : f32 to vector<8x8xf32>
    %94 = arith.select %91, %92, %93 : vector<8x8xi1>, vector<8x8xf32>
    %c0_i32 = arith.constant 0 : i32
    %95 = vector.broadcast %c0_i32 : i32 to vector<8x8xi32>
    %96 = arith.cmpi eq, %89, %95 : vector<8x8xi32>
    %cst_114 = arith.constant 0.000000e+00 : f32
    %97 = vector.broadcast %85 : f32 to vector<8x8xf32>
    %98 = vector.broadcast %cst_114 : f32 to vector<8x8xf32>
    %99 = arith.select %96, %97, %98 : vector<8x8xi1>, vector<8x8xf32>
    %100 = arith.addf %94, %99 : vector<8x8xf32>
    %c-1_i32 = arith.constant -1 : i32
    %101 = vector.broadcast %c-1_i32 : i32 to vector<8x8xi32>
    %102 = arith.cmpi eq, %89, %101 : vector<8x8xi32>
    %cst_115 = arith.constant 0.000000e+00 : f32
    %103 = vector.broadcast %86 : f32 to vector<8x8xf32>
    %104 = vector.broadcast %cst_115 : f32 to vector<8x8xf32>
    %105 = arith.select %102, %103, %104 : vector<8x8xi1>, vector<8x8xf32>
    %106 = arith.addf %100, %105 : vector<8x8xf32>
    %cst_116 = arith.constant dense<0.000000e+00> : vector<1x8xf32>
    %107 = tpu.matmul %83, %106, %cst_116 {dimension_numbers = #tpu.dot_dimension_numbers<[1], [0], [0], [1], [0, 0, 1, 1], [], []>} : vector<1x8xf32>, vector<8x8xf32>, vector<1x8xf32> -> vector<1x8xf32>
    %108 = arith.negf %107 : vector<1x8xf32>
    %109 = math.exp %108 : vector<1x8xf32>
    %cst_117 = arith.constant 1.000000e+00 : f32
    %110 = vector.broadcast %cst_117 : f32 to vector<1x8xf32>
    %111 = arith.addf %110, %109 : vector<1x8xf32>
    %112 = arith.divf %110, %111 : vector<1x8xf32>
    %113 = vector.shape_cast %3 : vector<16x16x4xf32> to vector<256x4xf32>
    %c0_118 = arith.constant 0 : index
    %c0_119 = arith.constant 0 : index
    %114 = vector.load %arg6[%c0_118, %c0_119] : memref<4x8xf32, #tpu.memory_space<vmem>>, vector<4x8xf32>
    %cst_120 = arith.constant dense<0.000000e+00> : vector<256x8xf32>
    %115 = tpu.matmul %113, %114, %cst_120 {dimension_numbers = #tpu.dot_dimension_numbers<[1], [0], [0], [1], [0, 0, 1, 1], [], []>} : vector<256x4xf32>, vector<4x8xf32>, vector<256x8xf32> -> vector<256x8xf32>
    %c0_121 = arith.constant 0 : index
    %c0_122 = arith.constant 0 : index
    %116 = vector.load %arg7[%c0_121, %c0_122] : memref<1x8xf32, #tpu.memory_space<vmem>>, vector<1x8xf32>
    %117 = vector.broadcast %116 : vector<1x8xf32> to vector<256x8xf32>
    %118 = arith.addf %115, %117 : vector<256x8xf32>
    %119 = vector.broadcast %112 : vector<1x8xf32> to vector<256x8xf32>
    %120 = arith.mulf %79, %119 : vector<256x8xf32>
    %121 = arith.addf %120, %118 : vector<256x8xf32>
    %122 = vector.shape_cast %121 : vector<256x8xf32> to vector<1x16x16x8xf32>
    %c0_123 = arith.constant 0 : index
    %c0_124 = arith.constant 0 : index
    %c0_125 = arith.constant 0 : index
    %c0_126 = arith.constant 0 : index
    %123 = vector.load %arg9[%c0_123, %c0_124, %c0_125, %c0_126] : memref<1x16x16x8xf32, #tpu.memory_space<vmem>>, vector<1x16x16x8xf32>
    tpu.vector_store %arg9[%c0_123, %c0_124, %c0_125, %c0_126], %122 {strides = array<i32>} : memref<1x16x16x8xf32, #tpu.memory_space<vmem>>, vector<1x16x16x8xf32>,
    return
  }
  func.func @transform_0(%arg0: i32) -> (i32, i32, i32, i32) {
    %c0_i32 = arith.constant 0 : i32
    %c0_i32_0 = arith.constant 0 : i32
    %c0_i32_1 = arith.constant 0 : i32
    %c0_i32_2 = arith.constant 0 : i32
    return %arg0, %c0_i32, %c0_i32_0, %c0_i32_1 : i32, i32, i32, i32
  }
  func.func @transform_1(%arg0: i32) -> (i32, i32) {
    %c0_i32 = arith.constant 0 : i32
    %c0_i32_0 = arith.constant 0 : i32
    %c0_i32_1 = arith.constant 0 : i32
    return %c0_i32, %c0_i32_0 : i32, i32
  }
  func.func @transform_2(%arg0: i32) -> (i32, i32) {
    %c0_i32 = arith.constant 0 : i32
    %c0_i32_0 = arith.constant 0 : i32
    %c0_i32_1 = arith.constant 0 : i32
    return %c0_i32, %c0_i32_0 : i32, i32
  }
  func.func @transform_3(%arg0: i32) -> (i32, i32) {
    %c0_i32 = arith.constant 0 : i32
    %c0_i32_0 = arith.constant 0 : i32
    %c0_i32_1 = arith.constant 0 : i32
    return %c0_i32, %c0_i32_0 : i32, i32
  }
  func.func @transform_4(%arg0: i32) -> (i32, i32) {
    %c0_i32 = arith.constant 0 : i32
    %c0_i32_0 = arith.constant 0 : i32
    %c0_i32_1 = arith.constant 0 : i32
    return %c0_i32, %c0_i32_0 : i32, i32
  }
  func.func @transform_5(%arg0: i32) -> (i32, i32) {
    %c0_i32 = arith.constant 0 : i32
    %c0_i32_0 = arith.constant 0 : i32
    %c0_i32_1 = arith.constant 0 : i32
    return %c0_i32, %c0_i32_0 : i32, i32
  }
  func.func @transform_6(%arg0: i32) -> (i32, i32) {
    %c0_i32 = arith.constant 0 : i32
    %c0_i32_0 = arith.constant 0 : i32
    %c0_i32_1 = arith.constant 0 : i32
    return %c0_i32, %c0_i32_0 : i32, i32
  }
  func.func @transform_7(%arg0: i32) -> i32 {
    %c0_i32 = arith.constant 0 : i32
    %c0_i32_0 = arith.constant 0 : i32
    return %c0_i32 : i32
  }
  func.func @transform_8(%arg0: i32) -> (i32, i32, i32, i32) {
    %c0_i32 = arith.constant 0 : i32
    %c0_i32_0 = arith.constant 0 : i32
    %c0_i32_1 = arith.constant 0 : i32
    %c0_i32_2 = arith.constant 0 : i32
    return %arg0, %c0_i32, %c0_i32_0, %c0_i32_1 : i32, i32, i32, i32
  }
}

</mosaic_0001>

<bundles_post_ra>
// kernel: res_conv_fixed_forward.1
= control target key start
LH: loop header
LB: loop body
LE: loop exit
PB: predicated region body
PF: predicated region fallthrough
CT: control target
= control target key end

     0   :  { %13 = vsyncpa [#allocation6], 0  ;;  %s5819_s27 = smov 0   ;;  %s8369_s0 = inlined_call_operand.vmem [shape: f32[2,16,16,4], index: 0, kind: input, shape index: {}]   ;;  %s8370_s1 = inlined_call_operand.vmem [shape: f32[36,8], index: 1, kind: input, shape index: {}]   ;;  %s8371_s2 = inlined_call_operand.vmem [shape: f32[1,8], index: 2, kind: input, shape index: {}]   ;;  %s8372_s3 = inlined_call_operand.vmem [shape: f32[72,8], index: 3, kind: input, shape index: {}]   ;;  %s8373_s4 = inlined_call_operand.vmem [shape: f32[1,8], index: 4, kind: input, shape index: {}]   ;;  %s8374_s5 = inlined_call_operand.vmem [shape: f32[4,8], index: 5, kind: input, shape index: {}]   ;;  %s8375_s6 = inlined_call_operand.vmem [shape: f32[1,8], index: 6, kind: input, shape index: {}]   ;;  %s8376_s7 = inlined_call_operand.vmem [shape: f32[3], index: 7, kind: input, shape index: {}]   ;;  %s8377_s8 = inlined_call_operand.vmem [shape: f32[2,16,16,8], index: 8, kind: output, shape index: {}]  }
   0x1 LB: > { %s5825_s28 = sadd.s32 4294967295, %s5757_s27   ;;  %p5254_p0 = scmp.ge.s32.totalorder %s5757_s27, 1  ;;  %s5757_s27 = sphi %s5819_s27, %s19_s27  }
   0x2   : > { %p223_p1 = scmp.lt.s32.totalorder %s5757_s27, 3  ;;  %s254_s9 = sshll.u32 %s8376_s7, 4  ;;  %s255_s9 = int_to_ptr.vmem [resolvable:$true] %s254_s9 }
   0x3   : > { %p5702_p3 = scmp.eq.s32.totalorder %s5825_s28, 0  ;;  %s5732_s11 = scalar_lea.vmem %s255_s9, 16 }
   0x4   : > { %p5832_p2 = pnand %p5254_p0, %p223_p1  ;;  %p5733_p6 = scmp.ne.s32.totalorder %s255_s9, %s5732_s11 }
   0x5   : > { %p5740_p10 = scmp.lt.s32.totalorder %s255_s9, %s255_s9  ;;  %p5741_p11 = scmp.lt.s32.totalorder %s5732_s11, %s5732_s11 }
   0x6   : > { %p5698_p4 = pneg %p5832_p2 }
   0x7   : > { %p5742_p12 = por %p5741_p11, %p5740_p10 }
   0x8   : > { %p5699_p5 = pnand %p5702_p3, %p5698_p4 }
   0xa   : > { %p5734_p7 = pneg %p5699_p5 }
   0xc   : > { %p5735_p8 = pnand %p5734_p7, %p5733_p6 }
   0xe   : > { %p5736_p9 = pneg %p5735_p8 }
  0x10   : > { %p5743_p13 = pnand %p5742_p12, %p5736_p9 }
  0x12   : > { %5746 = shalt.err (!%p5743_p13)
}
  0x13   : > { %s5759_s12 = smov [#allocation5]   ;;  %275 = sbr.rel (%p5832_p2) target bundleno = 1724 (0x6bc), region = 52 }
  0x14   : > { %5701 = dma.vmem_to_smem (!%p5699_p5), %s255_s9, 16, %s5759_s12, [#allocation6]  }
  0x1a   : > { %5752 = dma.done.wait (%p5702_p3), [#allocation6], 16  }
  0x1b   : > { %5754 = vsyncadd (%p5702_p3), [#allocation6], 4294967280 }
  0x1c   : > { %281 = sfence }
  0x1d   : > { %vm320_vm0 = vcmask 31744   ;;  %vm323_vm1 = vcmask 25600   ;;  %p310_p0 = scmp.lt.s32.totalorder %s5825_s28, 1  ;;  %v8378_v0 = vmov 0.0   ;;  %s5761_s17 = smov 4   ;;  %vm2191_vm2 = vcmask 1043456  }
  0x1e   : > { %321 = vst.msk [vmem:[#allocation2] sm:$0xff] %vm320_vm0, %v8378_v0  ;;  %322 = vst.msk [vmem:[#allocation2 + $0x8] sm:$0xff] %vm320_vm0, %v8378_v0  ;;  %s5762_s18 = smov 8   ;;  %s5763_s19 = smov 12   ;;  %vm665_vm3 = vcmask 64544   ;;  %vm858_vm4 = vcmask 97344  }
  0x1f   : > { %325 = vst.msk [vmem:[#allocation2 + $0x18] sm:$0xff] %vm320_vm0, %v8378_v0  ;;  %326 = vst.msk [vmem:[#allocation2 + $0x20] sm:$0xff] %vm320_vm0, %v8378_v0  ;;  %s8437_s28 = smov (!%p310_p0, %s5825_s28), 1  ;;  %s5764_s20 = smov 16   ;;  %vm1051_vm5 = vcmask 130144   ;;  %vm1244_vm6 = vcmask 162944  }
  0x20   : > { %328 = vst.msk [vmem:[#allocation2 + $0x30] sm:$0xff] %vm320_vm0, %v8378_v0  ;;  %329 = vst.msk [vmem:[#allocation2 + $0x38] sm:$0xff] %vm320_vm0, %v8378_v0  ;;  %s5370_s13 = sshll.u32 %s8437_s28, 8  ;;  %s5765_s21 = smov 20   ;;  %vm1437_vm7 = vcmask 195744   ;;  %vm1631_vm8 = vcmask 228544  }
  0x21   : > { %331 = vst.msk [vmem:[#allocation2 + $0x48] sm:$0xff] %vm320_vm0, %v8378_v0  ;;  %332 = vst.msk [vmem:[#allocation2 + $0x50] sm:$0xff] %vm320_vm0, %v8378_v0  ;;  %s5967_s16 = scalar_lea.vmem %s8369_s0, %s5370_s13  ;;  %s5766_s22 = smov 24   ;;  %vm1824_vm9 = vcmask 261344   ;;  %vm2017_vm10 = vcmask 294144   ;;  %vm2094_vm11 = vcmask 293888  }
  0x22   : > { %334 = vst.msk [vmem:[#allocation2 + $0x60] sm:$0xff] %vm320_vm0, %v8378_v0  ;;  %335 = vst.msk [vmem:[#allocation2 + $0x68] sm:$0xff] %vm320_vm0, %v8378_v0  ;;  %v5970_v1 = vld [vmem:[%s5967_s16] sm:$0xff]  ;;  %v5973_v2 = vld [vmem:[%s5967_s16 + $0x10] sm:$0xff]  ;;  %s5767_s23 = smov 28   ;;  %s5768_s12 = smov 32  }
  0x23   : > { %337 = vst.msk [vmem:[#allocation2 + $0x78] sm:$0xff] %vm320_vm0, %v8378_v0  ;;  %338 = vst.msk [vmem:[#allocation2 + $0x80] sm:$0xff] %vm320_vm0, %v8378_v0  ;;  %v5976_v3 = vld [vmem:[%s5967_s16 + $0x8] sm:$0xff]  ;;  %v5985_v4 = vld [vmem:[%s5967_s16 + $0x20] sm:$0xff]  ;;  %vm2516_vm12 = vcmask 64512   ;;  %vm2519_vm13 = vcmask 58368  }
  0x24   : > { %340 = vst.msk [vmem:[#allocation2 + $0x90] sm:$0xff] %vm320_vm0, %v8378_v0  ;;  %341 = vst.msk [vmem:[#allocation2 + $0x98] sm:$0xff] %vm320_vm0, %v8378_v0  ;;  %v5988_v5 = vld [vmem:[%s5967_s16 + $0x18] sm:$0xff]  ;;  %v5991_v6 = vld [vmem:[%s5967_s16 + $0x30] sm:$0xff]  ;;  %s5770_s26 = smov 48   ;;  %s5772_s29 = smov 64  }
  0x25   : > { %343 = vst.msk [vmem:[#allocation2 + $0xa8] sm:$0xff] %vm320_vm0, %v8378_v0  ;;  %344 = vst.msk [vmem:[#allocation2 + $0xb0] sm:$0xff] %vm320_vm0, %v8378_v0  ;;  %v505_v7 = vld [vmem:[#allocation2 + $0x1] sm:$0xff]  ;;  %v6009_v11 = vld [vmem:[%s5967_s16 + $0x38] sm:$0xff] }
  0x26   : > { %346 = vst.msk [vmem:[#allocation2 + $0xc0] sm:$0xff] %vm320_vm0, %v8378_v0  ;;  %347 = vst.msk [vmem:[#allocation2 + $0xc8] sm:$0xff] %vm320_vm0, %v8378_v0  ;;  %v6000_v9 = vld [vmem:[%s5967_s16 + $0x28] sm:$0xff]  ;;  %569 = vrot.lane.b32.xlu0 %v505_v7, %s5761_s17  ;;  %v6006_v10 = vld [vmem:[%s5967_s16 + $0x40] sm:$0xff] }
  0x27   : > { %349 = vst.msk [vmem:[#allocation2 + $0xd8] sm:$0xff] %vm320_vm0, %v8378_v0  ;;  %350 = vst.msk [vmem:[#allocation2 + $0xe0] sm:$0xff] %vm320_vm0, %v8378_v0  ;;  %v6012_v12 = vld [vmem:[%s5967_s16 + $0x50] sm:$0xff]  ;;  %v6021_v13 = vld [vmem:[%s5967_s16 + $0x48] sm:$0xff] }
  0x28   : > { %352 = vst.msk [vmem:[#allocation2 + $0xf0] sm:$0xff] %vm320_vm0, %v8378_v0  ;;  %353 = vst.msk [vmem:[#allocation2 + $0xf8] sm:$0xff] %vm320_vm0, %v8378_v0  ;;  %v6024_v14 = vld [vmem:[%s5967_s16 + $0x60] sm:$0xff]  ;;  %v6027_v15 = vld [vmem:[%s5967_s16 + $0x58] sm:$0xff] }
  0x29   : > { %355 = vst.msk [vmem:[#allocation2 + $0x108] sm:$0xff] %vm320_vm0, %v8378_v0  ;;  %356 = vst.msk [vmem:[#allocation2 + $0x110] sm:$0xff] %vm320_vm0, %v8378_v0  ;;  %v6036_v16 = vld [vmem:[%s5967_s16 + $0x70] sm:$0xff]  ;;  %v6039_v17 = vld [vmem:[%s5967_s16 + $0x68] sm:$0xff] }
  0x2a   : > { %358 = vst.msk [vmem:[#allocation2 + $0x120] sm:$0xff] %vm320_vm0, %v8378_v0  ;;  %359 = vst.msk [vmem:[#allocation2 + $0x128] sm:$0xff] %vm320_vm0, %v8378_v0  ;;  %v6042_v18 = vld [vmem:[%s5967_s16 + $0x80] sm:$0xff]  ;;  %v6051_v19 = vld [vmem:[%s5967_s16 + $0x78] sm:$0xff] }
  0x2b   : > { %361 = vst.msk [vmem:[#allocation2 + $0x138] sm:$0xff] %vm320_vm0, %v8378_v0  ;;  %362 = vst.msk [vmem:[#allocation2 + $0x140] sm:$0xff] %vm320_vm0, %v8378_v0  ;;  %v6054_v20 = vld [vmem:[%s5967_s16 + $0x90] sm:$0xff]  ;;  %v6057_v21 = vld [vmem:[%s5967_s16 + $0x88] sm:$0xff] }
  0x2c   : > { %364 = vst.msk [vmem:[#allocation2 + $0x150] sm:$0xff] %vm320_vm0, %v8378_v0  ;;  %365 = vst.msk [vmem:[#allocation2 + $0x158] sm:$0xff] %vm320_vm0, %v8378_v0  ;;  %v6067_v22 = vld [vmem:[%s5967_s16 + $0xa0] sm:$0xff]  ;;  %v6070_v23 = vld [vmem:[%s5967_s16 + $0x98] sm:$0xff] }
  0x2d   : > { %367 = vst.msk [vmem:[#allocation2 + $0x168] sm:$0xff] %vm320_vm0, %v8378_v0  ;;  %368 = vst.msk [vmem:[#allocation2 + $0x170] sm:$0xff] %vm320_vm0, %v8378_v0  ;;  %v6073_v24 = vld [vmem:[%s5967_s16 + $0xb0] sm:$0xff]  ;;  %v6090_v28 = vld [vmem:[%s5967_s16 + $0xa8] sm:$0xff] }
  0x2e   : > { %370 = vst.msk [vmem:[#allocation2 + $0x180] sm:$0xff] %vm320_vm0, %v8378_v0  ;;  %371 = vst.msk [vmem:[#allocation2 + $0x188] sm:$0xff] %vm320_vm0, %v8378_v0  ;;  %v6093_v29 = vld [vmem:[%s5967_s16 + $0xc0] sm:$0xff]  ;;  %v6112_v33 = vld [vmem:[%s5967_s16 + $0xb8] sm:$0xff] }
  0x2f   : > { %373 = vst.msk [vmem:[#allocation2 + $0x198] sm:$0xff] %vm320_vm0, %v8378_v0  ;;  %374 = vst.msk [vmem:[#allocation2 + $0x1a0] sm:$0xff] %vm320_vm0, %v8378_v0  ;;  %v6115_v34 = vld [vmem:[%s5967_s16 + $0xd0] sm:$0xff]  ;;  %v6118_v35 = vld [vmem:[%s5967_s16 + $0xc8] sm:$0xff] }
  0x30   : > { %324 = vst.msk [vmem:[#allocation2 + $0x10] sm:$0x3] %vm323_vm1, %v8378_v0  ;;  %327 = vst.msk [vmem:[#allocation2 + $0x28] sm:$0x3] %vm323_vm1, %v8378_v0  ;;  %v6129_v36 = vld [vmem:[%s5967_s16 + $0xe0] sm:$0xff]  ;;  %v6132_v37 = vld [vmem:[%s5967_s16 + $0xd8] sm:$0xff] }
  0x31   : > { %330 = vst.msk [vmem:[#allocation2 + $0x40] sm:$0x3] %vm323_vm1, %v8378_v0  ;;  %333 = vst.msk [vmem:[#allocation2 + $0x58] sm:$0x3] %vm323_vm1, %v8378_v0  ;;  %v6141_v39 = vld [vmem:[%s5967_s16 + $0xe8] sm:$0xff]  ;;  %v441_v46 = vld [vmem:[#allocation2] sm:$0xff] }
  0x32   : > { %336 = vst.msk [vmem:[#allocation2 + $0x70] sm:$0x3] %vm323_vm1, %v8378_v0  ;;  %339 = vst.msk [vmem:[#allocation2 + $0x88] sm:$0x3] %vm323_vm1, %v8378_v0  ;;  %v442_v48 = vld [vmem:[#allocation2 + $0x8] sm:$0xff] }
  0x33   : > { %342 = vst.msk [vmem:[#allocation2 + $0xa0] sm:$0x3] %vm323_vm1, %v8378_v0  ;;  %345 = vst.msk [vmem:[#allocation2 + $0xb8] sm:$0x3] %vm323_vm1, %v8378_v0 }
  0x34   : > { %348 = vst.msk [vmem:[#allocation2 + $0xd0] sm:$0x3] %vm323_vm1, %v8378_v0  ;;  %351 = vst.msk [vmem:[#allocation2 + $0xe8] sm:$0x3] %vm323_vm1, %v8378_v0 }
  0x35   : > { %354 = vst.msk [vmem:[#allocation2 + $0x100] sm:$0x3] %vm323_vm1, %v8378_v0  ;;  %357 = vst.msk [vmem:[#allocation2 + $0x118] sm:$0x3] %vm323_vm1, %v8378_v0 }
  0x36   : > { %360 = vst.msk [vmem:[#allocation2 + $0x130] sm:$0x3] %vm323_vm1, %v8378_v0  ;;  %363 = vst.msk [vmem:[#allocation2 + $0x148] sm:$0x3] %vm323_vm1, %v8378_v0 }
  0x37   : > { %366 = vst.msk [vmem:[#allocation2 + $0x160] sm:$0x3] %vm323_vm1, %v8378_v0  ;;  %369 = vst.msk [vmem:[#allocation2 + $0x178] sm:$0x3] %vm323_vm1, %v8378_v0  ;;  %v506_v8 = vld [vmem:[#allocation2 + $0x9] sm:$0xff] }
  0x38   : > { %372 = vst.msk [vmem:[#allocation2 + $0x190] sm:$0x3] %vm323_vm1, %v8378_v0  ;;  %375 = vst.msk [vmem:[#allocation2 + $0x1a8] sm:$0x3] %vm323_vm1, %v8378_v0  ;;  %571 = vrot.lane.b32.xlu0 %v506_v8, %s5761_s17 }
  0x39   : > { %409 = vst.msk [vmem:[#allocation2 + $0x19] sm:$0xff] %vm320_vm0, %v5970_v1  ;;  %411 = vst.msk [vmem:[#allocation2 + $0x31] sm:$0xff] %vm320_vm0, %v5973_v2 }
  0x3a   : > { %410 = vst.msk [vmem:[#allocation2 + $0x21] sm:$0xff] %vm320_vm0, %v5976_v3  ;;  %413 = vst.msk [vmem:[#allocation2 + $0x49] sm:$0xff] %vm320_vm0, %v5985_v4 }
  0x3b   : > { %412 = vst.msk [vmem:[#allocation2 + $0x39] sm:$0xff] %vm320_vm0, %v5988_v5  ;;  %415 = vst.msk [vmem:[#allocation2 + $0x61] sm:$0xff] %vm320_vm0, %v5991_v6 }
  0x3c   : > { %414 = vst.msk [vmem:[#allocation2 + $0x51] sm:$0xff] %vm320_vm0, %v6000_v9  ;;  %417 = vst.msk [vmem:[#allocation2 + $0x79] sm:$0xff] %vm320_vm0, %v6006_v10 }
  0x3d   : > { %416 = vst.msk [vmem:[#allocation2 + $0x69] sm:$0xff] %vm320_vm0, %v6009_v11  ;;  %419 = vst.msk [vmem:[#allocation2 + $0x91] sm:$0xff] %vm320_vm0, %v6012_v12 }
  0x3e   : > { %418 = vst.msk [vmem:[#allocation2 + $0x81] sm:$0xff] %vm320_vm0, %v6021_v13  ;;  %421 = vst.msk [vmem:[#allocation2 + $0xa9] sm:$0xff] %vm320_vm0, %v6024_v14 }
  0x3f   : > { %420 = vst.msk [vmem:[#allocation2 + $0x99] sm:$0xff] %vm320_vm0, %v6027_v15  ;;  %8399 = vst [vmem:[#allocation8_spill] sm:$0xff] %v6036_v16 }
  0x40   : > { %8400 = vst [vmem:[#allocation9_spill] sm:$0xff] %v6042_v18  ;;  %423 = vst.msk [vmem:[#allocation2 + $0xc1] sm:$0xff] %vm320_vm0, %v6036_v16  ;;  %v6075_v25 = vld [vmem:[#allocation2 + $0x19] sm:$0xff]  ;;  %v6077_v26 = vld [vmem:[#allocation2 + $0x31] sm:$0xff] }
  0x41   : > { %422 = vst.msk [vmem:[#allocation2 + $0xb1] sm:$0xff] %vm320_vm0, %v6039_v17  ;;  %425 = vst.msk [vmem:[#allocation2 + $0xd9] sm:$0xff] %vm320_vm0, %v6042_v18  ;;  %573 = vrot.lane.b32.xlu1 %v6075_v25, %s5761_s17  ;;  %v6087_v27 = vld [vmem:[#allocation2 + $0x21] sm:$0xff]  ;;  %577 = vrot.lane.b32.xlu0 %v6077_v26, %s5761_s17  ;;  %v6101_v30 = vld [vmem:[#allocation2 + $0x49] sm:$0xff] }
  0x42   : > { %8401 = vst [vmem:[#allocation10_spill] sm:$0xff] %v6051_v19  ;;  %8402 = vst [vmem:[#allocation11_spill] sm:$0xff] %v6054_v20  ;;  %v6105_v31 = vld [vmem:[#allocation2 + $0x39] sm:$0xff]  ;;  %v6109_v32 = vld [vmem:[#allocation2 + $0x61] sm:$0xff] }
  0x43   : > { %8403 = vst [vmem:[#allocation12_spill] sm:$0xff] %v6057_v21  ;;  %424 = vst.msk [vmem:[#allocation2 + $0xc9] sm:$0xff] %vm320_vm0, %v6051_v19  ;;  %v6134_v38 = vld [vmem:[#allocation2 + $0x51] sm:$0xff]  ;;  %v6147_v40 = vld [vmem:[#allocation2 + $0x79] sm:$0xff] }
  0x44   : > { %427 = vst.msk [vmem:[#allocation2 + $0xf1] sm:$0xff] %vm320_vm0, %v6054_v20  ;;  %426 = vst.msk [vmem:[#allocation2 + $0xe1] sm:$0xff] %vm320_vm0, %v6057_v21  ;;  %v6149_v41 = vld [vmem:[#allocation2 + $0x69] sm:$0xff]  ;;  %v6153_v42 = vld [vmem:[#allocation2 + $0x20] sm:$0xff] }
  0x45   : > { %8404 = vst [vmem:[#allocation13_spill] sm:$0xff] %v6067_v22  ;;  %8405 = vst [vmem:[#allocation14_spill] sm:$0xff] %v6070_v23  ;;  %575 = vrot.lane.b32.xlu1 %v6087_v27, %s5761_s17  ;;  %581 = vrot.lane.b32.xlu0 %v6101_v30, %s5761_s17  ;;  %v6155_v43 = vld [vmem:[#allocation2 + $0x18] sm:$0xff]  ;;  %v6157_v44 = vld [vmem:[#allocation2 + $0x30] sm:$0xff] }
  0x46   : > { %8406 = vst [vmem:[#allocation15_spill] sm:$0xff] %v6073_v24  ;;  %429 = vst.msk [vmem:[#allocation2 + $0x109] sm:$0xff] %vm320_vm0, %v6067_v22  ;;  %v6159_v45 = vld [vmem:[#allocation2 + $0x38] sm:$0xff]  ;;  %v6161_v47 = vld [vmem:[#allocation2 + $0x48] sm:$0xff] }
  0x47   : > { %428 = vst.msk [vmem:[#allocation2 + $0xf9] sm:$0xff] %vm320_vm0, %v6070_v23  ;;  %431 = vst.msk [vmem:[#allocation2 + $0x121] sm:$0xff] %vm320_vm0, %v6073_v24  ;;  %v6172_v49 = vld [vmem:[#allocation2 + $0x50] sm:$0xff]  ;;  %v6178_v50 = vld [vmem:[#allocation2 + $0x60] sm:$0xff] }
  0x48   : > { %8407 = vst [vmem:[#allocation16_spill] sm:$0xff] %v6090_v28  ;;  %8408 = vst [vmem:[#allocation17_spill] sm:$0xff] %v6093_v29  ;;  %v6180_v51 = vld [vmem:[#allocation2 + $0x91] sm:$0xff]  ;;  %v6191_v53 = vld [vmem:[#allocation2 + $0x81] sm:$0xff] }
  0x49   : > { %430 = vst.msk [vmem:[#allocation2 + $0x111] sm:$0xff] %vm320_vm0, %v6090_v28  ;;  %433 = vst.msk [vmem:[#allocation2 + $0x139] sm:$0xff] %vm320_vm0, %v6093_v29  ;;  %579 = vrot.lane.b32.xlu1 %v6105_v31, %s5761_s17  ;;  %585 = vrot.lane.b32.xlu0 %v6109_v32, %s5761_s17  ;;  %v6189_v52 = vld [vmem:[#allocation2 + $0x78] sm:$0xff]  ;;  %v6193_v54 = vld [vmem:[#allocation2 + $0xa9] sm:$0xff] }
  0x4a   : > { %8409 = vst [vmem:[#allocation18_spill] sm:$0xff] %v6112_v33  ;;  %8410 = vst [vmem:[#allocation19_spill] sm:$0xff] %v6115_v34  ;;  %v6197_v55 = vld [vmem:[#allocation2 + $0x68] sm:$0xff]  ;;  %v6203_v56 = vld [vmem:[#allocation2 + $0x90] sm:$0xff] }
  0x4b   : > { %8411 = vst [vmem:[#allocation20_spill] sm:$0xff] %v6118_v35  ;;  %432 = vst.msk [vmem:[#allocation2 + $0x129] sm:$0xff] %vm320_vm0, %v6112_v33  ;;  %v6205_v57 = vld [vmem:[#allocation2 + $0x80] sm:$0xff]  ;;  %v6207_v58 = vld [vmem:[#allocation2 + $0xa8] sm:$0xff] }
  0x4c   : > { %435 = vst.msk [vmem:[#allocation2 + $0x151] sm:$0xff] %vm320_vm0, %v6115_v34  ;;  %434 = vst.msk [vmem:[#allocation2 + $0x141] sm:$0xff] %vm320_vm0, %v6118_v35  ;;  %v6215_v59 = vld [vmem:[#allocation2 + $0x98] sm:$0xff]  ;;  %v6217_v60 = vld [vmem:[#allocation2 + $0xc0] sm:$0xff] }
  0x4d   : > { %8412 = vst [vmem:[#allocation21_spill] sm:$0xff] %v6129_v36  ;;  %8413 = vst [vmem:[#allocation22_spill] sm:$0xff] %v6132_v37  ;;  %583 = vrot.lane.b32.xlu1 %v6134_v38, %s5761_s17  ;;  %589 = vrot.lane.b32.xlu0 %v6147_v40, %s5761_s17  ;;  %v6219_v61 = vld [vmem:[#allocation2 + $0xb0] sm:$0xff]  ;;  %v6229_v62 = vld [vmem:[#allocation2 + $0xd8] sm:$0xff] }
  0x4e   : > { %437 = vst.msk [vmem:[#allocation2 + $0x169] sm:$0xff] %vm320_vm0, %v6129_v36  ;;  %436 = vst.msk [vmem:[#allocation2 + $0x159] sm:$0xff] %vm320_vm0, %v6132_v37  ;;  %v6231_v63 = vld [vmem:[#allocation2 + $0xc8] sm:$0xff]  ;;  %v6233_v7 = vld [vmem:[#allocation2 + $0xf0] sm:$0xff] }
  0x4f   : > { %8414 = vst [vmem:[#allocation23_spill] sm:$0xff] %v6141_v39  ;;  %438 = vst.msk [vmem:[#allocation2 + $0x171] sm:$0xff] %vm320_vm0, %v6141_v39  ;;  %v6235_v8 = vld [vmem:[#allocation2 + $0x99] sm:$0xff]  ;;  %v6251_v0 = vld [vmem:[#allocation2 + $0x108] sm:$0xff] }
  0x50   : > { %475 = vst.msk [vmem:[#allocation4 + $0x10] sm:$0xff] %vm320_vm0, %v6155_v43  ;;  %477 = vst.msk [vmem:[#allocation4 + $0x20] sm:$0xff] %vm320_vm0, %v6157_v44  ;;  %v6257_v39 = vld [vmem:[#allocation2 + $0xb1] sm:$0xff]  ;;  %v523_v37 = vld [vmem:[#allocation2 + $0xd9] sm:$0xff] }
  0x51   : > { %476 = vst.msk [vmem:[#allocation4 + $0x18] sm:$0xff] %vm320_vm0, %v6153_v42  ;;  %473 = vst.msk [vmem:[#allocation4] sm:$0xff] %vm320_vm0, %v441_v46  ;;  %587 = vrot.lane.b32.xlu1 %v6149_v41, %s5761_s17  ;;  %593 = vrot.lane.b32.xlu0 %v6180_v51, %s5761_s17  ;;  %v6243_v46 = vld [vmem:[#allocation2 + $0xe0] sm:$0xff]  ;;  %v6259_v36 = vld [vmem:[#allocation2 + $0xf8] sm:$0xff] }
  0x52   : > { %479 = vst.msk [vmem:[#allocation4 + $0x30] sm:$0xff] %vm320_vm0, %v6161_v47  ;;  %478 = vst.msk [vmem:[#allocation4 + $0x28] sm:$0xff] %vm320_vm0, %v6159_v45  ;;  %v6265_v34 = vld [vmem:[#allocation2 + $0x120] sm:$0xff]  ;;  %v6271_v35 = vld [vmem:[#allocation2 + $0xc9] sm:$0xff] }
  0x53   : > { %474 = vst.msk [vmem:[#allocation4 + $0x8] sm:$0xff] %vm320_vm0, %v442_v48  ;;  %481 = vst.msk [vmem:[#allocation4 + $0x40] sm:$0xff] %vm320_vm0, %v6178_v50  ;;  %v6249_v48 = vld [vmem:[#allocation2 + $0xc1] sm:$0xff]  ;;  %v6273_v29 = vld [vmem:[#allocation2 + $0x110] sm:$0xff] }
  0x54   : > { %480 = vst.msk [vmem:[#allocation4 + $0x38] sm:$0xff] %vm320_vm0, %v6172_v49  ;;  %483 = vst.msk [vmem:[#allocation4 + $0x50] sm:$0xff] %vm320_vm0, %v6189_v52  ;;  %v525_v33 = vld [vmem:[#allocation2 + $0xf1] sm:$0xff]  ;;  %v524_v28 = vld [vmem:[#allocation2 + $0xe1] sm:$0xff] }
  0x55   : > { %482 = vst.msk [vmem:[#allocation4 + $0x48] sm:$0xff] %vm320_vm0, %v6197_v55  ;;  %485 = vst.msk [vmem:[#allocation4 + $0x60] sm:$0xff] %vm320_vm0, %v6203_v56  ;;  %591 = vrot.lane.b32.xlu1 %v6191_v53, %s5761_s17  ;;  %597 = vrot.lane.b32.xlu0 %v6193_v54, %s5761_s17  ;;  %v467_v24 = vld [vmem:[#allocation2 + $0x138] sm:$0xff]  ;;  %v6281_v22 = vld [vmem:[#allocation2 + $0x128] sm:$0xff] }
  0x56   : > { %484 = vst.msk [vmem:[#allocation4 + $0x58] sm:$0xff] %vm320_vm0, %v6205_v57  ;;  %487 = vst.msk [vmem:[#allocation4 + $0x70] sm:$0xff] %vm320_vm0, %v6207_v58  ;;  %v527_v23 = vld [vmem:[#allocation2 + $0x109] sm:$0xff]  ;;  %v526_v20 = vld [vmem:[#allocation2 + $0xf9] sm:$0xff] }
  0x57   : > { %486 = vst.msk [vmem:[#allocation4 + $0x68] sm:$0xff] %vm320_vm0, %v6215_v59  ;;  %489 = vst.msk [vmem:[#allocation4 + $0x80] sm:$0xff] %vm320_vm0, %v6217_v60  ;;  %v6288_v21 = vld [vmem:[#allocation2 + $0x140] sm:$0xff]  ;;  %v471_v18 = vld [vmem:[#allocation2 + $0x168] sm:$0xff] }
  0x58   : > { %488 = vst.msk [vmem:[#allocation4 + $0x78] sm:$0xff] %vm320_vm0, %v6219_v61  ;;  %491 = vst.msk [vmem:[#allocation4 + $0x90] sm:$0xff] %vm320_vm0, %v6229_v62  ;;  %v470_v19 = vld [vmem:[#allocation2 + $0x158] sm:$0xff] }
  0x59   : > { %490 = vst.msk [vmem:[#allocation4 + $0x88] sm:$0xff] %vm320_vm0, %v6231_v63  ;;  %493 = vst.msk [vmem:[#allocation4 + $0xa0] sm:$0xff] %vm320_vm0, %v6233_v7  ;;  %595 = vrot.lane.b32.xlu1 %v6235_v8, %s5761_s17  ;;  %601 = vrot.lane.b32.xlu0 %v6249_v48, %s5761_s17  ;;  %v533_v16 = vld [vmem:[#allocation2 + $0x151] sm:$0xff] }
  0x5a   : > { %492 = vst.msk [vmem:[#allocation4 + $0x98] sm:$0xff] %vm320_vm0, %v6243_v46  ;;  %495 = vst.msk [vmem:[#allocation4 + $0xb0] sm:$0xff] %vm320_vm0, %v6251_v0 }
  0x5b   : > { %494 = vst.msk [vmem:[#allocation4 + $0xa8] sm:$0xff] %vm320_vm0, %v6259_v36  ;;  %497 = vst.msk [vmem:[#allocation4 + $0xc0] sm:$0xff] %vm320_vm0, %v6265_v34 }
  0x5c   : > { %496 = vst.msk [vmem:[#allocation4 + $0xb8] sm:$0xff] %vm320_vm0, %v6273_v29  ;;  %499 = vst.msk [vmem:[#allocation4 + $0xd0] sm:$0xff] %vm320_vm0, %v467_v24  ;;  %v529_v24 = vld [vmem:[#allocation2 + $0x121] sm:$0xff] }
  0x5d   : > { %599 = vrot.lane.b32.xlu1 %v6257_v39, %s5761_s17  ;;  %605 = vrot.lane.b32.xlu0 %v523_v37, %s5761_s17  ;;  %498 = vst.msk [vmem:[#allocation4 + $0xc8] sm:$0xff] %vm320_vm0, %v6281_v22  ;;  %v469_v37 = vld [vmem:[#allocation2 + $0x150] sm:$0xff]  ;;  %500 = vst.msk [vmem:[#allocation4 + $0xd8] sm:$0xff] %vm320_vm0, %v6288_v21 }
  0x5e   : > { %501 = vst.msk [vmem:[#allocation4 + $0xe0] sm:$0xff] %vm320_vm0, %v469_v37  ;;  %503 = vst.msk [vmem:[#allocation4 + $0xf0] sm:$0xff] %vm320_vm0, %v471_v18  ;;  %v530_v37 = vld [vmem:[#allocation2 + $0x129] sm:$0xff] }
  0x5f   : > { %502 = vst.msk [vmem:[#allocation4 + $0xe8] sm:$0xff] %vm320_vm0, %v470_v19  ;;  %v535_v18 = vld [vmem:[#allocation2 + $0x169] sm:$0xff] }
  0x60   : > { %v698_v19 = vld [vmem:[#allocation2 + $0x2] sm:$0xff] }
  0x61   : > { %603 = vrot.lane.b32.xlu1 %v6271_v35, %s5761_s17  ;;  %609 = vrot.lane.b32.xlu0 %v525_v33, %s5761_s17  ;;  %v528_v33 = vld [vmem:[#allocation2 + $0x111] sm:$0xff] }
  0x65   : > { %607 = vrot.lane.b32.xlu1 %v524_v28, %s5761_s17  ;;  %613 = vrot.lane.b32.xlu0 %v527_v23, %s5761_s17  ;;  %v531_v28 = vld [vmem:[#allocation2 + $0x139] sm:$0xff]  ;;  %v472_v23 = vld [vmem:[#allocation2 + $0x170] sm:$0xff] }
  0x66   : > { %504 = vst.msk [vmem:[#allocation4 + $0xf8] sm:$0xff] %vm320_vm0, %v472_v23  ;;  %v701_v23 = vld [vmem:[#allocation2 + $0x22] sm:$0xff] }
  0x69   : > { %611 = vrot.lane.b32.xlu1 %v526_v20, %s5761_s17  ;;  %617 = vrot.lane.b32.xlu0 %v529_v24, %s5761_s17  ;;  %v532_v20 = vld [vmem:[#allocation2 + $0x141] sm:$0xff]  ;;  %v534_v24 = vld [vmem:[#allocation2 + $0x159] sm:$0xff] }
  0x6d   : > { %615 = vrot.lane.b32.xlu1 %v528_v33, %s5761_s17  ;;  %621 = vrot.lane.b32.xlu0 %v531_v28, %s5761_s17  ;;  %v536_v33 = vld [vmem:[#allocation2 + $0x171] sm:$0xff]  ;;  %v700_v28 = vld [vmem:[#allocation2 + $0x1a] sm:$0xff] }
  0x71   : > { %619 = vrot.lane.b32.xlu1 %v530_v37, %s5761_s17  ;;  %625 = vrot.lane.b32.xlu0 %v533_v16, %s5761_s17  ;;  %v699_v37 = vld [vmem:[#allocation2 + $0xa] sm:$0xff]  ;;  %v702_v16 = vld [vmem:[#allocation2 + $0x32] sm:$0xff] }
  0x75   : > { %623 = vrot.lane.b32.xlu1 %v532_v20, %s5761_s17  ;;  %629 = vrot.lane.b32.xlu0 %v535_v18, %s5761_s17  ;;  %v6310_v20 = vld [vmem:[#allocation2 + $0x4a] sm:$0xff]  ;;  %v703_v18 = vld [vmem:[#allocation2 + $0x3a] sm:$0xff] }
  0x79   : > { %627 = vrot.lane.b32.xlu1 %v534_v24, %s5761_s17  ;;  %762 = vrot.lane.b32.xlu0 %v698_v19, %s5762_s18 }
  0x7d   : > { %631 = vrot.lane.b32.xlu1 %v536_v33, %s5761_s17  ;;  %766 = vrot.lane.b32.xlu0 %v700_v28, %s5762_s18  ;;  %s5771_s17 = smov 56  }
  0x81   : > { %764 = vrot.lane.b32.xlu1 %v699_v37, %s5762_s18  ;;  %770 = vrot.lane.b32.xlu0 %v702_v16, %s5762_s18 }
  0x85   : > { %768 = vrot.lane.b32.xlu1 %v701_v23, %s5762_s18  ;;  %774 = vrot.lane.b32.xlu0 %v6310_v20, %s5762_s18 }
  0x89   : > { %772 = vrot.lane.b32.xlu1 %v703_v18, %s5762_s18  ;;  %957 = vrot.lane.b32.xlu0 %v6153_v42, %s5763_s19 }
  0x8d   : > { %955 = vrot.lane.b32.xlu1 %v6155_v43, %s5763_s19  ;;  %1150 = vrot.lane.b32.xlu0 %v6087_v27, %s5764_s20  ;;  %v2083_v27 = vld [vmem:[%s8370_s1 + $0x8] sm:$0xff]  ;;  %v2084_v43 = vld [vmem:[%s8370_s1 + $0x10] sm:$0xff] }
  0x91   : > { %1148 = vrot.lane.b32.xlu1 %v6075_v25, %s5764_s20  ;;  %1343 = vrot.lane.b32.xlu0 %v701_v23, %s5765_s21  ;;  %v2082_v25 = vld [vmem:[%s8370_s1] sm:$0xff] }
  0x92   : > { %v5664_v42 = vpack.c.bf16 %v2083_v27, %v2082_v25 }
  0x94   : > { %5665 = vmatprep.subr.bf16.mxu0 %v5664_v42  ;;  %5688 = vmatprep.subr.bf16.mxu1 %v5664_v42 }
  0x95   : > { %1341 = vrot.lane.b32.xlu1 %v700_v28, %s5765_s21  ;;  %959 = vrot.lane.b32.xlu0 %v6157_v44, %s5763_s19 }
  0x96   : > { %5667 = vmatpush3.bf16.msra.mxu0 %v5664_v42  ;;  %5691 = vmatpush3.bf16.msra.mxu1 %v5664_v42 }
  0x98   : > { %v570_v19 = vpop.permute.xlu0 %569 }
  0x99   : > { %1535 = vrot.lane.b32.xlu1 %v6157_v44, %s5766_s22  ;;  %1728 = vrot.lane.b32.xlu0 %v6077_v26, %s5767_s23  ;;  %v2085_v44 = vld [vmem:[%s8370_s1 + $0x18] sm:$0xff]  ;;  %666 = vst.msk [vmem:[#allocation4] sm:$0xff] %vm665_vm3, %v570_v19 }
  0x9a   : > { %v5668_v24 = vpack.c.bf16 %v2085_v44, %v2084_v43 }
  0x9c   : > { %5669 = vmatprep.subr.bf16.mxu0 %v5668_v24  ;;  %5689 = vmatprep.subr.bf16.mxu1 %v5668_v24 }
  0x9d   : > { %1537 = vrot.lane.b32.xlu1 %v6159_v45, %s5766_s22  ;;  %1152 = vrot.lane.b32.xlu0 %v6077_v26, %s5764_s20  ;;  %v2086_v26 = vld [vmem:[%s8370_s1 + $0x20] sm:$0xf] }
  0x9e   : > { %5671 = vmatpush3.bf16.msra.mxu0 %v5668_v24  ;;  %5692 = vmatpush3.bf16.msra.mxu1 %v5668_v24 }
  0x9f   : > { %5493 = vmatprep.subr.msk.mxu0 %vm2191_vm2, %v2086_v26  ;;  %5690 = vmatprep.subr.msk.mxu1 %vm2191_vm2, %v2086_v26 }
  0xa1   : > { %961 = vrot.lane.b32.xlu1 %v6159_v45, %s5763_s19  ;;  %1921 = vrot.lane.b32.xlu0 %v702_v16, %s5768_s12  ;;  %v8415_v45 = vmov 0.0  }
  0xa2   : > { %5494 = vmatpush3.msk.msra.mxu0 %vm2191_vm2, %v2086_v26  ;;  %5693 = vmatpush3.msk.msra.mxu1 %vm2191_vm2, %v2086_v26  ;;  %2522 = vst.msk [vmem:[#allocation3 + $0x20] sm:$0xff] %vm2516_vm12, %v8415_v45  ;;  %2517 = vst.msk [vmem:[#allocation3] sm:$0xff] %vm2516_vm12, %v8415_v45 }
  0xa3   : > { %5609 = vmatprep.subr.mxu0 %v8415_v45  ;;  %2523 = vst.msk [vmem:[#allocation3 + $0x28] sm:$0x3] %vm2519_vm13, %v8415_v45  ;;  %2520 = vst.msk [vmem:[#allocation3 + $0x10] sm:$0x3] %vm2519_vm13, %v8415_v45 }
  0xa4   : > { %2518 = vst.msk [vmem:[#allocation3 + $0x8] sm:$0xff] %vm2516_vm12, %v8415_v45  ;;  %2521 = vst.msk [vmem:[#allocation3 + $0x18] sm:$0xff] %vm2516_vm12, %v8415_v45 }
  0xa5   : > { %1730 = vrot.lane.b32.xlu1 %v6105_v31, %s5767_s23  ;;  %1345 = vrot.lane.b32.xlu0 %v702_v16, %s5765_s21  ;;  %2524 = vst.msk [vmem:[#allocation3 + $0x30] sm:$0xff] %vm2516_vm12, %v8415_v45  ;;  %2525 = vst.msk [vmem:[#allocation3 + $0x38] sm:$0xff] %vm2516_vm12, %v8415_v45 }
  0xa6   : > { %2526 = vst.msk [vmem:[#allocation3 + $0x40] sm:$0x3] %vm2519_vm13, %v8415_v45  ;;  %2529 = vst.msk [vmem:[#allocation3 + $0x58] sm:$0x3] %vm2519_vm13, %v8415_v45 }
  0xa7   : > { %2527 = vst.msk [vmem:[#allocation3 + $0x48] sm:$0xff] %vm2516_vm12, %v8415_v45  ;;  %2528 = vst.msk [vmem:[#allocation3 + $0x50] sm:$0xff] %vm2516_vm12, %v8415_v45 }
  0xa8   : > { %2530 = vst.msk [vmem:[#allocation3 + $0x60] sm:$0xff] %vm2516_vm12, %v8415_v45  ;;  %2531 = vst.msk [vmem:[#allocation3 + $0x68] sm:$0xff] %vm2516_vm12, %v8415_v45 }
  0xa9   : > { %1154 = vrot.lane.b32.xlu1 %v6105_v31, %s5764_s20  ;;  %1347 = vrot.lane.b32.xlu0 %v703_v18, %s5765_s21  ;;  %2532 = vst.msk [vmem:[#allocation3 + $0x70] sm:$0x3] %vm2519_vm13, %v8415_v45  ;;  %2535 = vst.msk [vmem:[#allocation3 + $0x88] sm:$0x3] %vm2519_vm13, %v8415_v45 }
  0xaa   : > { %v572_v33 = vpop.permute.xlu0 %571  ;;  %2533 = vst.msk [vmem:[#allocation3 + $0x78] sm:$0xff] %vm2516_vm12, %v8415_v45  ;;  %2534 = vst.msk [vmem:[#allocation3 + $0x80] sm:$0xff] %vm2516_vm12, %v8415_v45 }
  0xab   : > { %667 = vst.msk [vmem:[#allocation4 + $0x8] sm:$0xff] %vm665_vm3, %v572_v33  ;;  %v1862_v33 = vld [vmem:[#allocation2 + $0x6a] sm:$0xff] }
  0xac   : > { %2536 = vst.msk [vmem:[#allocation3 + $0x90] sm:$0xff] %vm2516_vm12, %v8415_v45  ;;  %2537 = vst.msk [vmem:[#allocation3 + $0x98] sm:$0xff] %vm2516_vm12, %v8415_v45 }
  0xad   : > { %1923 = vrot.lane.b32.xlu1 %v703_v18, %s5768_s12  ;;  %963 = vrot.lane.b32.xlu0 %v6161_v47, %s5763_s19  ;;  %2538 = vst.msk [vmem:[#allocation3 + $0xa0] sm:$0x3] %vm2519_vm13, %v8415_v45  ;;  %2541 = vst.msk [vmem:[#allocation3 + $0xb8] sm:$0x3] %vm2519_vm13, %v8415_v45 }
  0xae   : > { %2539 = vst.msk [vmem:[#allocation3 + $0xa8] sm:$0xff] %vm2516_vm12, %v8415_v45  ;;  %2540 = vst.msk [vmem:[#allocation3 + $0xb0] sm:$0xff] %vm2516_vm12, %v8415_v45 }
  0xaf   : > { %2542 = vst.msk [vmem:[#allocation3 + $0xc0] sm:$0xff] %vm2516_vm12, %v8415_v45  ;;  %2543 = vst.msk [vmem:[#allocation3 + $0xc8] sm:$0xff] %vm2516_vm12, %v8415_v45 }
  0xb0   : > { %2544 = vst.msk [vmem:[#allocation3 + $0xd0] sm:$0x3] %vm2519_vm13, %v8415_v45  ;;  %2547 = vst.msk [vmem:[#allocation3 + $0xe8] sm:$0x3] %vm2519_vm13, %v8415_v45 }
  0xb1   : > { %1539 = vrot.lane.b32.xlu1 %v6161_v47, %s5766_s22  ;;  %1732 = vrot.lane.b32.xlu0 %v6101_v30, %s5767_s23  ;;  %2545 = vst.msk [vmem:[#allocation3 + $0xd8] sm:$0xff] %vm2516_vm12, %v8415_v45  ;;  %2546 = vst.msk [vmem:[#allocation3 + $0xe0] sm:$0xff] %vm2516_vm12, %v8415_v45 }
  0xb2   : > { %2548 = vst.msk [vmem:[#allocation3 + $0xf0] sm:$0xff] %vm2516_vm12, %v8415_v45  ;;  %2549 = vst.msk [vmem:[#allocation3 + $0xf8] sm:$0xff] %vm2516_vm12, %v8415_v45 }
  0xb3   : > { %v574_v31 = vpop.permute.xlu1 %573  ;;  %v578_v28 = vpop.permute.xlu0 %577  ;;  %2550 = vst.msk [vmem:[#allocation3 + $0x100] sm:$0x3] %vm2519_vm13, %v8415_v45  ;;  %2553 = vst.msk [vmem:[#allocation3 + $0x118] sm:$0x3] %vm2519_vm13, %v8415_v45 }
  0xb4   : > { %668 = vst.msk [vmem:[#allocation4 + $0x10] sm:$0xff] %vm665_vm3, %v574_v31  ;;  %670 = vst.msk [vmem:[#allocation4 + $0x20] sm:$0xff] %vm665_vm3, %v578_v28 }
  0xb5   : > { %1541 = vrot.lane.b32.xlu1 %v6172_v49, %s5766_s22  ;;  %1156 = vrot.lane.b32.xlu0 %v6101_v30, %s5764_s20  ;;  %2551 = vst.msk [vmem:[#allocation3 + $0x108] sm:$0xff] %vm2516_vm12, %v8415_v45  ;;  %2552 = vst.msk [vmem:[#allocation3 + $0x110] sm:$0xff] %vm2516_vm12, %v8415_v45 }
  0xb6   : > { %2554 = vst.msk [vmem:[#allocation3 + $0x120] sm:$0xff] %vm2516_vm12, %v8415_v45  ;;  %2555 = vst.msk [vmem:[#allocation3 + $0x128] sm:$0xff] %vm2516_vm12, %v8415_v45 }
  0xb7   : > { %v576_v37 = vpop.permute.xlu1 %575  ;;  %v582_v47 = vpop.permute.xlu0 %581  ;;  %2556 = vst.msk [vmem:[#allocation3 + $0x130] sm:$0x3] %vm2519_vm13, %v8415_v45  ;;  %2559 = vst.msk [vmem:[#allocation3 + $0x148] sm:$0x3] %vm2519_vm13, %v8415_v45 }
  0xb8   : > { %669 = vst.msk [vmem:[#allocation4 + $0x18] sm:$0xff] %vm665_vm3, %v576_v37  ;;  %672 = vst.msk [vmem:[#allocation4 + $0x30] sm:$0xff] %vm665_vm3, %v582_v47 }
  0xb9   : > { %965 = vrot.lane.b32.xlu1 %v6172_v49, %s5763_s19  ;;  %1925 = vrot.lane.b32.xlu0 %v6310_v20, %s5768_s12  ;;  %v1282_v49 = vld [vmem:[#allocation2 + $0x52] sm:$0xff]  ;;  %2557 = vst.msk [vmem:[#allocation3 + $0x138] sm:$0xff] %vm2516_vm12, %v8415_v45  ;;  %2558 = vst.msk [vmem:[#allocation3 + $0x140] sm:$0xff] %vm2516_vm12, %v8415_v45 }
  0xba   : > { %2560 = vst.msk [vmem:[#allocation3 + $0x150] sm:$0xff] %vm2516_vm12, %v8415_v45  ;;  %2561 = vst.msk [vmem:[#allocation3 + $0x158] sm:$0xff] %vm2516_vm12, %v8415_v45 }
  0xbb   : > { %v580_v16 = vpop.permute.xlu1 %579  ;;  %v586_v23 = vpop.permute.xlu0 %585  ;;  %2562 = vst.msk [vmem:[#allocation3 + $0x160] sm:$0x3] %vm2519_vm13, %v8415_v45  ;;  %2565 = vst.msk [vmem:[#allocation3 + $0x178] sm:$0x3] %vm2519_vm13, %v8415_v45 }
  0xbc   : > { %671 = vst.msk [vmem:[#allocation4 + $0x28] sm:$0xff] %vm665_vm3, %v580_v16  ;;  %674 = vst.msk [vmem:[#allocation4 + $0x40] sm:$0xff] %vm665_vm3, %v586_v23 }
  0xbd   : > { %1734 = vrot.lane.b32.xlu1 %v6134_v38, %s5767_s23  ;;  %1349 = vrot.lane.b32.xlu0 %v6310_v20, %s5765_s21  ;;  %2563 = vst.msk [vmem:[#allocation3 + $0x168] sm:$0xff] %vm2516_vm12, %v8415_v45  ;;  %2564 = vst.msk [vmem:[#allocation3 + $0x170] sm:$0xff] %vm2516_vm12, %v8415_v45 }
  0xbe   : > { %2566 = vst.msk [vmem:[#allocation3 + $0x180] sm:$0xff] %vm2516_vm12, %v8415_v45  ;;  %2567 = vst.msk [vmem:[#allocation3 + $0x188] sm:$0xff] %vm2516_vm12, %v8415_v45 }
  0xbf   : > { %v584_v30 = vpop.permute.xlu1 %583  ;;  %v590_v18 = vpop.permute.xlu0 %589  ;;  %2568 = vst.msk [vmem:[#allocation3 + $0x190] sm:$0x3] %vm2519_vm13, %v8415_v45  ;;  %2571 = vst.msk [vmem:[#allocation3 + $0x1a8] sm:$0x3] %vm2519_vm13, %v8415_v45 }
  0xc0   : > { %673 = vst.msk [vmem:[#allocation4 + $0x38] sm:$0xff] %vm665_vm3, %v584_v30  ;;  %676 = vst.msk [vmem:[#allocation4 + $0x50] sm:$0xff] %vm665_vm3, %v590_v18 }
  0xc1   : > { %1158 = vrot.lane.b32.xlu1 %v6134_v38, %s5764_s20  ;;  %1351 = vrot.lane.b32.xlu0 %v1282_v49, %s5765_s21  ;;  %2569 = vst.msk [vmem:[#allocation3 + $0x198] sm:$0xff] %vm2516_vm12, %v8415_v45  ;;  %2570 = vst.msk [vmem:[#allocation3 + $0x1a0] sm:$0xff] %vm2516_vm12, %v8415_v45 }
  0xc3   : > { %v588_v25 = vpop.permute.xlu1 %587  ;;  %v594_v27 = vpop.permute.xlu0 %593 }
  0xc4   : > { %675 = vst.msk [vmem:[#allocation4 + $0x48] sm:$0xff] %vm665_vm3, %v588_v25  ;;  %678 = vst.msk [vmem:[#allocation4 + $0x60] sm:$0xff] %vm665_vm3, %v594_v27 }
  0xc5   : > { %1927 = vrot.lane.b32.xlu1 %v1282_v49, %s5768_s12  ;;  %776 = vrot.lane.b32.xlu0 %v1282_v49, %s5762_s18 }
  0xc7   : > { %v592_v20 = vpop.permute.xlu1 %591  ;;  %v598_v42 = vpop.permute.xlu0 %597 }
  0xc8   : > { %677 = vst.msk [vmem:[#allocation4 + $0x58] sm:$0xff] %vm665_vm3, %v592_v20  ;;  %680 = vst.msk [vmem:[#allocation4 + $0x70] sm:$0xff] %vm665_vm3, %v598_v42  ;;  %v1864_v20 = vld [vmem:[#allocation2 + $0x82] sm:$0xff] }
  0xc9   : > { %1543 = vrot.lane.b32.xlu1 %v6178_v50, %s5766_s22  ;;  %1545 = vrot.lane.b32.xlu0 %v6197_v55, %s5766_s22 }
  0xcb   : > { %v596_v38 = vpop.permute.xlu1 %595  ;;  %v602_v43 = vpop.permute.xlu0 %601 }
  0xcc   : > { %679 = vst.msk [vmem:[#allocation4 + $0x68] sm:$0xff] %vm665_vm3, %v596_v38  ;;  %682 = vst.msk [vmem:[#allocation4 + $0x80] sm:$0xff] %vm665_vm3, %v602_v43 }
  0xcd   : > { %967 = vrot.lane.b32.xlu1 %v6178_v50, %s5763_s19  ;;  %969 = vrot.lane.b32.xlu0 %v6197_v55, %s5763_s19  ;;  %v1861_v55 = vld [vmem:[#allocation2 + $0x62] sm:$0xff] }
  0xcf   : > { %v600_v44 = vpop.permute.xlu1 %599  ;;  %v606_v24 = vpop.permute.xlu0 %605 }
  0xd0   : > { %681 = vst.msk [vmem:[#allocation4 + $0x78] sm:$0xff] %vm665_vm3, %v600_v44  ;;  %684 = vst.msk [vmem:[#allocation4 + $0x90] sm:$0xff] %vm665_vm3, %v606_v24 }
  0xd1   : > { %1736 = vrot.lane.b32.xlu1 %v6109_v32, %s5767_s23  ;;  %1738 = vrot.lane.b32.xlu0 %v6149_v41, %s5767_s23 }
  0xd3   : > { %v604_v26 = vpop.permute.xlu1 %603  ;;  %v610_v50 = vpop.permute.xlu0 %609 }
  0xd4   : > { %683 = vst.msk [vmem:[#allocation4 + $0x88] sm:$0xff] %vm665_vm3, %v604_v26  ;;  %686 = vst.msk [vmem:[#allocation4 + $0xa0] sm:$0xff] %vm665_vm3, %v610_v50 }
  0xd5   : > { %1160 = vrot.lane.b32.xlu1 %v6109_v32, %s5764_s20  ;;  %1162 = vrot.lane.b32.xlu0 %v6149_v41, %s5764_s20 }
  0xd7   : > { %v608_v19 = vpop.permute.xlu1 %607  ;;  %v614_v31 = vpop.permute.xlu0 %613 }
  0xd8   : > { %685 = vst.msk [vmem:[#allocation4 + $0x98] sm:$0xff] %vm665_vm3, %v608_v19  ;;  %688 = vst.msk [vmem:[#allocation4 + $0xb0] sm:$0xff] %vm665_vm3, %v614_v31 }
  0xd9   : > { %1929 = vrot.lane.b32.xlu1 %v1861_v55, %s5768_s12  ;;  %1931 = vrot.lane.b32.xlu0 %v1862_v33, %s5768_s12 }
  0xdb   : > { %v612_v28 = vpop.permute.xlu1 %611  ;;  %v618_v32 = vpop.permute.xlu0 %617 }
  0xdc   : > { %687 = vst.msk [vmem:[#allocation4 + $0xa8] sm:$0xff] %vm665_vm3, %v612_v28  ;;  %690 = vst.msk [vmem:[#allocation4 + $0xc0] sm:$0xff] %vm665_vm3, %v618_v32  ;;  %v1866_v28 = vld [vmem:[#allocation2 + $0x9a] sm:$0xff] }
  0xdd   : > { %1353 = vrot.lane.b32.xlu1 %v1861_v55, %s5765_s21  ;;  %1355 = vrot.lane.b32.xlu0 %v1862_v33, %s5765_s21 }
  0xdf   : > { %v616_v41 = vpop.permute.xlu1 %615  ;;  %v622_v37 = vpop.permute.xlu0 %621 }
  0xe0   : > { %689 = vst.msk [vmem:[#allocation4 + $0xb8] sm:$0xff] %vm665_vm3, %v616_v41  ;;  %692 = vst.msk [vmem:[#allocation4 + $0xd0] sm:$0xff] %vm665_vm3, %v622_v37 }
  0xe1   : > { %778 = vrot.lane.b32.xlu1 %v1861_v55, %s5762_s18  ;;  %780 = vrot.lane.b32.xlu0 %v1862_v33, %s5762_s18 }
  0xe3   : > { %v620_v47 = vpop.permute.xlu1 %619  ;;  %v626_v16 = vpop.permute.xlu0 %625 }
  0xe4   : > { %691 = vst.msk [vmem:[#allocation4 + $0xc8] sm:$0xff] %vm665_vm3, %v620_v47  ;;  %694 = vst.msk [vmem:[#allocation4 + $0xe0] sm:$0xff] %vm665_vm3, %v626_v16 }
  0xe5   : > { %1547 = vrot.lane.b32.xlu1 %v6189_v52, %s5766_s22  ;;  %1549 = vrot.lane.b32.xlu0 %v6205_v57, %s5766_s22 }
  0xe7   : > { %v624_v23 = vpop.permute.xlu1 %623  ;;  %v630_v30 = vpop.permute.xlu0 %629 }
  0xe8   : > { %693 = vst.msk [vmem:[#allocation4 + $0xd8] sm:$0xff] %vm665_vm3, %v624_v23  ;;  %696 = vst.msk [vmem:[#allocation4 + $0xf0] sm:$0xff] %vm665_vm3, %v630_v30 }
  0xe9   : > { %971 = vrot.lane.b32.xlu1 %v6189_v52, %s5763_s19  ;;  %973 = vrot.lane.b32.xlu0 %v6205_v57, %s5763_s19  ;;  %v1863_v57 = vld [vmem:[#allocation2 + $0x7a] sm:$0xff] }
  0xeb   : > { %v628_v49 = vpop.permute.xlu1 %627  ;;  %v763_v18 = vpop.permute.xlu0 %762 }
  0xec   : > { %695 = vst.msk [vmem:[#allocation4 + $0xe8] sm:$0xff] %vm665_vm3, %v628_v49 }
  0xed   : > { %1740 = vrot.lane.b32.xlu1 %v6147_v40, %s5767_s23  ;;  %859 = vst.msk [vmem:[#allocation4] sm:$0xff] %vm858_vm4, %v763_v18  ;;  %1742 = vrot.lane.b32.xlu0 %v6191_v53, %s5767_s23 }
  0xef   : > { %v632_v25 = vpop.permute.xlu1 %631  ;;  %v767_v52 = vpop.permute.xlu0 %766 }
  0xf0   : > { %697 = vst.msk [vmem:[#allocation4 + $0xf8] sm:$0xff] %vm665_vm3, %v632_v25 }
  0xf1   : > { %1164 = vrot.lane.b32.xlu1 %v6147_v40, %s5764_s20  ;;  %861 = vst.msk [vmem:[#allocation4 + $0x10] sm:$0xff] %vm858_vm4, %v767_v52  ;;  %1166 = vrot.lane.b32.xlu0 %v6191_v53, %s5764_s20 }
  0xf3   : > { %v765_v27 = vpop.permute.xlu1 %764  ;;  %v771_v42 = vpop.permute.xlu0 %770 }
  0xf4   : > { %860 = vst.msk [vmem:[#allocation4 + $0x8] sm:$0xff] %vm858_vm4, %v765_v27  ;;  %863 = vst.msk [vmem:[#allocation4 + $0x20] sm:$0xff] %vm858_vm4, %v771_v42 }
  0xf5   : > { %1933 = vrot.lane.b32.xlu1 %v1863_v57, %s5768_s12  ;;  %1935 = vrot.lane.b32.xlu0 %v1864_v20, %s5768_s12 }
  0xf7   : > { %v769_v38 = vpop.permute.xlu1 %768  ;;  %v775_v40 = vpop.permute.xlu0 %774 }
  0xf8   : > { %862 = vst.msk [vmem:[#allocation4 + $0x18] sm:$0xff] %vm858_vm4, %v769_v38  ;;  %865 = vst.msk [vmem:[#allocation4 + $0x30] sm:$0xff] %vm858_vm4, %v775_v40 }
  0xf9   : > { %1357 = vrot.lane.b32.xlu1 %v1863_v57, %s5765_s21  ;;  %1359 = vrot.lane.b32.xlu0 %v1864_v20, %s5765_s21 }
  0xfb   : > { %v773_v53 = vpop.permute.xlu1 %772  ;;  %v958_v43 = vpop.permute.xlu0 %957 }
  0xfc   : > { %864 = vst.msk [vmem:[#allocation4 + $0x28] sm:$0xff] %vm858_vm4, %v773_v53 }
  0xfd   : > { %782 = vrot.lane.b32.xlu1 %v1863_v57, %s5762_s18  ;;  %1053 = vst.msk [vmem:[#allocation4 + $0x8] sm:$0xff] %vm1051_vm5, %v958_v43  ;;  %784 = vrot.lane.b32.xlu0 %v1864_v20, %s5762_s18  ;;  %v1868_v20 = vld [vmem:[#allocation2 + $0xb2] sm:$0xff] }
  0xff   : > { %v956_v44 = vpop.permute.xlu1 %955  ;;  %v1151_v24 = vpop.permute.xlu0 %1150 }
 0x100   : > { %1052 = vst.msk [vmem:[#allocation4] sm:$0xff] %vm1051_vm5, %v956_v44 }
 0x101   : > { %1551 = vrot.lane.b32.xlu1 %v6203_v56, %s5766_s22  ;;  %1246 = vst.msk [vmem:[#allocation4 + $0x8] sm:$0xff] %vm1244_vm6, %v1151_v24  ;;  %1553 = vrot.lane.b32.xlu0 %v6215_v59, %s5766_s22 }
 0x103   : > { %v1149_v26 = vpop.permute.xlu1 %1148  ;;  %v1344_v50 = vpop.permute.xlu0 %1343 }
 0x104   : > { %1245 = vst.msk [vmem:[#allocation4] sm:$0xff] %vm1244_vm6, %v1149_v26 }
 0x105   : > { %975 = vrot.lane.b32.xlu1 %v6203_v56, %s5763_s19  ;;  %1439 = vst.msk [vmem:[#allocation4 + $0x8] sm:$0xff] %vm1437_vm7, %v1344_v50  ;;  %977 = vrot.lane.b32.xlu0 %v6215_v59, %s5763_s19  ;;  %v1865_v59 = vld [vmem:[#allocation2 + $0x92] sm:$0xff] }
 0x107   : > { %v1342_v55 = vpop.permute.xlu1 %1341  ;;  %v960_v19 = vpop.permute.xlu0 %959 }
 0x108   : > { %1438 = vst.msk [vmem:[#allocation4] sm:$0xff] %vm1437_vm7, %v1342_v55 }
 0x109   : > { %1744 = vrot.lane.b32.xlu1 %v6180_v51, %s5767_s23  ;;  %1054 = vst.msk [vmem:[#allocation4 + $0x10] sm:$0xff] %vm1051_vm5, %v960_v19  ;;  %1746 = vrot.lane.b32.xlu0 %v6235_v8, %s5767_s23 }
 0x10b   : > { %v1536_v33 = vpop.permute.xlu1 %1535  ;;  %v1729_v56 = vpop.permute.xlu0 %1728 }
 0x10c   : > { %1632 = vst.msk [vmem:[#allocation4] sm:$0xff] %vm1631_vm8, %v1536_v33  ;;  %v1098_v33 = vld [vmem:[#allocation2 + $0xc1] sm:$0xff] }
 0x10d   : > { %1168 = vrot.lane.b32.xlu1 %v6180_v51, %s5764_s20  ;;  %1825 = vst.msk [vmem:[#allocation4] sm:$0xff] %vm1824_vm9, %v1729_v56  ;;  %1170 = vrot.lane.b32.xlu0 %v6235_v8, %s5764_s20  ;;  %v1869_v56 = vld [vmem:[#allocation2 + $0xc2] sm:$0xff] }
 0x10f   : > { %v1538_v31 = vpop.permute.xlu1 %1537  ;;  %v1153_v32 = vpop.permute.xlu0 %1152 }
 0x110   : > { %1633 = vst.msk [vmem:[#allocation4 + $0x8] sm:$0xff] %vm1631_vm8, %v1538_v31 }
 0x111   : > { %1937 = vrot.lane.b32.xlu1 %v1865_v59, %s5768_s12  ;;  %1247 = vst.msk [vmem:[#allocation4 + $0x10] sm:$0xff] %vm1244_vm6, %v1153_v32  ;;  %1939 = vrot.lane.b32.xlu0 %v1866_v28, %s5768_s12 }
 0x113   : > { %v962_v41 = vpop.permute.xlu1 %961  ;;  %v1922_v51 = vpop.permute.xlu0 %1921 }
 0x114   : > { %1055 = vst.msk [vmem:[#allocation4 + $0x18] sm:$0xff] %vm1051_vm5, %v962_v41 }
 0x115   : > { %1361 = vrot.lane.b32.xlu1 %v1865_v59, %s5765_s21  ;;  %2018 = vst.msk [vmem:[#allocation4] sm:$0xff] %vm2017_vm10, %v1922_v51  ;;  %1363 = vrot.lane.b32.xlu0 %v1866_v28, %s5765_s21 }
 0x117   : > { %v1731_v8 = vpop.permute.xlu1 %1730  ;;  %v1346_v37 = vpop.permute.xlu0 %1345 }
 0x118   : > { %1826 = vst.msk [vmem:[#allocation4 + $0x8] sm:$0xff] %vm1824_vm9, %v1731_v8 }
 0x119   : > { %786 = vrot.lane.b32.xlu1 %v1865_v59, %s5762_s18  ;;  %1440 = vst.msk [vmem:[#allocation4 + $0x10] sm:$0xff] %vm1437_vm7, %v1346_v37  ;;  %788 = vrot.lane.b32.xlu0 %v1866_v28, %s5762_s18 }
 0x11b   : > { %v1155_v47 = vpop.permute.xlu1 %1154  ;;  %v1348_v16 = vpop.permute.xlu0 %1347 }
 0x11c   : > { %1248 = vst.msk [vmem:[#allocation4 + $0x18] sm:$0xff] %vm1244_vm6, %v1155_v47  ;;  %v2050_v23 = vld [vmem:[#allocation4] sm:$0xff] }
 0x11d   : > { %1555 = vrot.lane.b32.xlu1 %v6207_v58, %s5766_s22  ;;  %1441 = vst.msk [vmem:[#allocation4 + $0x18] sm:$0xff] %vm1437_vm7, %v1348_v16  ;;  %5495 = vmatprep.mubr.msk.f32.mxu0 %vm2094_vm11, %v2050_v23 }
 0x11e   : > { %1557 = vrot.lane.b32.xlu0 %v6219_v61, %s5766_s22 }
 0x11f   : > { %v1924_v30 = vpop.permute.xlu1 %1923  ;;  %v964_v49 = vpop.permute.xlu0 %963 }
 0x120   : > { %2019 = vst.msk [vmem:[#allocation4 + $0x8] sm:$0xff] %vm2017_vm10, %v1924_v30  ;;  %v1678_v30 = vld [vmem:[#allocation2 + $0xd9] sm:$0xff] }
 0x121   : > { %979 = vrot.lane.b32.xlu1 %v6207_v58, %s5763_s19  ;;  %1056 = vst.msk [vmem:[#allocation4 + $0x20] sm:$0xff] %vm1051_vm5, %v964_v49 }
 0x122   : > { %981 = vrot.lane.b32.xlu0 %v6219_v61, %s5763_s19  ;;  %v1867_v61 = vld [vmem:[#allocation2 + $0xaa] sm:$0xff] }
 0x123   : > { %v1540_v18 = vpop.permute.xlu1 %1539  ;;  %v1733_v25 = vpop.permute.xlu0 %1732 }
 0x124   : > { %1634 = vst.msk [vmem:[#allocation4 + $0x10] sm:$0xff] %vm1631_vm8, %v1540_v18  ;;  %v1679_v18 = vld [vmem:[#allocation2 + $0xe1] sm:$0xff] }
 0x125   : > { %1748 = vrot.lane.b32.xlu1 %v6193_v54, %s5767_s23  ;;  %1827 = vst.msk [vmem:[#allocation4 + $0x10] sm:$0xff] %vm1824_vm9, %v1733_v25 }
 0x126   : > { %1750 = vrot.lane.b32.xlu0 %v6257_v39, %s5767_s23 }
 0x127   : > { %v1542_v52 = vpop.permute.xlu1 %1541  ;;  %v2051_v57 = vld [vmem:[#allocation4 + $0x8] sm:$0xff]  ;;  %v1157_v58 = vpop.permute.xlu0 %1156 }
 0x128   : > { %1635 = vst.msk [vmem:[#allocation4 + $0x18] sm:$0xff] %vm1631_vm8, %v1542_v52  ;;  %5496 = vmatmul.mubr.msk.f32.vlgmr.msra.gmra.mrb[0].mxu0 %vm2094_vm11, %v2051_v57 }
 0x129   : > { %1172 = vrot.lane.b32.xlu1 %v6193_v54, %s5764_s20  ;;  %1249 = vst.msk [vmem:[#allocation4 + $0x20] sm:$0xff] %vm1244_vm6, %v1157_v58  ;;  %v1872_v58 = vld [vmem:[#allocation2 + $0xe2] sm:$0xff] }
 0x12a   : > { %1174 = vrot.lane.b32.xlu0 %v6257_v39, %s5764_s20 }
 0x12b   : > { %v966_v27 = vpop.permute.xlu1 %965  ;;  %v1926_v42 = vpop.permute.xlu0 %1925 }
 0x12c   : > { %1057 = vst.msk [vmem:[#allocation4 + $0x28] sm:$0xff] %vm1051_vm5, %v966_v27 }
 0x12d   : > { %1941 = vrot.lane.b32.xlu1 %v1867_v61, %s5768_s12  ;;  %2020 = vst.msk [vmem:[#allocation4 + $0x10] sm:$0xff] %vm2017_vm10, %v1926_v42 }
 0x12e   : > { %1943 = vrot.lane.b32.xlu0 %v1868_v20, %s5768_s12 }
 0x12f   : > { %v1735_v38 = vpop.permute.xlu1 %1734  ;;  %v1350_v54 = vpop.permute.xlu0 %1349 }
 0x130   : > { %1828 = vst.msk [vmem:[#allocation4 + $0x18] sm:$0xff] %vm1824_vm9, %v1735_v38 }
 0x131   : > { %1365 = vrot.lane.b32.xlu1 %v1867_v61, %s5765_s21  ;;  %1442 = vst.msk [vmem:[#allocation4 + $0x20] sm:$0xff] %vm1437_vm7, %v1350_v54 }
 0x132   : > { %1367 = vrot.lane.b32.xlu0 %v1868_v20, %s5765_s21 }
 0x133   : > { %v1159_v39 = vpop.permute.xlu1 %1158  ;;  %v1352_v40 = vpop.permute.xlu0 %1351 }
 0x134   : > { %1250 = vst.msk [vmem:[#allocation4 + $0x28] sm:$0xff] %vm1244_vm6, %v1159_v39  ;;  %v2052_v53 = vld [vmem:[#allocation4 + $0x10] sm:$0xff] }
 0x135   : > { %790 = vrot.lane.b32.xlu1 %v1867_v61, %s5762_s18  ;;  %1443 = vst.msk [vmem:[#allocation4 + $0x28] sm:$0xff] %vm1437_vm7, %v1352_v40  ;;  %5498 = vmatprep.mubr.msk.f32.mxu0 %vm2094_vm11, %v2052_v53 }
 0x136   : > { %792 = vrot.lane.b32.xlu0 %v1868_v20, %s5762_s18 }
 0x137   : > { %v1928_v43 = vpop.permute.xlu1 %1927  ;;  %v777_v44 = vpop.permute.xlu0 %776 }
 0x138   : > { %2021 = vst.msk [vmem:[#allocation4 + $0x18] sm:$0xff] %vm2017_vm10, %v1928_v43 }
 0x139   : > { %1559 = vrot.lane.b32.xlu1 %v6217_v60, %s5766_s22  ;;  %866 = vst.msk [vmem:[#allocation4 + $0x38] sm:$0xff] %vm858_vm4, %v777_v44 }
 0x13a   : > { %1561 = vrot.lane.b32.xlu0 %v6231_v63, %s5766_s22 }
 0x13b   : > { %v1544_v24 = vpop.permute.xlu1 %1543  ;;  %v1546_v26 = vpop.permute.xlu0 %1545 }
 0x13c   : > { %1636 = vst.msk [vmem:[#allocation4 + $0x20] sm:$0xff] %vm1631_vm8, %v1544_v24  ;;  %1637 = vst.msk [vmem:[#allocation4 + $0x28] sm:$0xff] %vm1631_vm8, %v1546_v26  ;;  %v1680_v24 = vld [vmem:[#allocation2 + $0xf1] sm:$0xff] }
 0x13d   : > { %983 = vrot.lane.b32.xlu1 %v6217_v60, %s5763_s19 }
 0x13e   : > { %985 = vrot.lane.b32.xlu0 %v6231_v63, %s5763_s19 }
 0x13f   : > { %v968_v50 = vpop.permute.xlu1 %967  ;;  %v2053_v55 = vld [vmem:[#allocation4 + $0x18] sm:$0xff]  ;;  %v970_v19 = vpop.permute.xlu0 %969 }
 0x140   : > { %1058 = vst.msk [vmem:[#allocation4 + $0x30] sm:$0xff] %vm1051_vm5, %v968_v50  ;;  %5499 = vmatmul.mubr.msk.f32.gmra.mrb[2].mxu0 %vm2094_vm11, %v2053_v55  ;;  %1059 = vst.msk [vmem:[#allocation4 + $0x38] sm:$0xff] %vm1051_vm5, %v970_v19  ;;  %v1681_v50 = vld [vmem:[#allocation2 + $0xf9] sm:$0xff] }
 0x141   : > { %1752 = vrot.lane.b32.xlu1 %v6249_v48, %s5767_s23  ;;  %v1870_v48 = vld [vmem:[#allocation2 + $0xca] sm:$0xff] }
 0x142   : > { %1754 = vrot.lane.b32.xlu0 %v6271_v35, %s5767_s23 }
 0x143   : > { %v1737_v60 = vpop.permute.xlu1 %1736  ;;  %v1739_v63 = vpop.permute.xlu0 %1738 }
 0x144   : > { %1829 = vst.msk [vmem:[#allocation4 + $0x20] sm:$0xff] %vm1824_vm9, %v1737_v60  ;;  %1830 = vst.msk [vmem:[#allocation4 + $0x28] sm:$0xff] %vm1824_vm9, %v1739_v63  ;;  %v6643_v60 = vld [vmem:[#allocation2 + $0xfa] sm:$0xff] }
 0x145   : > { %1176 = vrot.lane.b32.xlu1 %v1098_v33, %s5764_s20 }
 0x146   : > { %1178 = vrot.lane.b32.xlu0 %v6271_v35, %s5764_s20 }
 0x147   : > { %v1161_v59 = vpop.permute.xlu1 %1160  ;;  %v1163_v31 = vpop.permute.xlu0 %1162 }
 0x148   : > { %1251 = vst.msk [vmem:[#allocation4 + $0x30] sm:$0xff] %vm1244_vm6, %v1161_v59  ;;  %1252 = vst.msk [vmem:[#allocation4 + $0x38] sm:$0xff] %vm1244_vm6, %v1163_v31 }
 0x149   : > { %1945 = vrot.lane.b32.xlu1 %v1869_v56, %s5768_s12 }
 0x14a   : > { %1947 = vrot.lane.b32.xlu0 %v1870_v48, %s5768_s12 }
 0x14b   : > { %v1930_v28 = vpop.permute.xlu1 %1929  ;;  %v1932_v32 = vpop.permute.xlu0 %1931 }
 0x14c   : > { %2022 = vst.msk [vmem:[#allocation4 + $0x20] sm:$0xff] %vm2017_vm10, %v1930_v28  ;;  %2023 = vst.msk [vmem:[#allocation4 + $0x28] sm:$0xff] %vm2017_vm10, %v1932_v32 }
 0x14d   : > { %1369 = vrot.lane.b32.xlu1 %v1869_v56, %s5765_s21 }
 0x14e   : > { %1371 = vrot.lane.b32.xlu0 %v1870_v48, %s5765_s21 }
 0x14f   : > { %v1354_v35 = vpop.permute.xlu1 %1353  ;;  %v1356_v41 = vpop.permute.xlu0 %1355 }
 0x150   : > { %1444 = vst.msk [vmem:[#allocation4 + $0x30] sm:$0xff] %vm1437_vm7, %v1354_v35  ;;  %1445 = vst.msk [vmem:[#allocation4 + $0x38] sm:$0xff] %vm1437_vm7, %v1356_v41 }
 0x151   : > { %794 = vrot.lane.b32.xlu1 %v1869_v56, %s5762_s18 }
 0x152   : > { %796 = vrot.lane.b32.xlu0 %v1870_v48, %s5762_s18 }
 0x153   : > { %v779_v51 = vpop.permute.xlu1 %778  ;;  %v2054_v8 = vld [vmem:[#allocation4 + $0x20] sm:$0xff]  ;;  %v781_v37 = vpop.permute.xlu0 %780  ;;  %v2055_v47 = vld [vmem:[#allocation4 + $0x28] sm:$0xff] }
 0x154   : > { %867 = vst.msk [vmem:[#allocation4 + $0x40] sm:$0xff] %vm858_vm4, %v779_v51  ;;  %5501 = vmatprep.mubr.msk.f32.mxu0 %vm2094_vm11, %v2054_v8  ;;  %868 = vst.msk [vmem:[#allocation4 + $0x48] sm:$0xff] %vm858_vm4, %v781_v37  ;;  %v6780_v8 = vld [vmem:[%s5967_s16 + $0xf0] sm:$0xff] }
 0x155   : > { %1563 = vrot.lane.b32.xlu1 %v6229_v62, %s5766_s22  ;;  %5502 = vmatmul.mubr.msk.f32.gmra.mrb[4].mxu0 %vm2094_vm11, %v2055_v47  ;;  %439 = vst.msk [vmem:[#allocation2 + $0x181] sm:$0xff] %vm320_vm0, %v6780_v8  ;;  %v1682_v47 = vld [vmem:[#allocation2 + $0x109] sm:$0xff] }
 0x156   : > { %1565 = vrot.lane.b32.xlu0 %v6243_v46, %s5766_s22 }
 0x157   : > { %v1548_v16 = vpop.permute.xlu1 %1547  ;;  %v1550_v23 = vpop.permute.xlu0 %1549 }
 0x158   : > { %1638 = vst.msk [vmem:[#allocation4 + $0x30] sm:$0xff] %vm1631_vm8, %v1548_v16  ;;  %1639 = vst.msk [vmem:[#allocation4 + $0x38] sm:$0xff] %vm1631_vm8, %v1550_v23  ;;  %v6788_v16 = vld [vmem:[%s5967_s16 + $0xf8] sm:$0xff] }
 0x159   : > { %987 = vrot.lane.b32.xlu1 %v6229_v62, %s5763_s19  ;;  %440 = vst.msk [vmem:[#allocation2 + $0x189] sm:$0xff] %vm320_vm0, %v6788_v16 }
 0x15a   : > { %989 = vrot.lane.b32.xlu0 %v6243_v46, %s5763_s19  ;;  %v1871_v46 = vld [vmem:[#allocation2 + $0xda] sm:$0xff] }
 0x15b   : > { %v972_v49 = vpop.permute.xlu1 %971  ;;  %v974_v25 = vpop.permute.xlu0 %973 }
 0x15c   : > { %1060 = vst.msk [vmem:[#allocation4 + $0x40] sm:$0xff] %vm1051_vm5, %v972_v49  ;;  %1061 = vst.msk [vmem:[#allocation4 + $0x48] sm:$0xff] %vm1051_vm5, %v974_v25 }
 0x15d   : > { %1756 = vrot.lane.b32.xlu1 %v1678_v30, %s5767_s23 }
 0x15e   : > { %1758 = vrot.lane.b32.xlu0 %v1679_v18, %s5767_s23 }
 0x15f   : > { %v1741_v52 = vpop.permute.xlu1 %1740  ;;  %v1743_v62 = vpop.permute.xlu0 %1742 }
 0x160   : > { %1831 = vst.msk [vmem:[#allocation4 + $0x30] sm:$0xff] %vm1824_vm9, %v1741_v52  ;;  %1832 = vst.msk [vmem:[#allocation4 + $0x38] sm:$0xff] %vm1824_vm9, %v1743_v62  ;;  %v1876_v52 = vld [vmem:[#allocation2 + $0x112] sm:$0xff] }
 0x161   : > { %1180 = vrot.lane.b32.xlu1 %v1678_v30, %s5764_s20  ;;  %v1683_v30 = vld [vmem:[#allocation2 + $0x111] sm:$0xff] }
 0x162   : > { %1182 = vrot.lane.b32.xlu0 %v1679_v18, %s5764_s20 }
 0x163   : > { %v1165_v57 = vpop.permute.xlu1 %1164  ;;  %v1167_v61 = vpop.permute.xlu0 %1166 }
 0x164   : > { %1253 = vst.msk [vmem:[#allocation4 + $0x40] sm:$0xff] %vm1244_vm6, %v1165_v57  ;;  %1254 = vst.msk [vmem:[#allocation4 + $0x48] sm:$0xff] %vm1244_vm6, %v1167_v61 }
 0x165   : > { %1949 = vrot.lane.b32.xlu1 %v1871_v46, %s5768_s12 }
 0x166   : > { %1951 = vrot.lane.b32.xlu0 %v1872_v58, %s5768_s12 }
 0x167   : > { %v1934_v27 = vpop.permute.xlu1 %1933  ;;  %v1936_v20 = vpop.permute.xlu0 %1935 }
 0x168   : > { %2024 = vst.msk [vmem:[#allocation4 + $0x30] sm:$0xff] %vm2017_vm10, %v1934_v27  ;;  %2025 = vst.msk [vmem:[#allocation4 + $0x38] sm:$0xff] %vm2017_vm10, %v1936_v20 }
 0x169   : > { %1373 = vrot.lane.b32.xlu1 %v1871_v46, %s5765_s21 }
 0x16a   : > { %1375 = vrot.lane.b32.xlu0 %v1872_v58, %s5765_s21 }
 0x16b   : > { %v1358_v42 = vpop.permute.xlu1 %1357  ;;  %v1360_v38 = vpop.permute.xlu0 %1359 }
 0x16c   : > { %1446 = vst.msk [vmem:[#allocation4 + $0x40] sm:$0xff] %vm1437_vm7, %v1358_v42  ;;  %1447 = vst.msk [vmem:[#allocation4 + $0x48] sm:$0xff] %vm1437_vm7, %v1360_v38 }
 0x16d   : > { %798 = vrot.lane.b32.xlu1 %v1871_v46, %s5762_s18 }
 0x16e   : > { %800 = vrot.lane.b32.xlu0 %v1872_v58, %s5762_s18 }
 0x16f   : > { %v783_v54 = vpop.permute.xlu1 %782  ;;  %v2056_v39 = vld [vmem:[#allocation4 + $0x30] sm:$0xff]  ;;  %v785_v40 = vpop.permute.xlu0 %784  ;;  %v2057_v53 = vld [vmem:[#allocation4 + $0x38] sm:$0xff] }
 0x170   : > { %869 = vst.msk [vmem:[#allocation4 + $0x50] sm:$0xff] %vm858_vm4, %v783_v54  ;;  %5504 = vmatprep.mubr.msk.f32.mxu0 %vm2094_vm11, %v2056_v39  ;;  %870 = vst.msk [vmem:[#allocation4 + $0x58] sm:$0xff] %vm858_vm4, %v785_v40  ;;  %v1684_v40 = vld [vmem:[#allocation2 + $0x121] sm:$0xff] }
 0x171   : > { %1567 = vrot.lane.b32.xlu1 %v6233_v7, %s5766_s22  ;;  %5505 = vmatmul.mubr.msk.f32.gmra.mrb[6].mxu0 %vm2094_vm11, %v2057_v53 }
 0x172   : > { %1569 = vrot.lane.b32.xlu0 %v6259_v36, %s5766_s22 }
 0x173   : > { %v1552_v43 = vpop.permute.xlu1 %1551  ;;  %v1554_v44 = vpop.permute.xlu0 %1553 }
 0x174   : > { %1640 = vst.msk [vmem:[#allocation4 + $0x40] sm:$0xff] %vm1631_vm8, %v1552_v43  ;;  %1641 = vst.msk [vmem:[#allocation4 + $0x48] sm:$0xff] %vm1631_vm8, %v1554_v44  ;;  %v1685_v43 = vld [vmem:[#allocation2 + $0x129] sm:$0xff] }
 0x175   : > { %991 = vrot.lane.b32.xlu1 %v6233_v7, %s5763_s19 }
 0x176   : > { %993 = vrot.lane.b32.xlu0 %v6259_v36, %s5763_s19  ;;  %v6639_v36 = vld [vmem:[#allocation2 + $0xf2] sm:$0xff] }
 0x177   : > { %v976_v26 = vpop.permute.xlu1 %975  ;;  %v978_v55 = vpop.permute.xlu0 %977 }
 0x178   : > { %1062 = vst.msk [vmem:[#allocation4 + $0x50] sm:$0xff] %vm1051_vm5, %v976_v26  ;;  %1063 = vst.msk [vmem:[#allocation4 + $0x58] sm:$0xff] %vm1051_vm5, %v978_v55 }
 0x179   : > { %1760 = vrot.lane.b32.xlu1 %v1680_v24, %s5767_s23 }
 0x17a   : > { %1762 = vrot.lane.b32.xlu0 %v1681_v50, %s5767_s23 }
 0x17b   : > { %v1745_v19 = vpop.permute.xlu1 %1744  ;;  %v1747_v7 = vpop.permute.xlu0 %1746 }
 0x17c   : > { %1833 = vst.msk [vmem:[#allocation4 + $0x40] sm:$0xff] %vm1824_vm9, %v1745_v19  ;;  %1834 = vst.msk [vmem:[#allocation4 + $0x48] sm:$0xff] %vm1824_vm9, %v1747_v7 }
 0x17d   : > { %1184 = vrot.lane.b32.xlu1 %v1680_v24, %s5764_s20 }
 0x17e   : > { %1186 = vrot.lane.b32.xlu0 %v1681_v50, %s5764_s20  ;;  %v1878_v50 = vld [vmem:[#allocation2 + $0x12a] sm:$0xff] }
 0x17f   : > { %v1169_v33 = vpop.permute.xlu1 %1168  ;;  %v1171_v63 = vpop.permute.xlu0 %1170 }
 0x180   : > { %1255 = vst.msk [vmem:[#allocation4 + $0x50] sm:$0xff] %vm1244_vm6, %v1169_v33  ;;  %1256 = vst.msk [vmem:[#allocation4 + $0x58] sm:$0xff] %vm1244_vm6, %v1171_v63 }
 0x181   : > { %1953 = vrot.lane.b32.xlu1 %v6639_v36, %s5768_s12 }
 0x182   : > { %1955 = vrot.lane.b32.xlu0 %v6643_v60, %s5768_s12 }
 0x183   : > { %v1938_v56 = vpop.permute.xlu1 %1937  ;;  %v1940_v59 = vpop.permute.xlu0 %1939 }
 0x184   : > { %2026 = vst.msk [vmem:[#allocation4 + $0x40] sm:$0xff] %vm2017_vm10, %v1938_v56  ;;  %2027 = vst.msk [vmem:[#allocation4 + $0x48] sm:$0xff] %vm2017_vm10, %v1940_v59 }
 0x185   : > { %1377 = vrot.lane.b32.xlu1 %v6639_v36, %s5765_s21 }
 0x186   : > { %1379 = vrot.lane.b32.xlu0 %v6643_v60, %s5765_s21 }
 0x187   : > { %v1362_v48 = vpop.permute.xlu1 %1361  ;;  %v1364_v31 = vpop.permute.xlu0 %1363 }
 0x188   : > { %1448 = vst.msk [vmem:[#allocation4 + $0x50] sm:$0xff] %vm1437_vm7, %v1362_v48  ;;  %1449 = vst.msk [vmem:[#allocation4 + $0x58] sm:$0xff] %vm1437_vm7, %v1364_v31 }
 0x189   : > { %802 = vrot.lane.b32.xlu1 %v6639_v36, %s5762_s18 }
 0x18a   : > { %804 = vrot.lane.b32.xlu0 %v6643_v60, %s5762_s18  ;;  %v1493_v60 = vld [vmem:[#allocation2 + $0x138] sm:$0xff] }
 0x18b   : > { %v787_v28 = vpop.permute.xlu1 %786  ;;  %v2058_v32 = vld [vmem:[#allocation4 + $0x40] sm:$0xff]  ;;  %v789_v35 = vpop.permute.xlu0 %788  ;;  %v2059_v41 = vld [vmem:[#allocation4 + $0x48] sm:$0xff] }
 0x18c   : > { %871 = vst.msk [vmem:[#allocation4 + $0x60] sm:$0xff] %vm858_vm4, %v787_v28  ;;  %5507 = vmatprep.mubr.msk.f32.mxu0 %vm2094_vm11, %v2058_v32  ;;  %872 = vst.msk [vmem:[#allocation4 + $0x68] sm:$0xff] %vm858_vm4, %v789_v35  ;;  %v1686_v32 = vld [vmem:[#allocation2 + $0x139] sm:$0xff] }
 0x18d   : > { %1571 = vrot.lane.b32.xlu1 %v6251_v0, %s5766_s22  ;;  %5508 = vmatmul.mubr.msk.f32.gmra.mrb[8].mxu0 %vm2094_vm11, %v2059_v41  ;;  %v1687_v41 = vld [vmem:[#allocation2 + $0x141] sm:$0xff] }
 0x18e   : > { %1573 = vrot.lane.b32.xlu0 %v6273_v29, %s5766_s22 }
 0x18f   : > { %v1556_v51 = vpop.permute.xlu1 %1555 }
 0x190   : > { %1642 = vst.msk [vmem:[#allocation4 + $0x50] sm:$0xff] %vm1631_vm8, %v1556_v51  ;;  %v1558_v37 = vpop.permute.xlu0 %1557 }
 0x191   : > { %995 = vrot.lane.b32.xlu1 %v6251_v0, %s5763_s19  ;;  %1643 = vst.msk [vmem:[#allocation4 + $0x58] sm:$0xff] %vm1631_vm8, %v1558_v37 }
 0x192   : > { %997 = vrot.lane.b32.xlu0 %v6273_v29, %s5763_s19  ;;  %v1875_v29 = vld [vmem:[#allocation2 + $0x10a] sm:$0xff] }
 0x193   : > { %v980_v23 = vpop.permute.xlu1 %979 }
 0x194   : > { %1064 = vst.msk [vmem:[#allocation4 + $0x60] sm:$0xff] %vm1051_vm5, %v980_v23  ;;  %v982_v49 = vpop.permute.xlu0 %981 }
 0x195   : > { %1764 = vrot.lane.b32.xlu1 %v1682_v47, %s5767_s23  ;;  %1065 = vst.msk [vmem:[#allocation4 + $0x68] sm:$0xff] %vm1051_vm5, %v982_v49 }
 0x196   : > { %1766 = vrot.lane.b32.xlu0 %v1683_v30, %s5767_s23 }
 0x197   : > { %v1749_v0 = vpop.permute.xlu1 %1748 }
 0x198   : > { %1835 = vst.msk [vmem:[#allocation4 + $0x50] sm:$0xff] %vm1824_vm9, %v1749_v0  ;;  %v1751_v18 = vpop.permute.xlu0 %1750 }
 0x199   : > { %1188 = vrot.lane.b32.xlu1 %v1682_v47, %s5764_s20  ;;  %1836 = vst.msk [vmem:[#allocation4 + $0x58] sm:$0xff] %vm1824_vm9, %v1751_v18 }
 0x19a   : > { %1190 = vrot.lane.b32.xlu0 %v1683_v30, %s5764_s20  ;;  %v1880_v30 = vld [vmem:[#allocation2 + $0x142] sm:$0xff] }
 0x19b   : > { %v1173_v25 = vpop.permute.xlu1 %1172 }
 0x19c   : > { %1257 = vst.msk [vmem:[#allocation4 + $0x60] sm:$0xff] %vm1244_vm6, %v1173_v25  ;;  %v1175_v62 = vpop.permute.xlu0 %1174 }
 0x19d   : > { %1957 = vrot.lane.b32.xlu1 %v1875_v29, %s5768_s12  ;;  %1258 = vst.msk [vmem:[#allocation4 + $0x68] sm:$0xff] %vm1244_vm6, %v1175_v62 }
 0x19e   : > { %1959 = vrot.lane.b32.xlu0 %v1876_v52, %s5768_s12 }
 0x19f   : > { %v1942_v46 = vpop.permute.xlu1 %1941 }
 0x1a0   : > { %2028 = vst.msk [vmem:[#allocation4 + $0x50] sm:$0xff] %vm2017_vm10, %v1942_v46  ;;  %v1944_v57 = vpop.permute.xlu0 %1943 }
 0x1a1   : > { %1381 = vrot.lane.b32.xlu1 %v1875_v29, %s5765_s21  ;;  %2029 = vst.msk [vmem:[#allocation4 + $0x58] sm:$0xff] %vm2017_vm10, %v1944_v57  ;;  %v1496_v57 = vld [vmem:[#allocation2 + $0x158] sm:$0xff] }
 0x1a2   : > { %1383 = vrot.lane.b32.xlu0 %v1876_v52, %s5765_s21 }
 0x1a3   : > { %v1366_v58 = vpop.permute.xlu1 %1365 }
 0x1a4   : > { %1450 = vst.msk [vmem:[#allocation4 + $0x60] sm:$0xff] %vm1437_vm7, %v1366_v58  ;;  %v1368_v61 = vpop.permute.xlu0 %1367 }
 0x1a5   : > { %806 = vrot.lane.b32.xlu1 %v1875_v29, %s5762_s18  ;;  %1451 = vst.msk [vmem:[#allocation4 + $0x68] sm:$0xff] %vm1437_vm7, %v1368_v61 }
 0x1a6   : > { %808 = vrot.lane.b32.xlu0 %v1876_v52, %s5762_s18  ;;  %v1495_v52 = vld [vmem:[#allocation2 + $0x150] sm:$0xff] }
 0x1a7   : > { %v791_v27 = vpop.permute.xlu1 %790  ;;  %v2060_v20 = vld [vmem:[#allocation4 + $0x50] sm:$0xff] }
 0x1a8   : > { %873 = vst.msk [vmem:[#allocation4 + $0x70] sm:$0xff] %vm858_vm4, %v791_v27  ;;  %5510 = vmatprep.mubr.msk.f32.mxu0 %vm2094_vm11, %v2060_v20  ;;  %v793_v42 = vpop.permute.xlu0 %792  ;;  %v2061_v38 = vld [vmem:[#allocation4 + $0x58] sm:$0xff] }
 0x1a9   : > { %1575 = vrot.lane.b32.xlu1 %v6265_v34, %s5766_s22  ;;  %874 = vst.msk [vmem:[#allocation4 + $0x78] sm:$0xff] %vm858_vm4, %v793_v42  ;;  %5511 = vmatmul.mubr.msk.f32.gmra.mrb[10].mxu0 %vm2094_vm11, %v2061_v38  ;;  %v1688_v42 = vld [vmem:[#allocation2 + $0x151] sm:$0xff] }
 0x1aa   : > { %1577 = vrot.lane.b32.xlu0 %v6281_v22, %s5766_s22 }
 0x1ab   : > { %v1560_v54 = vpop.permute.xlu1 %1559 }
 0x1ac   : > { %1644 = vst.msk [vmem:[#allocation4 + $0x60] sm:$0xff] %vm1631_vm8, %v1560_v54  ;;  %v1562_v39 = vpop.permute.xlu0 %1561  ;;  %v1689_v54 = vld [vmem:[#allocation2 + $0x159] sm:$0xff] }
 0x1ad   : > { %999 = vrot.lane.b32.xlu1 %v6265_v34, %s5763_s19  ;;  %1645 = vst.msk [vmem:[#allocation4 + $0x68] sm:$0xff] %vm1631_vm8, %v1562_v39 }
 0x1ae   : > { %1001 = vrot.lane.b32.xlu0 %v6281_v22, %s5763_s19  ;;  %v1877_v22 = vld [vmem:[#allocation2 + $0x122] sm:$0xff] }
 0x1af   : > { %v984_v53 = vpop.permute.xlu1 %983 }
 0x1b0   : > { %1066 = vst.msk [vmem:[#allocation4 + $0x70] sm:$0xff] %vm1051_vm5, %v984_v53  ;;  %v986_v44 = vpop.permute.xlu0 %985 }
 0x1b1   : > { %1768 = vrot.lane.b32.xlu1 %v1684_v40, %s5767_s23  ;;  %1067 = vst.msk [vmem:[#allocation4 + $0x78] sm:$0xff] %vm1051_vm5, %v986_v44 }
 0x1b2   : > { %1770 = vrot.lane.b32.xlu0 %v1685_v43, %s5767_s23 }
 0x1b3   : > { %v1753_v24 = vpop.permute.xlu1 %1752 }
 0x1b4   : > { %1837 = vst.msk [vmem:[#allocation4 + $0x60] sm:$0xff] %vm1824_vm9, %v1753_v24  ;;  %v1755_v34 = vpop.permute.xlu0 %1754  ;;  %v1882_v24 = vld [vmem:[#allocation2 + $0x15a] sm:$0xff] }
 0x1b5   : > { %1192 = vrot.lane.b32.xlu1 %v1684_v40, %s5764_s20  ;;  %1838 = vst.msk [vmem:[#allocation4 + $0x68] sm:$0xff] %vm1824_vm9, %v1755_v34 }
 0x1b6   : > { %1194 = vrot.lane.b32.xlu0 %v1685_v43, %s5764_s20  ;;  %v1881_v43 = vld [vmem:[#allocation2 + $0x152] sm:$0xff] }
 0x1b7   : > { %v1177_v26 = vpop.permute.xlu1 %1176 }
 0x1b8   : > { %1259 = vst.msk [vmem:[#allocation4 + $0x70] sm:$0xff] %vm1244_vm6, %v1177_v26  ;;  %v1179_v55 = vpop.permute.xlu0 %1178 }
 0x1b9   : > { %1961 = vrot.lane.b32.xlu1 %v1877_v22, %s5768_s12  ;;  %1260 = vst.msk [vmem:[#allocation4 + $0x78] sm:$0xff] %vm1244_vm6, %v1179_v55 }
 0x1ba   : > { %1963 = vrot.lane.b32.xlu0 %v1878_v50, %s5768_s12 }
 0x1bb   : > { %v1946_v19 = vpop.permute.xlu1 %1945 }
 0x1bc   : > { %2030 = vst.msk [vmem:[#allocation4 + $0x60] sm:$0xff] %vm2017_vm10, %v1946_v19  ;;  %v1948_v7 = vpop.permute.xlu0 %1947  ;;  %v6911_v19 = vld [vmem:[%s8371_s2] ss:$0 sm:$0xff] }
 0x1bd   : > { %1385 = vrot.lane.b32.xlu1 %v1877_v22, %s5765_s21  ;;  %2031 = vst.msk [vmem:[#allocation4 + $0x68] sm:$0xff] %vm2017_vm10, %v1948_v7  ;;  %v1497_v7 = vld [vmem:[#allocation2 + $0x168] sm:$0xff] }
 0x1be   : > { %1387 = vrot.lane.b32.xlu0 %v1878_v50, %s5765_s21 }
 0x1bf   : > { %v1370_v36 = vpop.permute.xlu1 %1369 }
 0x1c0   : > { %1452 = vst.msk [vmem:[#allocation4 + $0x70] sm:$0xff] %vm1437_vm7, %v1370_v36  ;;  %v1372_v33 = vpop.permute.xlu0 %1371 }
 0x1c1   : > { %810 = vrot.lane.b32.xlu1 %v1877_v22, %s5762_s18  ;;  %1453 = vst.msk [vmem:[#allocation4 + $0x78] sm:$0xff] %vm1437_vm7, %v1372_v33 }
 0x1c2   : > { %812 = vrot.lane.b32.xlu0 %v1878_v50, %s5762_s18 }
 0x1c3   : > { %v795_v63 = vpop.permute.xlu1 %794  ;;  %v2062_v56 = vld [vmem:[#allocation4 + $0x60] sm:$0xff] }
 0x1c4   : > { %875 = vst.msk [vmem:[#allocation4 + $0x80] sm:$0xff] %vm858_vm4, %v795_v63  ;;  %5513 = vmatprep.mubr.msk.f32.mxu0 %vm2094_vm11, %v2062_v56  ;;  %v797_v59 = vpop.permute.xlu0 %796  ;;  %v2063_v48 = vld [vmem:[#allocation4 + $0x68] sm:$0xff] }
 0x1c5   : > { %1579 = vrot.lane.b32.xlu1 %v1493_v60, %s5766_s22  ;;  %876 = vst.msk [vmem:[#allocation4 + $0x88] sm:$0xff] %vm858_vm4, %v797_v59  ;;  %5514 = vmatmul.mubr.msk.f32.gmra.mrb[12].mxu0 %vm2094_vm11, %v2063_v48  ;;  %v1498_v59 = vld [vmem:[#allocation2 + $0x170] sm:$0xff] }
 0x1c6   : > { %1581 = vrot.lane.b32.xlu0 %v6288_v21, %s5766_s22 }
 0x1c7   : > { %v1564_v31 = vpop.permute.xlu1 %1563 }
 0x1c8   : > { %1646 = vst.msk [vmem:[#allocation4 + $0x70] sm:$0xff] %vm1631_vm8, %v1564_v31  ;;  %v1566_v28 = vpop.permute.xlu0 %1565 }
 0x1c9   : > { %1003 = vrot.lane.b32.xlu1 %v1493_v60, %s5763_s19  ;;  %1647 = vst.msk [vmem:[#allocation4 + $0x78] sm:$0xff] %vm1631_vm8, %v1566_v28 }
 0x1ca   : > { %1005 = vrot.lane.b32.xlu0 %v6288_v21, %s5763_s19  ;;  %v1879_v21 = vld [vmem:[#allocation2 + $0x13a] sm:$0xff] }
 0x1cb   : > { %v988_v35 = vpop.permute.xlu1 %987 }
 0x1cc   : > { %1068 = vst.msk [vmem:[#allocation4 + $0x80] sm:$0xff] %vm1051_vm5, %v988_v35  ;;  %v990_v51 = vpop.permute.xlu0 %989 }
 0x1cd   : > { %1772 = vrot.lane.b32.xlu1 %v1686_v32, %s5767_s23  ;;  %1069 = vst.msk [vmem:[#allocation4 + $0x88] sm:$0xff] %vm1051_vm5, %v990_v51 }
 0x1ce   : > { %1774 = vrot.lane.b32.xlu0 %v1687_v41, %s5767_s23 }
 0x1cf   : > { %v1757_v37 = vpop.permute.xlu1 %1756 }
 0x1d0   : > { %1839 = vst.msk [vmem:[#allocation4 + $0x70] sm:$0xff] %vm1824_vm9, %v1757_v37  ;;  %v1759_v47 = vpop.permute.xlu0 %1758 }
 0x1d1   : > { %1196 = vrot.lane.b32.xlu1 %v1686_v32, %s5764_s20  ;;  %1840 = vst.msk [vmem:[#allocation4 + $0x78] sm:$0xff] %vm1824_vm9, %v1759_v47 }
 0x1d2   : > { %1198 = vrot.lane.b32.xlu0 %v1687_v41, %s5764_s20 }
 0x1d3   : > { %v1181_v23 = vpop.permute.xlu1 %1180 }
 0x1d4   : > { %1261 = vst.msk [vmem:[#allocation4 + $0x80] sm:$0xff] %vm1244_vm6, %v1181_v23  ;;  %v1183_v49 = vpop.permute.xlu0 %1182 }
 0x1d5   : > { %1965 = vrot.lane.b32.xlu1 %v1879_v21, %s5768_s12  ;;  %1262 = vst.msk [vmem:[#allocation4 + $0x88] sm:$0xff] %vm1244_vm6, %v1183_v49 }
 0x1d6   : > { %1967 = vrot.lane.b32.xlu0 %v1880_v30, %s5768_s12 }
 0x1d7   : > { %v1950_v0 = vpop.permute.xlu1 %1949 }
 0x1d8   : > { %2032 = vst.msk [vmem:[#allocation4 + $0x70] sm:$0xff] %vm2017_vm10, %v1950_v0  ;;  %v1952_v18 = vpop.permute.xlu0 %1951 }
 0x1d9   : > { %1389 = vrot.lane.b32.xlu1 %v1879_v21, %s5765_s21  ;;  %2033 = vst.msk [vmem:[#allocation4 + $0x78] sm:$0xff] %vm2017_vm10, %v1952_v18 }
 0x1da   : > { %1391 = vrot.lane.b32.xlu0 %v1880_v30, %s5765_s21 }
 0x1db   : > { %v1374_v29 = vpop.permute.xlu1 %1373 }
 0x1dc   : > { %1454 = vst.msk [vmem:[#allocation4 + $0x80] sm:$0xff] %vm1437_vm7, %v1374_v29  ;;  %v1376_v25 = vpop.permute.xlu0 %1375 }
 0x1dd   : > { %814 = vrot.lane.b32.xlu1 %v1879_v21, %s5762_s18  ;;  %1455 = vst.msk [vmem:[#allocation4 + $0x88] sm:$0xff] %vm1437_vm7, %v1376_v25  ;;  %v1690_v21 = vld [vmem:[#allocation2 + $0x169] sm:$0xff] }
 0x1de   : > { %816 = vrot.lane.b32.xlu0 %v1880_v30, %s5762_s18  ;;  %v1691_v30 = vld [vmem:[#allocation2 + $0x171] sm:$0xff] }
 0x1df   : > { %v799_v62 = vpop.permute.xlu1 %798  ;;  %v2064_v46 = vld [vmem:[#allocation4 + $0x70] sm:$0xff] }
 0x1e0   : > { %877 = vst.msk [vmem:[#allocation4 + $0x90] sm:$0xff] %vm858_vm4, %v799_v62  ;;  %5516 = vmatprep.mubr.msk.f32.mxu0 %vm2094_vm11, %v2064_v46  ;;  %v801_v58 = vpop.permute.xlu0 %800  ;;  %v2065_v61 = vld [vmem:[#allocation4 + $0x78] sm:$0xff] }
 0x1e1   : > { %1583 = vrot.lane.b32.xlu1 %v1495_v52, %s5766_s22  ;;  %878 = vst.msk [vmem:[#allocation4 + $0x98] sm:$0xff] %vm858_vm4, %v801_v58  ;;  %5517 = vmatmul.mubr.msk.f32.gmra.mrb[14].mxu0 %vm2094_vm11, %v2065_v61  ;;  %v1884_v46 = vld [vmem:[#allocation2 + $0x172] sm:$0xff] }
 0x1e2   : > { %1585 = vrot.lane.b32.xlu0 %v1496_v57, %s5766_s22 }
 0x1e3   : > { %v1568_v27 = vpop.permute.xlu1 %1567 }
 0x1e4   : > { %1648 = vst.msk [vmem:[#allocation4 + $0x80] sm:$0xff] %vm1631_vm8, %v1568_v27  ;;  %v1570_v20 = vpop.permute.xlu0 %1569 }
 0x1e5   : > { %1007 = vrot.lane.b32.xlu1 %v1495_v52, %s5763_s19  ;;  %1649 = vst.msk [vmem:[#allocation4 + $0x88] sm:$0xff] %vm1631_vm8, %v1570_v20  ;;  %v1883_v52 = vld [vmem:[#allocation2 + $0x16a] sm:$0xff] }
 0x1e6   : > { %1009 = vrot.lane.b32.xlu0 %v1496_v57, %s5763_s19 }
 0x1e7   : > { %v992_v38 = vpop.permute.xlu1 %991 }
 0x1e8   : > { %1070 = vst.msk [vmem:[#allocation4 + $0x90] sm:$0xff] %vm1051_vm5, %v992_v38  ;;  %v994_v39 = vpop.permute.xlu0 %993 }
 0x1e9   : > { %1776 = vrot.lane.b32.xlu1 %v1688_v42, %s5767_s23  ;;  %1071 = vst.msk [vmem:[#allocation4 + $0x98] sm:$0xff] %vm1051_vm5, %v994_v39 }
 0x1ea   : > { %1778 = vrot.lane.b32.xlu0 %v1689_v54, %s5767_s23 }
 0x1eb   : > { %v1761_v40 = vpop.permute.xlu1 %1760 }
 0x1ec   : > { %1841 = vst.msk [vmem:[#allocation4 + $0x80] sm:$0xff] %vm1824_vm9, %v1761_v40  ;;  %v1763_v53 = vpop.permute.xlu0 %1762 }
 0x1ed   : > { %1200 = vrot.lane.b32.xlu1 %v1688_v42, %s5764_s20  ;;  %1842 = vst.msk [vmem:[#allocation4 + $0x88] sm:$0xff] %vm1824_vm9, %v1763_v53  ;;  %v1499_v53 = vld [vmem:[#allocation2 + $0x180] sm:$0xff] }
 0x1ee   : > { %1202 = vrot.lane.b32.xlu0 %v1689_v54, %s5764_s20 }
 0x1ef   : > { %v1185_v44 = vpop.permute.xlu1 %1184 }
 0x1f0   : > { %1263 = vst.msk [vmem:[#allocation4 + $0x90] sm:$0xff] %vm1244_vm6, %v1185_v44  ;;  %v1187_v34 = vpop.permute.xlu0 %1186 }
 0x1f1   : > { %1969 = vrot.lane.b32.xlu1 %v1881_v43, %s5768_s12  ;;  %1264 = vst.msk [vmem:[#allocation4 + $0x98] sm:$0xff] %vm1244_vm6, %v1187_v34 }
 0x1f2   : > { %1971 = vrot.lane.b32.xlu0 %v1882_v24, %s5768_s12 }
 0x1f3   : > { %v1954_v22 = vpop.permute.xlu1 %1953 }
 0x1f4   : > { %2034 = vst.msk [vmem:[#allocation4 + $0x80] sm:$0xff] %vm2017_vm10, %v1954_v22  ;;  %v1956_v26 = vpop.permute.xlu0 %1955  ;;  %v1500_v22 = vld [vmem:[#allocation2 + $0x188] sm:$0xff] }
 0x1f5   : > { %1393 = vrot.lane.b32.xlu1 %v1881_v43, %s5765_s21  ;;  %2035 = vst.msk [vmem:[#allocation4 + $0x88] sm:$0xff] %vm2017_vm10, %v1956_v26 }
 0x1f6   : > { %1395 = vrot.lane.b32.xlu0 %v1882_v24, %s5765_s21 }
 0x1f7   : > { %v1378_v50 = vpop.permute.xlu1 %1377 }
 0x1f8   : > { %1456 = vst.msk [vmem:[#allocation4 + $0x90] sm:$0xff] %vm1437_vm7, %v1378_v50  ;;  %v1380_v55 = vpop.permute.xlu0 %1379 }
 0x1f9   : > { %818 = vrot.lane.b32.xlu1 %v1881_v43, %s5762_s18  ;;  %1457 = vst.msk [vmem:[#allocation4 + $0x98] sm:$0xff] %vm1437_vm7, %v1380_v55 }
 0x1fa   : > { %820 = vrot.lane.b32.xlu0 %v1882_v24, %s5762_s18 }
 0x1fb   : > { %v5497_v36 = vpop.f32.mrb[0].mxu0  ;;  %v803_v33 = vpop.permute.xlu1 %802  ;;  %v2066_v60 = vld [vmem:[#allocation4 + $0x80] sm:$0xff] }
 0x1fc   : > { %v2267_v63 = vadd.f32 %v5497_v36, %v6911_v19  ;;  %879 = vst.msk [vmem:[#allocation4 + $0xa0] sm:$0xff] %vm858_vm4, %v803_v33  ;;  %v2261_v56 = vpop.f32.mrb[1].mxu0  ;;  %5519 = vmatprep.mubr.msk.f32.mxu1 %vm2094_vm11, %v2066_v60  ;;  %v805_v31 = vpop.permute.xlu0 %804  ;;  %v2067_v28 = vld [vmem:[#allocation4 + $0x88] sm:$0xff] }
 0x1fd   : > { %v2262_v48 = vadd.f32 %v6911_v19, %v2261_v56  ;;  %1587 = vrot.lane.b32.xlu1 %v1497_v7, %s5766_s22  ;;  %880 = vst.msk [vmem:[#allocation4 + $0xa8] sm:$0xff] %vm858_vm4, %v805_v31  ;;  %5520 = vmatmul.mubr.msk.f32.vlgmr.msra.gmra.mrb[0].mxu1 %vm2094_vm11, %v2067_v28  ;;  %v1692_v33 = vld [vmem:[#allocation2 + $0x181] sm:$0xff] }
 0x1fe   : > { %vm2421_vm14 = vcmp.ge.f32.partialorder %v2267_v63, 0.0  ;;  %v2453_v32 = vmul.f32 0.01, %v2267_v63  ;;  %1589 = vrot.lane.b32.xlu0 %v1498_v59, %s5766_s22 }
 0x1ff   : > { %vm2420_vm15 = vcmp.ge.f32.partialorder %v2262_v48, 0.0  ;;  %v2452_v35 = vmul.f32 0.01, %v2262_v48  ;;  %v1572_v41 = vpop.permute.xlu1 %1571 }
 0x200   : > { %v2485_v51 = vsel %vm2421_vm14, %v2267_v63, %v2453_v32  ;;  %1650 = vst.msk [vmem:[#allocation4 + $0x90] sm:$0xff] %vm1631_vm8, %v1572_v41  ;;  %v1574_v47 = vpop.permute.xlu0 %1573  ;;  %v1693_v63 = vld [vmem:[#allocation2 + $0x189] sm:$0xff] }
 0x201   : > { %2574 = vst.msk [vmem:[#allocation3 + $0x21] sm:$0xff] %vm2516_vm12, %v2485_v51  ;;  %v2484_v37 = vsel %vm2420_vm15, %v2262_v48, %v2452_v35  ;;  %1011 = vrot.lane.b32.xlu1 %v1497_v7, %s5763_s19  ;;  %v1885_v32 = vld [vmem:[#allocation2 + $0x182] sm:$0xff]  ;;  %v1886_v41 = vld [vmem:[#allocation2 + $0x18a] sm:$0xff] }
 0x202   : > { %2573 = vst.msk [vmem:[#allocation3 + $0x19] sm:$0xff] %vm2516_vm12, %v2484_v37  ;;  %1013 = vrot.lane.b32.xlu0 %v1498_v59, %s5763_s19 }
 0x203   : > { %1651 = vst.msk [vmem:[#allocation4 + $0x98] sm:$0xff] %vm1631_vm8, %v1574_v47  ;;  %v996_v23 = vpop.permute.xlu1 %995 }
 0x204   : > { %1072 = vst.msk [vmem:[#allocation4 + $0xa0] sm:$0xff] %vm1051_vm5, %v996_v23  ;;  %v998_v49 = vpop.permute.xlu0 %997 }
 0x205   : > { %1780 = vrot.lane.b32.xlu1 %v1690_v21, %s5767_s23  ;;  %1073 = vst.msk [vmem:[#allocation4 + $0xa8] sm:$0xff] %vm1051_vm5, %v998_v49 }
 0x206   : > { %1782 = vrot.lane.b32.xlu0 %v1691_v30, %s5767_s23 }
 0x207   : > { %v1765_v0 = vpop.permute.xlu1 %1764 }
 0x208   : > { %1843 = vst.msk [vmem:[#allocation4 + $0x90] sm:$0xff] %vm1824_vm9, %v1765_v0  ;;  %v1767_v18 = vpop.permute.xlu0 %1766  ;;  %v1501_v0 = vld [vmem:[#allocation2 + $0x198] sm:$0xff] }
 0x209   : > { %1204 = vrot.lane.b32.xlu1 %v1690_v21, %s5764_s20  ;;  %v6935_v29 = vld [vmem:[#allocation3 + $0x18] sm:$0xff]  ;;  %v6937_v25 = vld [vmem:[#allocation3 + $0x20] sm:$0xff]  ;;  %1844 = vst.msk [vmem:[#allocation4 + $0x98] sm:$0xff] %vm1824_vm9, %v1767_v18 }
 0x20a   : > { %2639 = vst.msk [vmem:[#allocation4 + $0x10] sm:$0xff] %vm2516_vm12, %v6935_v29  ;;  %2640 = vst.msk [vmem:[#allocation4 + $0x18] sm:$0xff] %vm2516_vm12, %v6937_v25  ;;  %1206 = vrot.lane.b32.xlu0 %v1691_v30, %s5764_s20  ;;  %v2605_v18 = vld [vmem:[#allocation3] sm:$0xff] }
 0x20b   : > { %v1189_v62 = vpop.permute.xlu1 %1188  ;;  %2637 = vst.msk [vmem:[#allocation4] sm:$0xff] %vm2516_vm12, %v2605_v18 }
 0x20c   : > { %1265 = vst.msk [vmem:[#allocation4 + $0xa0] sm:$0xff] %vm1244_vm6, %v1189_v62  ;;  %v1191_v57 = vpop.permute.xlu0 %1190 }
 0x20d   : > { %1973 = vrot.lane.b32.xlu1 %v1883_v52, %s5768_s12  ;;  %1266 = vst.msk [vmem:[#allocation4 + $0xa8] sm:$0xff] %vm1244_vm6, %v1191_v57 }
 0x20e   : > { %1975 = vrot.lane.b32.xlu0 %v1884_v46, %s5768_s12 }
 0x20f   : > { %v1958_v58 = vpop.permute.xlu1 %1957 }
 0x210   : > { %2036 = vst.msk [vmem:[#allocation4 + $0x90] sm:$0xff] %vm2017_vm10, %v1958_v58  ;;  %v1960_v61 = vpop.permute.xlu0 %1959 }
 0x211   : > { %1397 = vrot.lane.b32.xlu1 %v1883_v52, %s5765_s21  ;;  %2037 = vst.msk [vmem:[#allocation4 + $0x98] sm:$0xff] %vm2017_vm10, %v1960_v61  ;;  %v1694_v61 = vld [vmem:[#allocation2 + $0x199] sm:$0xff] }
 0x212   : > { %1399 = vrot.lane.b32.xlu0 %v1884_v46, %s5765_s21 }
 0x213   : > { %v1382_v27 = vpop.permute.xlu1 %1381  ;;  %v5500_v20 = vpop.f32.mrb[2].mxu0 }
 0x214   : > { %1458 = vst.msk [vmem:[#allocation4 + $0xa0] sm:$0xff] %vm1437_vm7, %v1382_v27  ;;  %v2277_v42 = vadd.f32 %v5500_v20, %v6911_v19  ;;  %v2271_v38 = vpop.f32.mrb[3].mxu0  ;;  %v1384_v39 = vpop.permute.xlu0 %1383  ;;  %v1502_v20 = vld [vmem:[#allocation2 + $0x1a0] sm:$0xff] }
 0x215   : > { %v2272_v54 = vadd.f32 %v6911_v19, %v2271_v38  ;;  %822 = vrot.lane.b32.xlu1 %v1883_v52, %s5762_s18  ;;  %1459 = vst.msk [vmem:[#allocation4 + $0xa8] sm:$0xff] %vm1437_vm7, %v1384_v39  ;;  %v1887_v39 = vld [vmem:[#allocation2 + $0x19a] sm:$0xff] }
 0x216   : > { %vm2423_vm1 = vcmp.ge.f32.partialorder %v2277_v42, 0.0  ;;  %v2455_v40 = vmul.f32 0.01, %v2277_v42  ;;  %824 = vrot.lane.b32.xlu0 %v1884_v46, %s5762_s18 }
 0x217   : > { %vm2422_vm3 = vcmp.ge.f32.partialorder %v2272_v54, 0.0  ;;  %v2454_v43 = vmul.f32 0.01, %v2272_v54  ;;  %v807_v44 = vpop.permute.xlu1 %806  ;;  %v2068_v24 = vld [vmem:[#allocation4 + $0x90] sm:$0xff] }
 0x218   : > { %v2487_v34 = vsel %vm2423_vm1, %v2277_v42, %v2455_v40  ;;  %881 = vst.msk [vmem:[#allocation4 + $0xb0] sm:$0xff] %vm858_vm4, %v807_v44  ;;  %5522 = vmatprep.mubr.msk.f32.mxu1 %vm2094_vm11, %v2068_v24  ;;  %v809_v50 = vpop.permute.xlu0 %808  ;;  %v2069_v55 = vld [vmem:[#allocation4 + $0x98] sm:$0xff] }
 0x219   : > { %2576 = vst.msk [vmem:[#allocation3 + $0x39] sm:$0xff] %vm2516_vm12, %v2487_v34  ;;  %v2486_v26 = vsel %vm2422_vm3, %v2272_v54, %v2454_v43  ;;  %1591 = vrot.lane.b32.xlu1 %v1499_v53, %s5766_s22  ;;  %5523 = vmatmul.mubr.msk.f32.gmra.mrb[2].mxu1 %vm2094_vm11, %v2069_v55  ;;  %v2606_v42 = vld [vmem:[#allocation3 + $0x8] sm:$0xff]  ;;  %v1695_v43 = vld [vmem:[#allocation2 + $0x1a1] sm:$0xff] }
 0x21a   : > { %2575 = vst.msk [vmem:[#allocation3 + $0x31] sm:$0xff] %vm2516_vm12, %v2486_v26  ;;  %1593 = vrot.lane.b32.xlu0 %v1500_v22, %s5766_s22  ;;  %2638 = vst.msk [vmem:[#allocation4 + $0x8] sm:$0xff] %vm2516_vm12, %v2606_v42 }
 0x21b   : > { %882 = vst.msk [vmem:[#allocation4 + $0xb8] sm:$0xff] %vm858_vm4, %v809_v50  ;;  %v1576_v7 = vpop.permute.xlu1 %1575  ;;  %v1888_v50 = vld [vmem:[#allocation2 + $0x1a2] sm:$0xff] }
 0x21c   : > { %1652 = vst.msk [vmem:[#allocation4 + $0xa0] sm:$0xff] %vm1631_vm8, %v1576_v7  ;;  %v1578_v36 = vpop.permute.xlu0 %1577  ;;  %v2862_v7 = vld [vmem:[#allocation3 + $0x2] sm:$0xff] }
 0x21d   : > { %1015 = vrot.lane.b32.xlu1 %v1499_v53, %s5763_s19  ;;  %1653 = vst.msk [vmem:[#allocation4 + $0xa8] sm:$0xff] %vm1631_vm8, %v1578_v36 }
 0x21e   : > { %1017 = vrot.lane.b32.xlu0 %v1500_v22, %s5763_s19  ;;  %v2669_v22 = vld [vmem:[#allocation3 + $0x1] sm:$0xff]  ;;  %s5769_s19 = smov 40  }
 0x21f   : > { %v1000_v60 = vpop.permute.xlu1 %999 }
 0x220   : > { %1074 = vst.msk [vmem:[#allocation4 + $0xb0] sm:$0xff] %vm1051_vm5, %v1000_v60  ;;  %v1002_v56 = vpop.permute.xlu0 %1001 }
 0x221   : > { %1784 = vrot.lane.b32.xlu1 %v1692_v33, %s5767_s23  ;;  %v6973_v59 = vld [vmem:[#allocation3 + $0x30] sm:$0xff]  ;;  %v6975_v48 = vld [vmem:[#allocation3 + $0x38] sm:$0xff]  ;;  %1075 = vst.msk [vmem:[#allocation4 + $0xb8] sm:$0xff] %vm1051_vm5, %v1002_v56 }
 0x222   : > { %2641 = vst.msk [vmem:[#allocation4 + $0x20] sm:$0xff] %vm2516_vm12, %v6973_v59  ;;  %2642 = vst.msk [vmem:[#allocation4 + $0x28] sm:$0xff] %vm2516_vm12, %v6975_v48  ;;  %1786 = vrot.lane.b32.xlu0 %v1693_v63, %s5767_s23  ;;  %v2863_v56 = vld [vmem:[#allocation3 + $0xa] sm:$0xff] }
 0x223   : > { %v1769_v31 = vpop.permute.xlu1 %1768 }
 0x224   : > { %1845 = vst.msk [vmem:[#allocation4 + $0xa0] sm:$0xff] %vm1824_vm9, %v1769_v31  ;;  %v1771_v28 = vpop.permute.xlu0 %1770 }
 0x225   : > { %1208 = vrot.lane.b32.xlu1 %v1692_v33, %s5764_s20  ;;  %1846 = vst.msk [vmem:[#allocation4 + $0xa8] sm:$0xff] %vm1824_vm9, %v1771_v28  ;;  %v2670_v33 = vld [vmem:[#allocation3 + $0x9] sm:$0xff] }
 0x226   : > { %1210 = vrot.lane.b32.xlu0 %v1693_v63, %s5764_s20 }
 0x227   : > { %v1193_v35 = vpop.permute.xlu1 %1192 }
 0x228   : > { %1267 = vst.msk [vmem:[#allocation4 + $0xb0] sm:$0xff] %vm1244_vm6, %v1193_v35  ;;  %v1195_v51 = vpop.permute.xlu0 %1194  ;;  %v5503_v37 = vpop.f32.mrb[4].mxu0  ;;  %v3248_v35 = vld [vmem:[#allocation3 + $0x19] sm:$0xff] }
 0x229   : > { %1977 = vrot.lane.b32.xlu1 %v1885_v32, %s5768_s12  ;;  %1268 = vst.msk [vmem:[#allocation4 + $0xb8] sm:$0xff] %vm1244_vm6, %v1195_v51  ;;  %v2287_v47 = vadd.f32 %v5503_v37, %v6911_v19  ;;  %v2281_v21 = vpop.f32.mrb[5].mxu0 }
 0x22a   : > { %1979 = vrot.lane.b32.xlu0 %v1886_v41, %s5768_s12  ;;  %v2282_v30 = vadd.f32 %v6911_v19, %v2281_v21 }
 0x22b   : > { %v1962_v23 = vpop.permute.xlu1 %1961  ;;  %vm2425_vm13 = vcmp.ge.f32.partialorder %v2287_v47, 0.0  ;;  %v2457_v49 = vmul.f32 0.01, %v2287_v47 }
 0x22c   : > { %2038 = vst.msk [vmem:[#allocation4 + $0xa0] sm:$0xff] %vm2017_vm10, %v1962_v23  ;;  %vm2424_vm14 = vcmp.ge.f32.partialorder %v2282_v30, 0.0  ;;  %v2456_v52 = vmul.f32 0.01, %v2282_v30  ;;  %v1964_v62 = vpop.permute.xlu0 %1963 }
 0x22d   : > { %1401 = vrot.lane.b32.xlu1 %v1885_v32, %s5765_s21  ;;  %v2489_v46 = vsel %vm2425_vm13, %v2287_v47, %v2457_v49  ;;  %2039 = vst.msk [vmem:[#allocation4 + $0xa8] sm:$0xff] %vm2017_vm10, %v1964_v62  ;;  %v3249_v49 = vld [vmem:[#allocation3 + $0x21] sm:$0xff] }
 0x22e   : > { %2578 = vst.msk [vmem:[#allocation3 + $0x51] sm:$0xff] %vm2516_vm12, %v2489_v46  ;;  %v2488_v57 = vsel %vm2424_vm14, %v2282_v30, %v2456_v52  ;;  %1595 = vrot.lane.b32.xlu0 %v1501_v0, %s5766_s22  ;;  %v3441_v46 = vld [vmem:[#allocation3 + $0x1a] sm:$0xff] }
 0x22f   : > { %v1386_v58 = vpop.permute.xlu1 %1385  ;;  %2577 = vst.msk [vmem:[#allocation3 + $0x49] sm:$0xff] %vm2516_vm12, %v2488_v57 }
 0x230   : > { %1460 = vst.msk [vmem:[#allocation4 + $0xb0] sm:$0xff] %vm1437_vm7, %v1386_v58  ;;  %v1388_v27 = vpop.permute.xlu0 %1387 }
 0x231   : > { %1403 = vrot.lane.b32.xlu1 %v1886_v41, %s5765_s21  ;;  %1461 = vst.msk [vmem:[#allocation4 + $0xb8] sm:$0xff] %vm1437_vm7, %v1388_v27 }
 0x232   : > { %1788 = vrot.lane.b32.xlu0 %v1694_v61, %s5767_s23  ;;  %v3442_v61 = vld [vmem:[#allocation3 + $0x22] sm:$0xff] }
 0x233   : > { %v811_v38 = vpop.permute.xlu1 %810  ;;  %v2070_v54 = vld [vmem:[#allocation4 + $0xa0] sm:$0xff] }
 0x234   : > { %883 = vst.msk [vmem:[#allocation4 + $0xc0] sm:$0xff] %vm858_vm4, %v811_v38  ;;  %5525 = vmatprep.mubr.msk.f32.mxu1 %vm2094_vm11, %v2070_v54  ;;  %v813_v40 = vpop.permute.xlu0 %812  ;;  %v2071_v53 = vld [vmem:[#allocation4 + $0xa8] sm:$0xff] }
 0x235   : > { %1597 = vrot.lane.b32.xlu1 %v1502_v20, %s5766_s22  ;;  %884 = vst.msk [vmem:[#allocation4 + $0xc8] sm:$0xff] %vm858_vm4, %v813_v40  ;;  %5526 = vmatmul.mubr.msk.f32.gmra.mrb[4].mxu1 %vm2094_vm11, %v2071_v53  ;;  %v4247_v40 = vld [vmem:[%s8372_s3 + $0x8] sm:$0xff] }
 0x236   : > { %1981 = vrot.lane.b32.xlu0 %v1887_v39, %s5768_s12  ;;  %v7011_v24 = vld [vmem:[#allocation3 + $0x48] sm:$0xff]  ;;  %v7013_v34 = vld [vmem:[#allocation3 + $0x50] sm:$0xff] }
 0x237   : > { %v1580_v44 = vpop.permute.xlu1 %1579  ;;  %2643 = vst.msk [vmem:[#allocation4 + $0x30] sm:$0xff] %vm2516_vm12, %v7011_v24  ;;  %2644 = vst.msk [vmem:[#allocation4 + $0x38] sm:$0xff] %vm2516_vm12, %v7013_v34  ;;  %v4246_v39 = vld [vmem:[%s8372_s3] sm:$0xff] }
 0x238   : > { %1654 = vst.msk [vmem:[#allocation4 + $0xb0] sm:$0xff] %vm1631_vm8, %v1580_v44  ;;  %v1582_v26 = vpop.permute.xlu0 %1581 }
 0x239   : > { %1790 = vrot.lane.b32.xlu1 %v1695_v43, %s5767_s23  ;;  %1655 = vst.msk [vmem:[#allocation4 + $0xb8] sm:$0xff] %vm1631_vm8, %v1582_v26  ;;  %v5672_v43 = vpack.c.bf16 %v4247_v40, %v4246_v39  ;;  %v4249_v26 = vld [vmem:[%s8372_s3 + $0x18] sm:$0xff]  ;;  %s8224_s23 = scalar_lea.vmem %s8377_s8, %s5370_s13 }
 0x23a   : > { %2733 = vrot.lane.b32.xlu0 %v2669_v22, %s5762_s18  ;;  %v4248_v22 = vld [vmem:[%s8372_s3 + $0x10] sm:$0xff] }
 0x23b   : > { %v1004_v55 = vpop.permute.xlu1 %1003  ;;  %5673 = vmatprep.subr.bf16.mxu1 %v5672_v43 }
 0x23c   : > { %1076 = vst.msk [vmem:[#allocation4 + $0xc0] sm:$0xff] %vm1051_vm5, %v1004_v55  ;;  %v1006_v36 = vpop.permute.xlu0 %1005  ;;  %5675 = vmatpush3.bf16.msra.mxu1 %v5672_v43  ;;  %v5676_v55 = vpack.c.bf16 %v4249_v26, %v4248_v22 }
 0x23d   : > { %1983 = vrot.lane.b32.xlu1 %v1888_v50, %s5768_s12  ;;  %1077 = vst.msk [vmem:[#allocation4 + $0xc8] sm:$0xff] %vm1051_vm5, %v1006_v36  ;;  %v3828_v36 = vld [vmem:[#allocation3 + $0x31] sm:$0xff] }
 0x23e   : > { %2926 = vrot.lane.b32.xlu0 %v2862_v7, %s5764_s20  ;;  %5677 = vmatprep.subr.bf16.mxu1 %v5676_v55 }
 0x23f   : > { %v1773_v60 = vpop.permute.xlu1 %1772 }
 0x240   : > { %1847 = vst.msk [vmem:[#allocation4 + $0xb0] sm:$0xff] %vm1824_vm9, %v1773_v60  ;;  %v1775_v63 = vpop.permute.xlu0 %1774  ;;  %5679 = vmatpush3.bf16.msra.mxu1 %v5676_v55 }
 0x241   : > { %2735 = vrot.lane.b32.xlu1 %v2670_v33, %s5762_s18  ;;  %1848 = vst.msk [vmem:[#allocation4 + $0xb8] sm:$0xff] %vm1824_vm9, %v1775_v63  ;;  %v4250_v33 = vld [vmem:[%s8372_s3 + $0x20] sm:$0xff] }
 0x242   : > { %3119 = vrot.lane.b32.xlu0 %v6935_v29, %s5766_s22 }
 0x243   : > { %v1197_v31 = vpop.permute.xlu1 %1196 }
 0x244   : > { %1269 = vst.msk [vmem:[#allocation4 + $0xc0] sm:$0xff] %vm1244_vm6, %v1197_v31  ;;  %v1199_v28 = vpop.permute.xlu0 %1198  ;;  %v5506_v32 = vpop.f32.mrb[6].mxu0  ;;  %v3829_v31 = vld [vmem:[#allocation3 + $0x39] sm:$0xff] }
 0x245   : > { %2928 = vrot.lane.b32.xlu1 %v2863_v56, %s5764_s20  ;;  %1270 = vst.msk [vmem:[#allocation4 + $0xc8] sm:$0xff] %vm1244_vm6, %v1199_v28  ;;  %v2297_v41 = vadd.f32 %v5506_v32, %v6911_v19  ;;  %v2291_v51 = vpop.f32.mrb[7].mxu0 }
 0x246   : > { %3312 = vrot.lane.b32.xlu0 %v3248_v35, %s5768_s12  ;;  %v2292_v47 = vadd.f32 %v6911_v19, %v2291_v51  ;;  %v4252_v51 = vld [vmem:[%s8372_s3 + $0x30] sm:$0xff] }
 0x247   : > { %v1966_v37 = vpop.permute.xlu1 %1965  ;;  %vm2427_vm15 = vcmp.ge.f32.partialorder %v2297_v41, 0.0  ;;  %v2459_v29 = vmul.f32 0.01, %v2297_v41 }
 0x248   : > { %2040 = vst.msk [vmem:[#allocation4 + $0xb0] sm:$0xff] %vm2017_vm10, %v1966_v37  ;;  %vm2426_vm1 = vcmp.ge.f32.partialorder %v2292_v47, 0.0  ;;  %v2458_v21 = vmul.f32 0.01, %v2292_v47  ;;  %v1968_v23 = vpop.permute.xlu0 %1967  ;;  %v4253_v37 = vld [vmem:[%s8372_s3 + $0x38] sm:$0xff] }
 0x249   : > { %3121 = vrot.lane.b32.xlu1 %v6937_v25, %s5766_s22  ;;  %v2491_v30 = vsel %vm2427_vm15, %v2297_v41, %v2459_v29  ;;  %2041 = vst.msk [vmem:[#allocation4 + $0xb8] sm:$0xff] %vm2017_vm10, %v1968_v23 }
 0x24a   : > { %2580 = vst.msk [vmem:[#allocation3 + $0x69] sm:$0xff] %vm2516_vm12, %v2491_v30  ;;  %v2490_v0 = vsel %vm2426_vm1, %v2292_v47, %v2458_v21  ;;  %3314 = vrot.lane.b32.xlu0 %v3249_v49, %s5768_s12  ;;  %v5684_v21 = vpack.c.bf16 %v4253_v37, %v4252_v51 }
 0x24b   : > { %v1390_v18 = vpop.permute.xlu1 %1389  ;;  %2579 = vst.msk [vmem:[#allocation3 + $0x61] sm:$0xff] %vm2516_vm12, %v2490_v0  ;;  %v4021_v0 = vld [vmem:[#allocation3 + $0x32] sm:$0xff] }
 0x24c   : > { %1462 = vst.msk [vmem:[#allocation4 + $0xc0] sm:$0xff] %vm1437_vm7, %v1390_v18  ;;  %v1392_v52 = vpop.permute.xlu0 %1391 }
 0x24d   : > { %2737 = vrot.lane.b32.xlu1 %v3248_v35, %s5762_s18  ;;  %1463 = vst.msk [vmem:[#allocation4 + $0xc8] sm:$0xff] %vm1437_vm7, %v1392_v52  ;;  %v4254_v52 = vld [vmem:[%s8372_s3 + $0x40] sm:$0xff] }
 0x24e   : > { %2739 = vrot.lane.b32.xlu0 %v3249_v49, %s5762_s18 }
 0x24f   : > { %v815_v25 = vpop.permute.xlu1 %814  ;;  %v2072_v62 = vld [vmem:[#allocation4 + $0xb0] sm:$0xff] }
 0x250   : > { %885 = vst.msk [vmem:[#allocation4 + $0xd0] sm:$0xff] %vm858_vm4, %v815_v25  ;;  %5528 = vmatprep.mubr.msk.f32.mxu1 %vm2094_vm11, %v2072_v62  ;;  %v817_v57 = vpop.permute.xlu0 %816  ;;  %v2073_v58 = vld [vmem:[#allocation4 + $0xb8] sm:$0xff] }
 0x251   : > { %3505 = vrot.lane.b32.xlu1 %v3441_v46, %s5769_s19  ;;  %886 = vst.msk [vmem:[#allocation4 + $0xd8] sm:$0xff] %vm858_vm4, %v817_v57  ;;  %5529 = vmatmul.mubr.msk.f32.gmra.mrb[6].mxu1 %vm2094_vm11, %v2073_v58 }
 0x252   : > { %3507 = vrot.lane.b32.xlu0 %v3442_v61, %s5769_s19  ;;  %v7055_v20 = vld [vmem:[#allocation3 + $0x60] sm:$0xff]  ;;  %v7057_v42 = vld [vmem:[#allocation3 + $0x68] sm:$0xff] }
 0x253   : > { %v1584_v27 = vpop.permute.xlu1 %1583  ;;  %2645 = vst.msk [vmem:[#allocation4 + $0x40] sm:$0xff] %vm2516_vm12, %v7055_v20  ;;  %2646 = vst.msk [vmem:[#allocation4 + $0x48] sm:$0xff] %vm2516_vm12, %v7057_v42 }
 0x254   : > { %1656 = vst.msk [vmem:[#allocation4 + $0xc0] sm:$0xff] %vm1631_vm8, %v1584_v27  ;;  %v1586_v38 = vpop.permute.xlu0 %1585 }
 0x255   : > { %2930 = vrot.lane.b32.xlu1 %v3441_v46, %s5764_s20  ;;  %1657 = vst.msk [vmem:[#allocation4 + $0xc8] sm:$0xff] %vm1631_vm8, %v1586_v38  ;;  %v4022_v38 = vld [vmem:[#allocation3 + $0x3a] sm:$0xff] }
 0x256   : > { %2932 = vrot.lane.b32.xlu0 %v3442_v61, %s5764_s20 }
 0x257   : > { %v1008_v54 = vpop.permute.xlu1 %1007 }
 0x258   : > { %1078 = vst.msk [vmem:[#allocation4 + $0xd0] sm:$0xff] %vm1051_vm5, %v1008_v54  ;;  %v1010_v53 = vpop.permute.xlu0 %1009 }
 0x259   : > { %3699 = vrot.lane.b32.xlu1 %v6973_v59, %s5770_s26  ;;  %1079 = vst.msk [vmem:[#allocation4 + $0xd8] sm:$0xff] %vm1051_vm5, %v1010_v53 }
 0x25a   : > { %3701 = vrot.lane.b32.xlu0 %v6975_v48, %s5770_s26 }
 0x25b   : > { %v1777_v44 = vpop.permute.xlu1 %1776 }
 0x25c   : > { %1849 = vst.msk [vmem:[#allocation4 + $0xc0] sm:$0xff] %vm1824_vm9, %v1777_v44  ;;  %v1779_v50 = vpop.permute.xlu0 %1778 }
 0x25d   : > { %3123 = vrot.lane.b32.xlu1 %v6973_v59, %s5766_s22  ;;  %1850 = vst.msk [vmem:[#allocation4 + $0xc8] sm:$0xff] %vm1824_vm9, %v1779_v50  ;;  %v4251_v59 = vld [vmem:[%s8372_s3 + $0x28] sm:$0xff] }
 0x25e   : > { %3125 = vrot.lane.b32.xlu0 %v6975_v48, %s5766_s22  ;;  %v5680_v56 = vpack.c.bf16 %v4251_v59, %v4250_v33  ;;  %v3830_v59 = vld [vmem:[#allocation3 + $0x49] sm:$0xff] }
 0x25f   : > { %v1201_v7 = vpop.permute.xlu1 %1200 }
 0x260   : > { %1271 = vst.msk [vmem:[#allocation4 + $0xd0] sm:$0xff] %vm1244_vm6, %v1201_v7  ;;  %v1203_v60 = vpop.permute.xlu0 %1202  ;;  %v5509_v63 = vpop.f32.mrb[8].mxu0  ;;  %5681 = vmatprep.subr.bf16.mxu1 %v5680_v56 }
 0x261   : > { %3892 = vrot.lane.b32.xlu1 %v3828_v36, %s5771_s17  ;;  %1272 = vst.msk [vmem:[#allocation4 + $0xd8] sm:$0xff] %vm1244_vm6, %v1203_v60  ;;  %v2307_v48 = vadd.f32 %v5509_v63, %v6911_v19  ;;  %v2301_v28 = vpop.f32.mrb[9].mxu0  ;;  %5683 = vmatpush3.bf16.msra.mxu1 %v5680_v56  ;;  %v3831_v56 = vld [vmem:[#allocation3 + $0x51] sm:$0xff] }
 0x262   : > { %3894 = vrot.lane.b32.xlu0 %v3829_v31, %s5771_s17  ;;  %v2302_v35 = vadd.f32 %v6911_v19, %v2301_v28  ;;  %5685 = vmatprep.subr.bf16.mxu1 %v5684_v21 }
 0x263   : > { %v1970_v32 = vpop.permute.xlu1 %1969  ;;  %vm2429_vm3 = vcmp.ge.f32.partialorder %v2307_v48, 0.0  ;;  %v2461_v41 = vmul.f32 0.01, %v2307_v48 }
 0x264   : > { %2042 = vst.msk [vmem:[#allocation4 + $0xc0] sm:$0xff] %vm2017_vm10, %v1970_v32  ;;  %vm2428_vm13 = vcmp.ge.f32.partialorder %v2302_v35, 0.0  ;;  %v2460_v47 = vmul.f32 0.01, %v2302_v35  ;;  %v1972_v29 = vpop.permute.xlu0 %1971 }
 0x265   : > { %3316 = vrot.lane.b32.xlu1 %v3828_v36, %s5768_s12  ;;  %v2493_v23 = vsel %vm2429_vm3, %v2307_v48, %v2461_v41  ;;  %2043 = vst.msk [vmem:[#allocation4 + $0xc8] sm:$0xff] %vm2017_vm10, %v1972_v29  ;;  %5687 = vmatpush3.bf16.msra.mxu1 %v5684_v21  ;;  %vm3795_vm3 = vcmask 458112  }
 0x266   : > { %2582 = vst.msk [vmem:[#allocation3 + $0x81] sm:$0xff] %vm2516_vm12, %v2493_v23  ;;  %v2492_v30 = vsel %vm2428_vm13, %v2302_v35, %v2460_v47  ;;  %2741 = vrot.lane.b32.xlu0 %v3828_v36, %s5762_s18  ;;  %5559 = vmatprep.subr.mxu1 %v4254_v52  ;;  %v4023_v35 = vld [vmem:[#allocation3 + $0x4a] sm:$0xff]  ;;  %vm3988_vm13 = vcmask 523712  }
 0x267   : > { %v1394_v49 = vpop.permute.xlu1 %1393  ;;  %2581 = vst.msk [vmem:[#allocation3 + $0x79] sm:$0xff] %vm2516_vm12, %v2492_v30  ;;  %v4024_v30 = vld [vmem:[#allocation3 + $0x52] sm:$0xff] }
 0x268   : > { %1464 = vst.msk [vmem:[#allocation4 + $0xd0] sm:$0xff] %vm1437_vm7, %v1394_v49  ;;  %v1396_v18 = vpop.permute.xlu0 %1395 }
 0x269   : > { %4085 = vrot.lane.b32.xlu1 %v4021_v0, %s5772_s29  ;;  %1465 = vst.msk [vmem:[#allocation4 + $0xd8] sm:$0xff] %vm1437_vm7, %v1396_v18  ;;  %5560 = vmatpush3.msra.mxu1 %v4254_v52 }
 0x26a   : > { %3509 = vrot.lane.b32.xlu0 %v4021_v0, %s5769_s19 }
 0x26b   : > { %v819_v25 = vpop.permute.xlu1 %818  ;;  %v2074_v62 = vld [vmem:[#allocation4 + $0xc0] sm:$0xff] }
 0x26c   : > { %887 = vst.msk [vmem:[#allocation4 + $0xe0] sm:$0xff] %vm858_vm4, %v819_v25  ;;  %5531 = vmatprep.mubr.msk.f32.mxu1 %vm2094_vm11, %v2074_v62  ;;  %v821_v46 = vpop.permute.xlu0 %820  ;;  %v2075_v57 = vld [vmem:[#allocation4 + $0xc8] sm:$0xff] }
 0x26d   : > { %3318 = vrot.lane.b32.xlu1 %v3829_v31, %s5768_s12  ;;  %888 = vst.msk [vmem:[#allocation4 + $0xe8] sm:$0xff] %vm858_vm4, %v821_v46  ;;  %5532 = vmatmul.mubr.msk.f32.gmra.mrb[8].mxu1 %vm2094_vm11, %v2075_v57 }
 0x26e   : > { %2743 = vrot.lane.b32.xlu0 %v3829_v31, %s5762_s18  ;;  %v7128_v61 = vld [vmem:[#allocation3 + $0x78] sm:$0xff]  ;;  %v7130_v27 = vld [vmem:[#allocation3 + $0x80] sm:$0xff] }
 0x26f   : > { %v1588_v58 = vpop.permute.xlu1 %1587  ;;  %2647 = vst.msk [vmem:[#allocation4 + $0x50] sm:$0xff] %vm2516_vm12, %v7128_v61  ;;  %2648 = vst.msk [vmem:[#allocation4 + $0x58] sm:$0xff] %vm2516_vm12, %v7130_v27 }
 0x270   : > { %1658 = vst.msk [vmem:[#allocation4 + $0xd0] sm:$0xff] %vm1631_vm8, %v1588_v58  ;;  %v1590_v54 = vpop.permute.xlu0 %1589 }
 0x271   : > { %4087 = vrot.lane.b32.xlu1 %v4022_v38, %s5772_s29  ;;  %1659 = vst.msk [vmem:[#allocation4 + $0xd8] sm:$0xff] %vm1631_vm8, %v1590_v54 }
 0x272   : > { %3511 = vrot.lane.b32.xlu0 %v4022_v38, %s5769_s19 }
 0x273   : > { %v1012_v39 = vpop.permute.xlu1 %1011 }
 0x274   : > { %1080 = vst.msk [vmem:[#allocation4 + $0xe0] sm:$0xff] %vm1051_vm5, %v1012_v39  ;;  %v1014_v40 = vpop.permute.xlu0 %1013 }
 0x275   : > { %2934 = vrot.lane.b32.xlu1 %v4021_v0, %s5764_s20  ;;  %1081 = vst.msk [vmem:[#allocation4 + $0xe8] sm:$0xff] %vm1051_vm5, %v1014_v40 }
 0x276   : > { %2936 = vrot.lane.b32.xlu0 %v4022_v38, %s5764_s20 }
 0x277   : > { %v1781_v53 = vpop.permute.xlu1 %1780 }
 0x278   : > { %1851 = vst.msk [vmem:[#allocation4 + $0xd0] sm:$0xff] %vm1824_vm9, %v1781_v53  ;;  %v1783_v43 = vpop.permute.xlu0 %1782 }
 0x279   : > { %3703 = vrot.lane.b32.xlu1 %v7011_v24, %s5770_s26  ;;  %1852 = vst.msk [vmem:[#allocation4 + $0xd8] sm:$0xff] %vm1824_vm9, %v1783_v43 }
 0x27a   : > { %3705 = vrot.lane.b32.xlu0 %v7013_v34, %s5770_s26 }
 0x27b   : > { %v1205_v44 = vpop.permute.xlu1 %1204 }
 0x27c   : > { %1273 = vst.msk [vmem:[#allocation4 + $0xe0] sm:$0xff] %vm1244_vm6, %v1205_v44  ;;  %v1207_v22 = vpop.permute.xlu0 %1206  ;;  %v5512_v26 = vpop.f32.mrb[10].mxu0 }
 0x27d   : > { %3127 = vrot.lane.b32.xlu1 %v7011_v24, %s5766_s22  ;;  %1274 = vst.msk [vmem:[#allocation4 + $0xe8] sm:$0xff] %vm1244_vm6, %v1207_v22  ;;  %v2317_v50 = vadd.f32 %v5512_v26, %v6911_v19  ;;  %v2311_v55 = vpop.f32.mrb[11].mxu0  ;;  %v3832_v22 = vld [vmem:[#allocation3 + $0x61] sm:$0xff] }
 0x27e   : > { %3129 = vrot.lane.b32.xlu0 %v7013_v34, %s5766_s22  ;;  %v2312_v36 = vadd.f32 %v6911_v19, %v2311_v55 }
 0x27f   : > { %v1974_v7 = vpop.permute.xlu1 %1973  ;;  %vm2431_vm14 = vcmp.ge.f32.partialorder %v2317_v50, 0.0  ;;  %v2463_v33 = vmul.f32 0.01, %v2317_v50 }
 0x280   : > { %2044 = vst.msk [vmem:[#allocation4 + $0xd0] sm:$0xff] %vm2017_vm10, %v1974_v7  ;;  %vm2430_vm15 = vcmp.ge.f32.partialorder %v2312_v36, 0.0  ;;  %v2462_v60 = vmul.f32 0.01, %v2312_v36  ;;  %v1976_v24 = vpop.permute.xlu0 %1975 }
 0x281   : > { %3896 = vrot.lane.b32.xlu1 %v3830_v59, %s5771_s17  ;;  %v2495_v63 = vsel %vm2431_vm14, %v2317_v50, %v2463_v33  ;;  %2045 = vst.msk [vmem:[#allocation4 + $0xd8] sm:$0xff] %vm2017_vm10, %v1976_v24 }
 0x282   : > { %2584 = vst.msk [vmem:[#allocation3 + $0x99] sm:$0xff] %vm2516_vm12, %v2495_v63  ;;  %v2494_v48 = vsel %vm2430_vm15, %v2312_v36, %v2462_v60  ;;  %3898 = vrot.lane.b32.xlu0 %v3831_v56, %s5771_s17  ;;  %v4025_v60 = vld [vmem:[#allocation3 + $0x62] sm:$0xff] }
 0x283   : > { %v1398_v34 = vpop.permute.xlu1 %1397  ;;  %2583 = vst.msk [vmem:[#allocation3 + $0x91] sm:$0xff] %vm2516_vm12, %v2494_v48 }
 0x284   : > { %1466 = vst.msk [vmem:[#allocation4 + $0xe0] sm:$0xff] %vm1437_vm7, %v1398_v34  ;;  %v1400_v31 = vpop.permute.xlu0 %1399  ;;  %v4026_v34 = vld [vmem:[#allocation3 + $0x6a] sm:$0xff] }
 0x285   : > { %3320 = vrot.lane.b32.xlu1 %v3830_v59, %s5768_s12  ;;  %1467 = vst.msk [vmem:[#allocation4 + $0xe8] sm:$0xff] %vm1437_vm7, %v1400_v31 }
 0x286   : > { %2745 = vrot.lane.b32.xlu0 %v3830_v59, %s5762_s18 }
 0x287   : > { %v823_v28 = vpop.permute.xlu1 %822  ;;  %v2076_v32 = vld [vmem:[#allocation4 + $0xd0] sm:$0xff] }
 0x288   : > { %889 = vst.msk [vmem:[#allocation4 + $0xf0] sm:$0xff] %vm858_vm4, %v823_v28  ;;  %5534 = vmatprep.mubr.msk.f32.mxu1 %vm2094_vm11, %v2076_v32  ;;  %v825_v41 = vpop.permute.xlu0 %824  ;;  %v2077_v51 = vld [vmem:[#allocation4 + $0xd8] sm:$0xff] }
 0x289   : > { %4089 = vrot.lane.b32.xlu1 %v4023_v35, %s5772_s29  ;;  %890 = vst.msk [vmem:[#allocation4 + $0xf8] sm:$0xff] %vm858_vm4, %v825_v41  ;;  %5535 = vmatmul.mubr.msk.f32.gmra.mrb[10].mxu1 %vm2094_vm11, %v2077_v51 }
 0x28a   : > { %3513 = vrot.lane.b32.xlu0 %v4023_v35, %s5769_s19  ;;  %v7174_v47 = vld [vmem:[#allocation3 + $0x90] sm:$0xff]  ;;  %v7176_v29 = vld [vmem:[#allocation3 + $0x98] sm:$0xff] }
 0x28b   : > { %v1592_v37 = vpop.permute.xlu1 %1591  ;;  %2649 = vst.msk [vmem:[#allocation4 + $0x60] sm:$0xff] %vm2516_vm12, %v7174_v47  ;;  %2650 = vst.msk [vmem:[#allocation4 + $0x68] sm:$0xff] %vm2516_vm12, %v7176_v29 }
 0x28c   : > { %1660 = vst.msk [vmem:[#allocation4 + $0xe0] sm:$0xff] %vm1631_vm8, %v1592_v37  ;;  %v1594_v21 = vpop.permute.xlu0 %1593 }
 0x28d   : > { %3322 = vrot.lane.b32.xlu1 %v3831_v56, %s5768_s12  ;;  %1661 = vst.msk [vmem:[#allocation4 + $0xe8] sm:$0xff] %vm1631_vm8, %v1594_v21 }
 0x28e   : > { %2747 = vrot.lane.b32.xlu0 %v3831_v56, %s5762_s18 }
 0x28f   : > { %v1016_v23 = vpop.permute.xlu1 %1015 }
 0x290   : > { %1082 = vst.msk [vmem:[#allocation4 + $0xf0] sm:$0xff] %vm1051_vm5, %v1016_v23  ;;  %v1018_v49 = vpop.permute.xlu0 %1017 }
 0x291   : > { %4091 = vrot.lane.b32.xlu1 %v4024_v30, %s5772_s29  ;;  %1083 = vst.msk [vmem:[#allocation4 + $0xf8] sm:$0xff] %vm1051_vm5, %v1018_v49 }
 0x292   : > { %3515 = vrot.lane.b32.xlu0 %v4024_v30, %s5769_s19 }
 0x293   : > { %v1785_v0 = vpop.permute.xlu1 %1784 }
 0x294   : > { %1853 = vst.msk [vmem:[#allocation4 + $0xe0] sm:$0xff] %vm1824_vm9, %v1785_v0  ;;  %v1787_v18 = vpop.permute.xlu0 %1786 }
 0x295   : > { %2938 = vrot.lane.b32.xlu1 %v4023_v35, %s5764_s20  ;;  %1854 = vst.msk [vmem:[#allocation4 + $0xe8] sm:$0xff] %vm1824_vm9, %v1787_v18 }
 0x296   : > { %2940 = vrot.lane.b32.xlu0 %v4024_v30, %s5764_s20 }
 0x297   : > { %v1209_v52 = vpop.permute.xlu1 %1208 }
 0x298   : > { %1275 = vst.msk [vmem:[#allocation4 + $0xf0] sm:$0xff] %vm1244_vm6, %v1209_v52  ;;  %v1211_v25 = vpop.permute.xlu0 %1210  ;;  %v5515_v62 = vpop.f32.mrb[12].mxu0 }
 0x299   : > { %3707 = vrot.lane.b32.xlu1 %v7055_v20, %s5770_s26  ;;  %1276 = vst.msk [vmem:[#allocation4 + $0xf8] sm:$0xff] %vm1244_vm6, %v1211_v25  ;;  %v2327_v46 = vadd.f32 %v5515_v62, %v6911_v19  ;;  %v2321_v57 = vpop.f32.mrb[13].mxu0  ;;  %vm2829_vm6 = vcmask 130112  }
 0x29a   : > { %3709 = vrot.lane.b32.xlu0 %v7057_v42, %s5770_s26  ;;  %v2322_v38 = vadd.f32 %v6911_v19, %v2321_v57  ;;  %v3834_v57 = vld [vmem:[#allocation3 + $0x79] sm:$0xff] }
 0x29b   : > { %v1978_v58 = vpop.permute.xlu1 %1977  ;;  %vm2433_vm4 = vcmp.ge.f32.partialorder %v2327_v46, 0.0  ;;  %v2465_v54 = vmul.f32 0.01, %v2327_v46 }
 0x29c   : > { %2046 = vst.msk [vmem:[#allocation4 + $0xe0] sm:$0xff] %vm2017_vm10, %v1978_v58  ;;  %vm2432_vm5 = vcmp.ge.f32.partialorder %v2322_v38, 0.0  ;;  %v2464_v39 = vmul.f32 0.01, %v2322_v38  ;;  %v1980_v40 = vpop.permute.xlu0 %1979 }
 0x29d   : > { %3131 = vrot.lane.b32.xlu1 %v7055_v20, %s5766_s22  ;;  %v2497_v53 = vsel %vm2433_vm4, %v2327_v46, %v2465_v54  ;;  %2047 = vst.msk [vmem:[#allocation4 + $0xe8] sm:$0xff] %vm2017_vm10, %v1980_v40  ;;  %v3833_v20 = vld [vmem:[#allocation3 + $0x69] sm:$0xff]  ;;  %vm4181_vm4 = vcmask 589312  }
 0x29e   : > { %2586 = vst.msk [vmem:[#allocation3 + $0xb1] sm:$0xff] %vm2516_vm12, %v2497_v53  ;;  %v2496_v43 = vsel %vm2432_vm5, %v2322_v38, %v2464_v39  ;;  %3133 = vrot.lane.b32.xlu0 %v7057_v42, %s5766_s22  ;;  %v3835_v38 = vld [vmem:[#allocation3 + $0x81] sm:$0xff]  ;;  %vm4262_vm5 = vcmask 588800  }
 0x29f   : > { %v1402_v44 = vpop.permute.xlu1 %1401  ;;  %2585 = vst.msk [vmem:[#allocation3 + $0xa9] sm:$0xff] %vm2516_vm12, %v2496_v43  ;;  %v4027_v53 = vld [vmem:[#allocation3 + $0x7a] sm:$0xff] }
 0x2a0   : > { %1468 = vst.msk [vmem:[#allocation4 + $0xf0] sm:$0xff] %vm1437_vm7, %v1402_v44  ;;  %v1596_v26 = vpop.permute.xlu0 %1595 }
 0x2a1   : > { %3900 = vrot.lane.b32.xlu1 %v3832_v22, %s5771_s17  ;;  %1662 = vst.msk [vmem:[#allocation4 + $0xf0] sm:$0xff] %vm1631_vm8, %v1596_v26 }
 0x2a2   : > { %3902 = vrot.lane.b32.xlu0 %v3833_v20, %s5771_s17 }
 0x2a3   : > { %v1404_v50 = vpop.permute.xlu1 %1403  ;;  %v2078_v55 = vld [vmem:[#allocation4 + $0xe0] sm:$0xff] }
 0x2a4   : > { %1469 = vst.msk [vmem:[#allocation4 + $0xf8] sm:$0xff] %vm1437_vm7, %v1404_v50  ;;  %5537 = vmatprep.mubr.msk.f32.mxu1 %vm2094_vm11, %v2078_v55  ;;  %v1789_v42 = vpop.permute.xlu0 %1788  ;;  %v2079_v7 = vld [vmem:[#allocation4 + $0xe8] sm:$0xff]  ;;  %vm3022_vm7 = vcmask 195712  }
 0x2a5   : > { %3324 = vrot.lane.b32.xlu1 %v3832_v22, %s5768_s12  ;;  %1855 = vst.msk [vmem:[#allocation4 + $0xf0] sm:$0xff] %vm1824_vm9, %v1789_v42  ;;  %5538 = vmatmul.mubr.msk.f32.gmra.mrb[12].mxu1 %vm2094_vm11, %v2079_v7  ;;  %v7292_v42 = vld [vmem:[%s8371_s2] ss:$0 sm:$0xff] }
 0x2a6   : > { %2749 = vrot.lane.b32.xlu0 %v3832_v22, %s5762_s18  ;;  %v7220_v33 = vld [vmem:[#allocation3 + $0xa8] sm:$0xff]  ;;  %v7222_v59 = vld [vmem:[#allocation3 + $0xb0] sm:$0xff] }
 0x2a7   : > { %v1598_v36 = vpop.permute.xlu1 %1597  ;;  %2651 = vst.msk [vmem:[#allocation4 + $0x70] sm:$0xff] %vm2516_vm12, %v7220_v33  ;;  %2652 = vst.msk [vmem:[#allocation4 + $0x78] sm:$0xff] %vm2516_vm12, %v7222_v59 }
 0x2a8   : > { %1663 = vst.msk [vmem:[#allocation4 + $0xf8] sm:$0xff] %vm1631_vm8, %v1598_v36  ;;  %v1982_v24 = vpop.permute.xlu0 %1981  ;;  %vm3215_vm8 = vcmask 261312  }
 0x2a9   : > { %4093 = vrot.lane.b32.xlu1 %v4025_v60, %s5772_s29  ;;  %2048 = vst.msk [vmem:[#allocation4 + $0xf0] sm:$0xff] %vm2017_vm10, %v1982_v24 }
 0x2aa   : > { %3517 = vrot.lane.b32.xlu0 %v4025_v60, %s5769_s19 }
 0x2ab   : > { %v1791_v63 = vpop.permute.xlu1 %1790 }
 0x2ac   : > { %1856 = vst.msk [vmem:[#allocation4 + $0xf8] sm:$0xff] %vm1824_vm9, %v1791_v63  ;;  %v2734_v56 = vpop.permute.xlu0 %2733  ;;  %vm3408_vm9 = vcmask 326912  }
 0x2ad   : > { %3326 = vrot.lane.b32.xlu1 %v3833_v20, %s5768_s12  ;;  %2830 = vst.msk [vmem:[#allocation4] sm:$0xff] %vm2829_vm6, %v2734_v56 }
 0x2ae   : > { %2751 = vrot.lane.b32.xlu0 %v3833_v20, %s5762_s18  ;;  %v4028_v20 = vld [vmem:[#allocation3 + $0x82] sm:$0xff] }
 0x2af   : > { %v1984_v48 = vpop.permute.xlu1 %1983 }
 0x2b0   : > { %2049 = vst.msk [vmem:[#allocation4 + $0xf8] sm:$0xff] %vm2017_vm10, %v1984_v48  ;;  %v2927_v31 = vpop.permute.xlu0 %2926  ;;  %v2080_v28 = vld [vmem:[#allocation4 + $0xf0] sm:$0xff] }
 0x2b1   : > { %4095 = vrot.lane.b32.xlu1 %v4026_v34, %s5772_s29  ;;  %3023 = vst.msk [vmem:[#allocation4] sm:$0xff] %vm3022_vm7, %v2927_v31  ;;  %5540 = vmatprep.mubr.msk.f32.mxu1 %vm2094_vm11, %v2080_v28 }
 0x2b2   : > { %3519 = vrot.lane.b32.xlu0 %v4026_v34, %s5769_s19 }
 0x2b3   : > { %v2736_v32 = vpop.permute.xlu1 %2735 }
 0x2b4   : > { %2831 = vst.msk [vmem:[#allocation4 + $0x8] sm:$0xff] %vm2829_vm6, %v2736_v32  ;;  %v3120_v35 = vpop.permute.xlu0 %3119  ;;  %v5518_v41 = vpop.f32.mrb[14].mxu0 }
 0x2b5   : > { %2942 = vrot.lane.b32.xlu1 %v4025_v60, %s5764_s20  ;;  %3216 = vst.msk [vmem:[#allocation4] sm:$0xff] %vm3215_vm8, %v3120_v35  ;;  %v2337_v51 = vadd.f32 %v5518_v41, %v6911_v19  ;;  %v2331_v37 = vpop.f32.mrb[15].mxu0 }
 0x2b6   : > { %2944 = vrot.lane.b32.xlu0 %v4026_v34, %s5764_s20  ;;  %v2332_v23 = vadd.f32 %v6911_v19, %v2331_v37 }
 0x2b7   : > { %v2929_v21 = vpop.permute.xlu1 %2928  ;;  %v2081_v30 = vld [vmem:[#allocation4 + $0xf8] sm:$0xff]  ;;  %vm2435_vm10 = vcmp.ge.f32.partialorder %v2337_v51, 0.0  ;;  %v2467_v49 = vmul.f32 0.01, %v2337_v51 }
 0x2b8   : > { %3024 = vst.msk [vmem:[#allocation4 + $0x8] sm:$0xff] %vm3022_vm7, %v2929_v21  ;;  %5541 = vmatmul.mubr.msk.f32.gmra.mrb[14].mxu1 %vm2094_vm11, %v2081_v30  ;;  %vm2434_vm1 = vcmp.ge.f32.partialorder %v2332_v23, 0.0  ;;  %v2466_v0 = vmul.f32 0.01, %v2332_v23  ;;  %v3313_v18 = vpop.permute.xlu0 %3312  ;;  %vm3601_vm11 = vcmask 392512  }
 0x2b9   : > { %3711 = vrot.lane.b32.xlu1 %v7128_v61, %s5770_s26  ;;  %v2499_v52 = vsel %vm2435_vm10, %v2337_v51, %v2467_v49  ;;  %3409 = vst.msk [vmem:[#allocation4] sm:$0xff] %vm3408_vm9, %v3313_v18 }
 0x2ba   : > { %2588 = vst.msk [vmem:[#allocation3 + $0xc9] sm:$0xff] %vm2516_vm12, %v2499_v52  ;;  %v2498_v19 = vsel %vm2434_vm1, %v2332_v23, %v2466_v0  ;;  %3713 = vrot.lane.b32.xlu0 %v7130_v27, %s5770_s26  ;;  %v3836_v23 = vld [vmem:[#allocation3 + $0x91] sm:$0xff] }
 0x2bb   : > { %v3122_v25 = vpop.permute.xlu1 %3121  ;;  %2587 = vst.msk [vmem:[#allocation3 + $0xc1] sm:$0xff] %vm2516_vm12, %v2498_v19  ;;  %v4029_v52 = vld [vmem:[#allocation3 + $0x92] sm:$0xff] }
 0x2bc   : > { %3217 = vst.msk [vmem:[#allocation4 + $0x8] sm:$0xff] %vm3215_vm8, %v3122_v25  ;;  %v3315_v62 = vpop.permute.xlu0 %3314 }
 0x2bd   : > { %3135 = vrot.lane.b32.xlu1 %v7128_v61, %s5766_s22  ;;  %3410 = vst.msk [vmem:[#allocation4 + $0x8] sm:$0xff] %vm3408_vm9, %v3315_v62 }
 0x2be   : > { %3137 = vrot.lane.b32.xlu0 %v7130_v27, %s5766_s22 }
 0x2bf   : > { %v2738_v46 = vpop.permute.xlu1 %2737 }
 0x2c0   : > { %2832 = vst.msk [vmem:[#allocation4 + $0x10] sm:$0xff] %vm2829_vm6, %v2738_v46  ;;  %v2740_v58 = vpop.permute.xlu0 %2739 }
 0x2c1   : > { %3904 = vrot.lane.b32.xlu1 %v3834_v57, %s5771_s17  ;;  %2833 = vst.msk [vmem:[#allocation4 + $0x18] sm:$0xff] %vm2829_vm6, %v2740_v58 }
 0x2c2   : > { %3906 = vrot.lane.b32.xlu0 %v3835_v38, %s5771_s17  ;;  %v7266_v61 = vld [vmem:[#allocation3 + $0xc0] sm:$0xff]  ;;  %v7268_v39 = vld [vmem:[#allocation3 + $0xc8] sm:$0xff] }
 0x2c3   : > { %v3506_v54 = vpop.permute.xlu1 %3505  ;;  %2653 = vst.msk [vmem:[#allocation4 + $0x80] sm:$0xff] %vm2516_vm12, %v7266_v61  ;;  %2654 = vst.msk [vmem:[#allocation4 + $0x88] sm:$0xff] %vm2516_vm12, %v7268_v39 }
 0x2c4   : > { %3602 = vst.msk [vmem:[#allocation4] sm:$0xff] %vm3601_vm11, %v3506_v54  ;;  %v3508_v27 = vpop.permute.xlu0 %3507 }
 0x2c5   : > { %3328 = vrot.lane.b32.xlu1 %v3834_v57, %s5768_s12  ;;  %3603 = vst.msk [vmem:[#allocation4 + $0x8] sm:$0xff] %vm3601_vm11, %v3508_v27 }
 0x2c6   : > { %2753 = vrot.lane.b32.xlu0 %v3834_v57, %s5762_s18 }
 0x2c7   : > { %v2931_v40 = vpop.permute.xlu1 %2930 }
 0x2c8   : > { %3025 = vst.msk [vmem:[#allocation4 + $0x10] sm:$0xff] %vm3022_vm7, %v2931_v40  ;;  %v2933_v43 = vpop.permute.xlu0 %2932 }
 0x2c9   : > { %4097 = vrot.lane.b32.xlu1 %v4027_v53, %s5772_s29  ;;  %3026 = vst.msk [vmem:[#allocation4 + $0x18] sm:$0xff] %vm3022_vm7, %v2933_v43 }
 0x2ca   : > { %3521 = vrot.lane.b32.xlu0 %v4027_v53, %s5769_s19 }
 0x2cb   : > { %v3700_v44 = vpop.permute.xlu1 %3699 }
 0x2cc   : > { %3796 = vst.msk [vmem:[#allocation4] sm:$0xff] %vm3795_vm3, %v3700_v44  ;;  %v3702_v22 = vpop.permute.xlu0 %3701 }
 0x2cd   : > { %3330 = vrot.lane.b32.xlu1 %v3835_v38, %s5768_s12  ;;  %3797 = vst.msk [vmem:[#allocation4 + $0x8] sm:$0xff] %vm3795_vm3, %v3702_v22 }
 0x2ce   : > { %2755 = vrot.lane.b32.xlu0 %v3835_v38, %s5762_s18 }
 0x2cf   : > { %v3124_v26 = vpop.permute.xlu1 %3123 }
 0x2d0   : > { %3218 = vst.msk [vmem:[#allocation4 + $0x10] sm:$0xff] %vm3215_vm8, %v3124_v26  ;;  %v3126_v50 = vpop.permute.xlu0 %3125  ;;  %v5521_v55 = vpop.f32.mrb[0].mxu1 }
 0x2d1   : > { %4099 = vrot.lane.b32.xlu1 %v4028_v20, %s5772_s29  ;;  %3219 = vst.msk [vmem:[#allocation4 + $0x18] sm:$0xff] %vm3215_vm8, %v3126_v50  ;;  %v2347_v7 = vadd.f32 %v7292_v42, %v5521_v55  ;;  %v2341_v36 = vpop.f32.mrb[1].mxu1 }
 0x2d2   : > { %3523 = vrot.lane.b32.xlu0 %v4028_v20, %s5769_s19  ;;  %v2342_v24 = vadd.f32 %v7292_v42, %v2341_v36 }
 0x2d3   : > { %v3893_v60 = vpop.permute.xlu1 %3892  ;;  %vm2437_vm14 = vcmp.ge.f32.partialorder %v2347_v7, 0.0  ;;  %v2469_v63 = vmul.f32 0.01, %v2347_v7 }
 0x2d4   : > { %3989 = vst.msk [vmem:[#allocation4] sm:$0xff] %vm3988_vm13, %v3893_v60  ;;  %vm2436_vm15 = vcmp.ge.f32.partialorder %v2342_v24, 0.0  ;;  %v2468_v56 = vmul.f32 0.01, %v2342_v24  ;;  %v3895_v48 = vpop.permute.xlu0 %3894 }
 0x2d5   : > { %2946 = vrot.lane.b32.xlu1 %v4027_v53, %s5764_s20  ;;  %v2501_v34 = vsel %vm2437_vm14, %v2347_v7, %v2469_v63  ;;  %3990 = vst.msk [vmem:[#allocation4 + $0x8] sm:$0xff] %vm3988_vm13, %v3895_v48  ;;  %v4030_v53 = vld [vmem:[#allocation3 + $0x9a] sm:$0xff]  ;;  %v3838_v48 = vld [vmem:[#allocation3 + $0xa9] sm:$0xff] }
 0x2d6   : > { %2590 = vst.msk [vmem:[#allocation3 + $0xe1] sm:$0xff] %vm2516_vm12, %v2501_v34  ;;  %v2500_v31 = vsel %vm2436_vm15, %v2342_v24, %v2468_v56  ;;  %2948 = vrot.lane.b32.xlu0 %v4028_v20, %s5764_s20 }
 0x2d7   : > { %v3317_v28 = vpop.permute.xlu1 %3316  ;;  %2589 = vst.msk [vmem:[#allocation3 + $0xd9] sm:$0xff] %vm2516_vm12, %v2500_v31  ;;  %v3839_v31 = vld [vmem:[#allocation3 + $0xb1] sm:$0xff] }
 0x2d8   : > { %3411 = vst.msk [vmem:[#allocation4 + $0x10] sm:$0xff] %vm3408_vm9, %v3317_v28  ;;  %v2742_v32 = vpop.permute.xlu0 %2741 }
 0x2d9   : > { %3715 = vrot.lane.b32.xlu1 %v7174_v47, %s5770_s26  ;;  %2834 = vst.msk [vmem:[#allocation4 + $0x20] sm:$0xff] %vm2829_vm6, %v2742_v32 }
 0x2da   : > { %3717 = vrot.lane.b32.xlu0 %v7176_v29, %s5770_s26 }
 0x2db   : > { %v4086_v35 = vpop.permute.xlu1 %4085 }
 0x2dc   : > { %4182 = vst.msk [vmem:[#allocation4] sm:$0xff] %vm4181_vm4, %v4086_v35  ;;  %v3510_v41 = vpop.permute.xlu0 %3509  ;;  %v4031_v35 = vld [vmem:[#allocation3 + $0xaa] sm:$0xff] }
 0x2dd   : > { %3139 = vrot.lane.b32.xlu1 %v7174_v47, %s5766_s22  ;;  %3604 = vst.msk [vmem:[#allocation4 + $0x10] sm:$0xff] %vm3601_vm11, %v3510_v41 }
 0x2de   : > { %3141 = vrot.lane.b32.xlu0 %v7176_v29, %s5766_s22  ;;  %v7315_v37 = vld [vmem:[#allocation3 + $0xd8] sm:$0xff]  ;;  %v7317_v21 = vld [vmem:[#allocation3 + $0xe0] sm:$0xff] }
 0x2df   : > { %v3319_v51 = vpop.permute.xlu1 %3318  ;;  %2655 = vst.msk [vmem:[#allocation4 + $0x90] sm:$0xff] %vm2516_vm12, %v7315_v37  ;;  %2656 = vst.msk [vmem:[#allocation4 + $0x98] sm:$0xff] %vm2516_vm12, %v7317_v21  ;;  %v3837_v29 = vld [vmem:[#allocation3 + $0x99] sm:$0xff] }
 0x2e0   : > { %3412 = vst.msk [vmem:[#allocation4 + $0x18] sm:$0xff] %vm3408_vm9, %v3319_v51  ;;  %v2744_v47 = vpop.permute.xlu0 %2743 }
 0x2e1   : > { %3908 = vrot.lane.b32.xlu1 %v3836_v23, %s5771_s17  ;;  %2835 = vst.msk [vmem:[#allocation4 + $0x28] sm:$0xff] %vm2829_vm6, %v2744_v47 }
 0x2e2   : > { %3910 = vrot.lane.b32.xlu0 %v3837_v29, %s5771_s17 }
 0x2e3   : > { %v4088_v30 = vpop.permute.xlu1 %4087  ;;  %v4214_v49 = vld [vmem:[#allocation4] sm:$0xff] }
 0x2e4   : > { %4183 = vst.msk [vmem:[#allocation4 + $0x8] sm:$0xff] %vm4181_vm4, %v4088_v30  ;;  %5561 = vmatprep.mubr.msk.f32.mxu1 %vm4262_vm5, %v4214_v49  ;;  %v3512_v0 = vpop.permute.xlu0 %3511 }
 0x2e5   : > { %3332 = vrot.lane.b32.xlu1 %v3836_v23, %s5768_s12  ;;  %3605 = vst.msk [vmem:[#allocation4 + $0x18] sm:$0xff] %vm3601_vm11, %v3512_v0 }
 0x2e6   : > { %2757 = vrot.lane.b32.xlu0 %v3836_v23, %s5762_s18 }
 0x2e7   : > { %v2935_v18 = vpop.permute.xlu1 %2934 }
 0x2e8   : > { %3027 = vst.msk [vmem:[#allocation4 + $0x20] sm:$0xff] %vm3022_vm7, %v2935_v18  ;;  %v2937_v19 = vpop.permute.xlu0 %2936 }
 0x2e9   : > { %4101 = vrot.lane.b32.xlu1 %v4029_v52, %s5772_s29  ;;  %3028 = vst.msk [vmem:[#allocation4 + $0x28] sm:$0xff] %vm3022_vm7, %v2937_v19 }
 0x2ea   : > { %3525 = vrot.lane.b32.xlu0 %v4029_v52, %s5769_s19 }
 0x2eb   : > { %v3704_v25 = vpop.permute.xlu1 %3703  ;;  %v4215_v62 = vld [vmem:[#allocation4 + $0x8] sm:$0xff] }
 0x2ec   : > { %3798 = vst.msk [vmem:[#allocation4 + $0x10] sm:$0xff] %vm3795_vm3, %v3704_v25  ;;  %5562 = vmatmul.mubr.msk.f32.vlgmr.msra.gmra.mrb[16].mxu1 %vm4262_vm5, %v4215_v62  ;;  %v3706_v46 = vpop.permute.xlu0 %3705  ;;  %v5524_v57 = vpop.f32.mrb[2].mxu1 }
 0x2ed   : > { %3334 = vrot.lane.b32.xlu1 %v3837_v29, %s5768_s12  ;;  %3799 = vst.msk [vmem:[#allocation4 + $0x18] sm:$0xff] %vm3795_vm3, %v3706_v46  ;;  %v2357_v58 = vadd.f32 %v7292_v42, %v5524_v57  ;;  %v2351_v38 = vpop.f32.mrb[3].mxu1  ;;  %v4032_v46 = vld [vmem:[#allocation3 + $0xb2] sm:$0xff] }
 0x2ee   : > { %2759 = vrot.lane.b32.xlu0 %v3837_v29, %s5762_s18  ;;  %v2352_v27 = vadd.f32 %v7292_v42, %v2351_v38 }
 0x2ef   : > { %v3128_v54 = vpop.permute.xlu1 %3127  ;;  %vm2439_vm10 = vcmp.ge.f32.partialorder %v2357_v58, 0.0  ;;  %v2471_v40 = vmul.f32 0.01, %v2357_v58 }
 0x2f0   : > { %3220 = vst.msk [vmem:[#allocation4 + $0x20] sm:$0xff] %vm3215_vm8, %v3128_v54  ;;  %vm2438_vm1 = vcmp.ge.f32.partialorder %v2352_v27, 0.0  ;;  %v2470_v43 = vmul.f32 0.01, %v2352_v27  ;;  %v3130_v44 = vpop.permute.xlu0 %3129 }
 0x2f1   : > { %4103 = vrot.lane.b32.xlu1 %v4030_v53, %s5772_s29  ;;  %v2503_v22 = vsel %vm2439_vm10, %v2357_v58, %v2471_v40  ;;  %3221 = vst.msk [vmem:[#allocation4 + $0x28] sm:$0xff] %vm3215_vm8, %v3130_v44 }
 0x2f2   : > { %2592 = vst.msk [vmem:[#allocation3 + $0xf9] sm:$0xff] %vm2516_vm12, %v2503_v22  ;;  %v2502_v26 = vsel %vm2438_vm1, %v2352_v27, %v2470_v43  ;;  %3527 = vrot.lane.b32.xlu0 %v4030_v53, %s5769_s19 }
 0x2f3   : > { %v3897_v20 = vpop.permute.xlu1 %3896  ;;  %2591 = vst.msk [vmem:[#allocation3 + $0xf1] sm:$0xff] %vm2516_vm12, %v2502_v26  ;;  %v3840_v26 = vld [vmem:[#allocation3 + $0xc1] sm:$0xff] }
 0x2f4   : > { %3991 = vst.msk [vmem:[#allocation4 + $0x10] sm:$0xff] %vm3988_vm13, %v3897_v20  ;;  %v3899_v50 = vpop.permute.xlu0 %3898 }
 0x2f5   : > { %2950 = vrot.lane.b32.xlu1 %v4029_v52, %s5764_s20  ;;  %3992 = vst.msk [vmem:[#allocation4 + $0x18] sm:$0xff] %vm3988_vm13, %v3899_v50  ;;  %v3841_v50 = vld [vmem:[#allocation3 + $0xc9] sm:$0xff] }
 0x2f6   : > { %2952 = vrot.lane.b32.xlu0 %v4030_v53, %s5764_s20 }
 0x2f7   : > { %v3321_v55 = vpop.permute.xlu1 %3320 }
 0x2f8   : > { %3413 = vst.msk [vmem:[#allocation4 + $0x20] sm:$0xff] %vm3408_vm9, %v3321_v55  ;;  %v2746_v7 = vpop.permute.xlu0 %2745 }
 0x2f9   : > { %3719 = vrot.lane.b32.xlu1 %v7220_v33, %s5770_s26  ;;  %2836 = vst.msk [vmem:[#allocation4 + $0x30] sm:$0xff] %vm2829_vm6, %v2746_v7 }
 0x2fa   : > { %3721 = vrot.lane.b32.xlu0 %v7222_v59, %s5770_s26  ;;  %v7359_v60 = vld [vmem:[#allocation3 + $0xf0] sm:$0xff]  ;;  %v7361_v24 = vld [vmem:[#allocation3 + $0xf8] sm:$0xff] }
 0x2fb   : > { %v4090_v36 = vpop.permute.xlu1 %4089  ;;  %2657 = vst.msk [vmem:[#allocation4 + $0xa0] sm:$0xff] %vm2516_vm12, %v7359_v60  ;;  %2658 = vst.msk [vmem:[#allocation4 + $0xa8] sm:$0xff] %vm2516_vm12, %v7361_v24 }
 0x2fc   : > { %4184 = vst.msk [vmem:[#allocation4 + $0x10] sm:$0xff] %vm4181_vm4, %v4090_v36  ;;  %v3514_v63 = vpop.permute.xlu0 %3513 }
 0x2fd   : > { %3143 = vrot.lane.b32.xlu1 %v7220_v33, %s5766_s22  ;;  %3606 = vst.msk [vmem:[#allocation4 + $0x20] sm:$0xff] %vm3601_vm11, %v3514_v63 }
 0x2fe   : > { %3145 = vrot.lane.b32.xlu0 %v7222_v59, %s5766_s22 }
 0x2ff   : > { %v3323_v56 = vpop.permute.xlu1 %3322 }
 0x300   : > { %3414 = vst.msk [vmem:[#allocation4 + $0x28] sm:$0xff] %vm3408_vm9, %v3323_v56  ;;  %v2748_v34 = vpop.permute.xlu0 %2747 }
 0x301   : > { %3912 = vrot.lane.b32.xlu1 %v3838_v48, %s5771_s17  ;;  %2837 = vst.msk [vmem:[#allocation4 + $0x38] sm:$0xff] %vm2829_vm6, %v2748_v34 }
 0x302   : > { %3914 = vrot.lane.b32.xlu0 %v3839_v31, %s5771_s17 }
 0x303   : > { %v4092_v28 = vpop.permute.xlu1 %4091  ;;  %v4216_v33 = vld [vmem:[#allocation4 + $0x10] sm:$0xff] }
 0x304   : > { %4185 = vst.msk [vmem:[#allocation4 + $0x18] sm:$0xff] %vm4181_vm4, %v4092_v28  ;;  %5564 = vmatprep.mubr.msk.f32.mxu1 %vm4262_vm5, %v4216_v33  ;;  %v3516_v59 = vpop.permute.xlu0 %3515 }
 0x305   : > { %3336 = vrot.lane.b32.xlu1 %v3838_v48, %s5768_s12  ;;  %3607 = vst.msk [vmem:[#allocation4 + $0x28] sm:$0xff] %vm3601_vm11, %v3516_v59 }
 0x306   : > { %2761 = vrot.lane.b32.xlu0 %v3838_v48, %s5762_s18 }
 0x307   : > { %v2939_v32 = vpop.permute.xlu1 %2938 }
 0x308   : > { %3029 = vst.msk [vmem:[#allocation4 + $0x30] sm:$0xff] %vm3022_vm7, %v2939_v32  ;;  %v2941_v41 = vpop.permute.xlu0 %2940  ;;  %v5527_v51 = vpop.f32.mrb[4].mxu1 }
 0x309   : > { %4105 = vrot.lane.b32.xlu1 %v4031_v35, %s5772_s29  ;;  %3030 = vst.msk [vmem:[#allocation4 + $0x38] sm:$0xff] %vm3022_vm7, %v2941_v41  ;;  %v2367_v23 = vadd.f32 %v7292_v42, %v5527_v51  ;;  %v2361_v47 = vpop.f32.mrb[5].mxu1 }
 0x30a   : > { %3529 = vrot.lane.b32.xlu0 %v4031_v35, %s5769_s19  ;;  %v2362_v30 = vadd.f32 %v7292_v42, %v2361_v47  ;;  %v4034_v47 = vld [vmem:[#allocation3 + $0xca] sm:$0xff] }
 0x30b   : > { %v3708_v29 = vpop.permute.xlu1 %3707  ;;  %v4217_v49 = vld [vmem:[#allocation4 + $0x18] sm:$0xff]  ;;  %vm2441_vm14 = vcmp.ge.f32.partialorder %v2367_v23, 0.0  ;;  %v2473_v0 = vmul.f32 0.01, %v2367_v23 }
 0x30c   : > { %3800 = vst.msk [vmem:[#allocation4 + $0x20] sm:$0xff] %vm3795_vm3, %v3708_v29  ;;  %5565 = vmatmul.mubr.msk.f32.gmra.mrb[18].mxu1 %vm4262_vm5, %v4217_v49  ;;  %vm2440_vm15 = vcmp.ge.f32.partialorder %v2362_v30, 0.0  ;;  %v2472_v18 = vmul.f32 0.01, %v2362_v30  ;;  %v3710_v52 = vpop.permute.xlu0 %3709 }
 0x30d   : > { %3338 = vrot.lane.b32.xlu1 %v3839_v31, %s5768_s12  ;;  %v2505_v19 = vsel %vm2441_vm14, %v2367_v23, %v2473_v0  ;;  %3801 = vst.msk [vmem:[#allocation4 + $0x28] sm:$0xff] %vm3795_vm3, %v3710_v52 }
 0x30e   : > { %2594 = vst.msk [vmem:[#allocation3 + $0x111] sm:$0xff] %vm2516_vm12, %v2505_v19  ;;  %v2504_v25 = vsel %vm2440_vm15, %v2362_v30, %v2472_v18  ;;  %2763 = vrot.lane.b32.xlu0 %v3839_v31, %s5762_s18  ;;  %v4033_v31 = vld [vmem:[#allocation3 + $0xc2] sm:$0xff] }
 0x30f   : > { %v3132_v62 = vpop.permute.xlu1 %3131  ;;  %2593 = vst.msk [vmem:[#allocation3 + $0x109] sm:$0xff] %vm2516_vm12, %v2504_v25 }
 0x310   : > { %3222 = vst.msk [vmem:[#allocation4 + $0x30] sm:$0xff] %vm3215_vm8, %v3132_v62  ;;  %v3134_v57 = vpop.permute.xlu0 %3133 }
 0x311   : > { %4107 = vrot.lane.b32.xlu1 %v4032_v46, %s5772_s29  ;;  %3223 = vst.msk [vmem:[#allocation4 + $0x38] sm:$0xff] %vm3215_vm8, %v3134_v57  ;;  %v3842_v57 = vld [vmem:[#allocation3 + $0xd9] sm:$0xff] }
 0x312   : > { %3531 = vrot.lane.b32.xlu0 %v4032_v46, %s5769_s19 }
 0x313   : > { %v3901_v58 = vpop.permute.xlu1 %3900 }
 0x314   : > { %3993 = vst.msk [vmem:[#allocation4 + $0x20] sm:$0xff] %vm3988_vm13, %v3901_v58  ;;  %v3903_v38 = vpop.permute.xlu0 %3902 }
 0x315   : > { %2954 = vrot.lane.b32.xlu1 %v4031_v35, %s5764_s20  ;;  %3994 = vst.msk [vmem:[#allocation4 + $0x28] sm:$0xff] %vm3988_vm13, %v3903_v38 }
 0x316   : > { %2956 = vrot.lane.b32.xlu0 %v4032_v46, %s5764_s20  ;;  %v7403_v27 = vld [vmem:[#allocation3 + $0x108] sm:$0xff]  ;;  %v7405_v40 = vld [vmem:[#allocation3 + $0x110] sm:$0xff] }
 0x317   : > { %v3325_v54 = vpop.permute.xlu1 %3324  ;;  %2659 = vst.msk [vmem:[#allocation4 + $0xb0] sm:$0xff] %vm2516_vm12, %v7403_v27  ;;  %2660 = vst.msk [vmem:[#allocation4 + $0xb8] sm:$0xff] %vm2516_vm12, %v7405_v40 }
 0x318   : > { %3415 = vst.msk [vmem:[#allocation4 + $0x30] sm:$0xff] %vm3408_vm9, %v3325_v54  ;;  %v2750_v53 = vpop.permute.xlu0 %2749 }
 0x319   : > { %3723 = vrot.lane.b32.xlu1 %v7266_v61, %s5770_s26  ;;  %2838 = vst.msk [vmem:[#allocation4 + $0x40] sm:$0xff] %vm2829_vm6, %v2750_v53  ;;  %v3843_v53 = vld [vmem:[#allocation3 + $0xe1] sm:$0xff] }
 0x31a   : > { %3725 = vrot.lane.b32.xlu0 %v7268_v39, %s5770_s26 }
 0x31b   : > { %v4094_v43 = vpop.permute.xlu1 %4093 }
 0x31c   : > { %4186 = vst.msk [vmem:[#allocation4 + $0x20] sm:$0xff] %vm4181_vm4, %v4094_v43  ;;  %v3518_v44 = vpop.permute.xlu0 %3517 }
 0x31d   : > { %3147 = vrot.lane.b32.xlu1 %v7266_v61, %s5766_s22  ;;  %3608 = vst.msk [vmem:[#allocation4 + $0x30] sm:$0xff] %vm3601_vm11, %v3518_v44 }
 0x31e   : > { %3149 = vrot.lane.b32.xlu0 %v7268_v39, %s5766_s22 }
 0x31f   : > { %v3327_v22 = vpop.permute.xlu1 %3326 }
 0x320   : > { %3416 = vst.msk [vmem:[#allocation4 + $0x38] sm:$0xff] %vm3408_vm9, %v3327_v22  ;;  %v2752_v20 = vpop.permute.xlu0 %2751 }
 0x321   : > { %3916 = vrot.lane.b32.xlu1 %v3840_v26, %s5771_s17  ;;  %2839 = vst.msk [vmem:[#allocation4 + $0x48] sm:$0xff] %vm2829_vm6, %v2752_v20 }
 0x322   : > { %3918 = vrot.lane.b32.xlu0 %v3841_v50, %s5771_s17 }
 0x323   : > { %v4096_v55 = vpop.permute.xlu1 %4095  ;;  %v4218_v61 = vld [vmem:[#allocation4 + $0x20] sm:$0xff] }
 0x324   : > { %4187 = vst.msk [vmem:[#allocation4 + $0x28] sm:$0xff] %vm4181_vm4, %v4096_v55  ;;  %5567 = vmatprep.mubr.msk.f32.mxu1 %vm4262_vm5, %v4218_v61  ;;  %v3520_v39 = vpop.permute.xlu0 %3519  ;;  %v5530_v7 = vpop.f32.mrb[6].mxu1 }
 0x325   : > { %3340 = vrot.lane.b32.xlu1 %v3840_v26, %s5768_s12  ;;  %3609 = vst.msk [vmem:[#allocation4 + $0x38] sm:$0xff] %vm3601_vm11, %v3520_v39  ;;  %v2377_v36 = vadd.f32 %v7292_v42, %v5530_v7  ;;  %v2371_v63 = vpop.f32.mrb[7].mxu1  ;;  %v4035_v39 = vld [vmem:[#allocation3 + $0xda] sm:$0xff] }
 0x326   : > { %2765 = vrot.lane.b32.xlu0 %v3840_v26, %s5762_s18  ;;  %v2372_v48 = vadd.f32 %v7292_v42, %v2371_v63 }
 0x327   : > { %v2943_v56 = vpop.permute.xlu1 %2942  ;;  %vm2443_vm10 = vcmp.ge.f32.partialorder %v2377_v36, 0.0  ;;  %v2475_v34 = vmul.f32 0.01, %v2377_v36 }
 0x328   : > { %3031 = vst.msk [vmem:[#allocation4 + $0x40] sm:$0xff] %vm3022_vm7, %v2943_v56  ;;  %vm2442_vm1 = vcmp.ge.f32.partialorder %v2372_v48, 0.0  ;;  %v2474_v28 = vmul.f32 0.01, %v2372_v48  ;;  %v2945_v33 = vpop.permute.xlu0 %2944 }
 0x329   : > { %4109 = vrot.lane.b32.xlu1 %v4033_v31, %s5772_s29  ;;  %v2507_v59 = vsel %vm2443_vm10, %v2377_v36, %v2475_v34  ;;  %3032 = vst.msk [vmem:[#allocation4 + $0x48] sm:$0xff] %vm3022_vm7, %v2945_v33 }
 0x32a   : > { %2596 = vst.msk [vmem:[#allocation3 + $0x129] sm:$0xff] %vm2516_vm12, %v2507_v59  ;;  %v2506_v32 = vsel %vm2442_vm1, %v2372_v48, %v2474_v28  ;;  %3533 = vrot.lane.b32.xlu0 %v4033_v31, %s5769_s19  ;;  %v4036_v28 = vld [vmem:[#allocation3 + $0xe2] sm:$0xff] }
 0x32b   : > { %v3712_v35 = vpop.permute.xlu1 %3711  ;;  %v4219_v41 = vld [vmem:[#allocation4 + $0x28] sm:$0xff]  ;;  %2595 = vst.msk [vmem:[#allocation3 + $0x121] sm:$0xff] %vm2516_vm12, %v2506_v32 }
 0x32c   : > { %3802 = vst.msk [vmem:[#allocation4 + $0x30] sm:$0xff] %vm3795_vm3, %v3712_v35  ;;  %5568 = vmatmul.mubr.msk.f32.gmra.mrb[20].mxu1 %vm4262_vm5, %v4219_v41  ;;  %v3714_v51 = vpop.permute.xlu0 %3713 }
 0x32d   : > { %3342 = vrot.lane.b32.xlu1 %v3841_v50, %s5768_s12  ;;  %3803 = vst.msk [vmem:[#allocation4 + $0x38] sm:$0xff] %vm3795_vm3, %v3714_v51 }
 0x32e   : > { %2767 = vrot.lane.b32.xlu0 %v3841_v50, %s5762_s18 }
 0x32f   : > { %v3136_v23 = vpop.permute.xlu1 %3135 }
 0x330   : > { %3224 = vst.msk [vmem:[#allocation4 + $0x40] sm:$0xff] %vm3215_vm8, %v3136_v23  ;;  %v3138_v29 = vpop.permute.xlu0 %3137 }
 0x331   : > { %4111 = vrot.lane.b32.xlu1 %v4034_v47, %s5772_s29  ;;  %3225 = vst.msk [vmem:[#allocation4 + $0x48] sm:$0xff] %vm3215_vm8, %v3138_v29 }
 0x332   : > { %3535 = vrot.lane.b32.xlu0 %v4034_v47, %s5769_s19  ;;  %v7449_v49 = vld [vmem:[#allocation3 + $0x120] sm:$0xff]  ;;  %v7451_v0 = vld [vmem:[#allocation3 + $0x128] sm:$0xff] }
 0x333   : > { %v3905_v30 = vpop.permute.xlu1 %3904  ;;  %2661 = vst.msk [vmem:[#allocation4 + $0xc0] sm:$0xff] %vm2516_vm12, %v7449_v49  ;;  %2662 = vst.msk [vmem:[#allocation4 + $0xc8] sm:$0xff] %vm2516_vm12, %v7451_v0 }
 0x334   : > { %3995 = vst.msk [vmem:[#allocation4 + $0x30] sm:$0xff] %vm3988_vm13, %v3905_v30  ;;  %v3907_v18 = vpop.permute.xlu0 %3906 }
 0x335   : > { %2958 = vrot.lane.b32.xlu1 %v4033_v31, %s5764_s20  ;;  %3996 = vst.msk [vmem:[#allocation4 + $0x38] sm:$0xff] %vm3988_vm13, %v3907_v18 }
 0x336   : > { %2960 = vrot.lane.b32.xlu0 %v4034_v47, %s5764_s20 }
 0x337   : > { %v3329_v52 = vpop.permute.xlu1 %3328 }
 0x338   : > { %3417 = vst.msk [vmem:[#allocation4 + $0x40] sm:$0xff] %vm3408_vm9, %v3329_v52  ;;  %v2754_v19 = vpop.permute.xlu0 %2753 }
 0x339   : > { %3727 = vrot.lane.b32.xlu1 %v7315_v37, %s5770_s26  ;;  %2840 = vst.msk [vmem:[#allocation4 + $0x50] sm:$0xff] %vm2829_vm6, %v2754_v19 }
 0x33a   : > { %3729 = vrot.lane.b32.xlu0 %v7317_v21, %s5770_s26 }
 0x33b   : > { %v4098_v25 = vpop.permute.xlu1 %4097 }
 0x33c   : > { %4188 = vst.msk [vmem:[#allocation4 + $0x30] sm:$0xff] %vm4181_vm4, %v4098_v25  ;;  %v3522_v62 = vpop.permute.xlu0 %3521  ;;  %v3844_v25 = vld [vmem:[#allocation3 + $0xf1] sm:$0xff] }
 0x33d   : > { %3151 = vrot.lane.b32.xlu1 %v7315_v37, %s5766_s22  ;;  %3610 = vst.msk [vmem:[#allocation4 + $0x40] sm:$0xff] %vm3601_vm11, %v3522_v62 }
 0x33e   : > { %3153 = vrot.lane.b32.xlu0 %v7317_v21, %s5766_s22 }
 0x33f   : > { %v3331_v46 = vpop.permute.xlu1 %3330 }
 0x340   : > { %3418 = vst.msk [vmem:[#allocation4 + $0x48] sm:$0xff] %vm3408_vm9, %v3331_v46  ;;  %v2756_v58 = vpop.permute.xlu0 %2755  ;;  %v5533_v38 = vpop.f32.mrb[8].mxu1 }
 0x341   : > { %3920 = vrot.lane.b32.xlu1 %v3842_v57, %s5771_s17  ;;  %2841 = vst.msk [vmem:[#allocation4 + $0x58] sm:$0xff] %vm2829_vm6, %v2756_v58  ;;  %v2387_v54 = vadd.f32 %v7292_v42, %v5533_v38  ;;  %v2381_v37 = vpop.f32.mrb[9].mxu1 }
 0x342   : > { %3922 = vrot.lane.b32.xlu0 %v3843_v53, %s5771_s17  ;;  %v2382_v44 = vadd.f32 %v7292_v42, %v2381_v37  ;;  %v4037_v37 = vld [vmem:[#allocation3 + $0xf2] sm:$0xff] }
 0x343   : > { %v4100_v43 = vpop.permute.xlu1 %4099  ;;  %v4220_v22 = vld [vmem:[#allocation4 + $0x30] sm:$0xff]  ;;  %vm2445_vm14 = vcmp.ge.f32.partialorder %v2387_v54, 0.0  ;;  %v2477_v21 = vmul.f32 0.01, %v2387_v54 }
 0x344   : > { %4189 = vst.msk [vmem:[#allocation4 + $0x38] sm:$0xff] %vm4181_vm4, %v4100_v43  ;;  %5570 = vmatprep.mubr.msk.f32.mxu1 %vm4262_vm5, %v4220_v22  ;;  %vm2444_vm15 = vcmp.ge.f32.partialorder %v2382_v44, 0.0  ;;  %v2476_v26 = vmul.f32 0.01, %v2382_v44  ;;  %v3524_v20 = vpop.permute.xlu0 %3523 }
 0x345   : > { %3344 = vrot.lane.b32.xlu1 %v3842_v57, %s5768_s12  ;;  %v2509_v50 = vsel %vm2445_vm14, %v2387_v54, %v2477_v21  ;;  %3611 = vst.msk [vmem:[#allocation4 + $0x48] sm:$0xff] %vm3601_vm11, %v3524_v20 }
 0x346   : > { %2598 = vst.msk [vmem:[#allocation3 + $0x141] sm:$0xff] %vm2516_vm12, %v2509_v50  ;;  %v2508_v55 = vsel %vm2444_vm15, %v2382_v44, %v2476_v26  ;;  %2769 = vrot.lane.b32.xlu0 %v3842_v57, %s5762_s18  ;;  %v3845_v57 = vld [vmem:[#allocation3 + $0xf9] sm:$0xff] }
 0x347   : > { %v2947_v61 = vpop.permute.xlu1 %2946  ;;  %2597 = vst.msk [vmem:[#allocation3 + $0x139] sm:$0xff] %vm2516_vm12, %v2508_v55  ;;  %v4038_v55 = vld [vmem:[#allocation3 + $0xfa] sm:$0xff] }
 0x348   : > { %3033 = vst.msk [vmem:[#allocation4 + $0x50] sm:$0xff] %vm3022_vm7, %v2947_v61  ;;  %v2949_v7 = vpop.permute.xlu0 %2948 }
 0x349   : > { %4113 = vrot.lane.b32.xlu1 %v4035_v39, %s5772_s29  ;;  %3034 = vst.msk [vmem:[#allocation4 + $0x58] sm:$0xff] %vm3022_vm7, %v2949_v7 }
 0x34a   : > { %3537 = vrot.lane.b32.xlu0 %v4035_v39, %s5769_s19 }
 0x34b   : > { %v3716_v36 = vpop.permute.xlu1 %3715  ;;  %v4221_v63 = vld [vmem:[#allocation4 + $0x38] sm:$0xff] }
 0x34c   : > { %3804 = vst.msk [vmem:[#allocation4 + $0x40] sm:$0xff] %vm3795_vm3, %v3716_v36  ;;  %5571 = vmatmul.mubr.msk.f32.gmra.mrb[22].mxu1 %vm4262_vm5, %v4221_v63  ;;  %v3718_v56 = vpop.permute.xlu0 %3717 }
 0x34d   : > { %3346 = vrot.lane.b32.xlu1 %v3843_v53, %s5768_s12  ;;  %3805 = vst.msk [vmem:[#allocation4 + $0x48] sm:$0xff] %vm3795_vm3, %v3718_v56 }
 0x34e   : > { %2771 = vrot.lane.b32.xlu0 %v3843_v53, %s5762_s18  ;;  %v7495_v34 = vld [vmem:[#allocation3 + $0x138] sm:$0xff]  ;;  %v7497_v31 = vld [vmem:[#allocation3 + $0x140] sm:$0xff] }
 0x34f   : > { %v3140_v48 = vpop.permute.xlu1 %3139  ;;  %2663 = vst.msk [vmem:[#allocation4 + $0xd0] sm:$0xff] %vm2516_vm12, %v7495_v34  ;;  %2664 = vst.msk [vmem:[#allocation4 + $0xd8] sm:$0xff] %vm2516_vm12, %v7497_v31 }
 0x350   : > { %3226 = vst.msk [vmem:[#allocation4 + $0x50] sm:$0xff] %vm3215_vm8, %v3140_v48  ;;  %v3142_v33 = vpop.permute.xlu0 %3141 }
 0x351   : > { %4115 = vrot.lane.b32.xlu1 %v4036_v28, %s5772_s29  ;;  %3227 = vst.msk [vmem:[#allocation4 + $0x58] sm:$0xff] %vm3215_vm8, %v3142_v33 }
 0x352   : > { %3539 = vrot.lane.b32.xlu0 %v4036_v28, %s5769_s19 }
 0x353   : > { %v3909_v59 = vpop.permute.xlu1 %3908 }
 0x354   : > { %3997 = vst.msk [vmem:[#allocation4 + $0x40] sm:$0xff] %vm3988_vm13, %v3909_v59  ;;  %v3911_v32 = vpop.permute.xlu0 %3910 }
 0x355   : > { %2962 = vrot.lane.b32.xlu1 %v4035_v39, %s5764_s20  ;;  %3998 = vst.msk [vmem:[#allocation4 + $0x48] sm:$0xff] %vm3988_vm13, %v3911_v32 }
 0x356   : > { %2964 = vrot.lane.b32.xlu0 %v4036_v28, %s5764_s20 }
 0x357   : > { %v3333_v35 = vpop.permute.xlu1 %3332 }
 0x358   : > { %3419 = vst.msk [vmem:[#allocation4 + $0x50] sm:$0xff] %vm3408_vm9, %v3333_v35  ;;  %v2758_v41 = vpop.permute.xlu0 %2757 }
 0x359   : > { %3731 = vrot.lane.b32.xlu1 %v7359_v60, %s5770_s26  ;;  %2842 = vst.msk [vmem:[#allocation4 + $0x60] sm:$0xff] %vm2829_vm6, %v2758_v41 }
 0x35a   : > { %3733 = vrot.lane.b32.xlu0 %v7361_v24, %s5770_s26 }
 0x35b   : > { %v4102_v51 = vpop.permute.xlu1 %4101 }
 0x35c   : > { %4190 = vst.msk [vmem:[#allocation4 + $0x40] sm:$0xff] %vm4181_vm4, %v4102_v51  ;;  %v3526_v23 = vpop.permute.xlu0 %3525  ;;  %v5536_v47 = vpop.f32.mrb[10].mxu1 }
 0x35d   : > { %3155 = vrot.lane.b32.xlu1 %v7359_v60, %s5766_s22  ;;  %3612 = vst.msk [vmem:[#allocation4 + $0x50] sm:$0xff] %vm3601_vm11, %v3526_v23  ;;  %v2397_v29 = vadd.f32 %v7292_v42, %v5536_v47  ;;  %v2391_v30 = vpop.f32.mrb[11].mxu1 }
 0x35e   : > { %3157 = vrot.lane.b32.xlu0 %v7361_v24, %s5766_s22  ;;  %v2392_v52 = vadd.f32 %v7292_v42, %v2391_v30 }
 0x35f   : > { %v3335_v18 = vpop.permute.xlu1 %3334  ;;  %vm2447_vm10 = vcmp.ge.f32.partialorder %v2397_v29, 0.0  ;;  %v2479_v19 = vmul.f32 0.01, %v2397_v29 }
 0x360   : > { %3420 = vst.msk [vmem:[#allocation4 + $0x58] sm:$0xff] %vm3408_vm9, %v3335_v18  ;;  %vm2446_vm1 = vcmp.ge.f32.partialorder %v2392_v52, 0.0  ;;  %v2478_v60 = vmul.f32 0.01, %v2392_v52  ;;  %v2760_v62 = vpop.permute.xlu0 %2759 }
 0x361   : > { %3924 = vrot.lane.b32.xlu1 %v3844_v25, %s5771_s17  ;;  %v2511_v46 = vsel %vm2447_vm10, %v2397_v29, %v2479_v19  ;;  %2843 = vst.msk [vmem:[#allocation4 + $0x68] sm:$0xff] %vm2829_vm6, %v2760_v62  ;;  %v3846_v29 = vld [vmem:[#allocation3 + $0x109] sm:$0xff] }
 0x362   : > { %2600 = vst.msk [vmem:[#allocation3 + $0x159] sm:$0xff] %vm2516_vm12, %v2511_v46  ;;  %v2510_v58 = vsel %vm2446_vm1, %v2392_v52, %v2478_v60  ;;  %3926 = vrot.lane.b32.xlu0 %v3845_v57, %s5771_s17  ;;  %v4039_v62 = vld [vmem:[#allocation3 + $0x10a] sm:$0xff] }
 0x363   : > { %v4104_v24 = vpop.permute.xlu1 %4103  ;;  %v4222_v38 = vld [vmem:[#allocation4 + $0x40] sm:$0xff]  ;;  %2599 = vst.msk [vmem:[#allocation3 + $0x151] sm:$0xff] %vm2516_vm12, %v2510_v58 }
 0x364   : > { %4191 = vst.msk [vmem:[#allocation4 + $0x48] sm:$0xff] %vm4181_vm4, %v4104_v24  ;;  %5573 = vmatprep.mubr.msk.f32.mxu1 %vm4262_vm5, %v4222_v38  ;;  %v3528_v54 = vpop.permute.xlu0 %3527 }
 0x365   : > { %3348 = vrot.lane.b32.xlu1 %v3844_v25, %s5768_s12  ;;  %3613 = vst.msk [vmem:[#allocation4 + $0x58] sm:$0xff] %vm3601_vm11, %v3528_v54 }
 0x366   : > { %2773 = vrot.lane.b32.xlu0 %v3844_v25, %s5762_s18 }
 0x367   : > { %v2951_v53 = vpop.permute.xlu1 %2950 }
 0x368   : > { %3035 = vst.msk [vmem:[#allocation4 + $0x60] sm:$0xff] %vm3022_vm7, %v2951_v53  ;;  %v2953_v43 = vpop.permute.xlu0 %2952 }
 0x369   : > { %4117 = vrot.lane.b32.xlu1 %v4037_v37, %s5772_s29  ;;  %3036 = vst.msk [vmem:[#allocation4 + $0x68] sm:$0xff] %vm3022_vm7, %v2953_v43 }
 0x36a   : > { %3541 = vrot.lane.b32.xlu0 %v4037_v37, %s5769_s19  ;;  %v7540_v21 = vld [vmem:[#allocation3 + $0x150] sm:$0xff]  ;;  %v7542_v26 = vld [vmem:[#allocation3 + $0x158] sm:$0xff] }
 0x36b   : > { %v3720_v44 = vpop.permute.xlu1 %3719  ;;  %v4223_v22 = vld [vmem:[#allocation4 + $0x48] sm:$0xff]  ;;  %2665 = vst.msk [vmem:[#allocation4 + $0xe0] sm:$0xff] %vm2516_vm12, %v7540_v21  ;;  %2666 = vst.msk [vmem:[#allocation4 + $0xe8] sm:$0xff] %vm2516_vm12, %v7542_v26 }
 0x36c   : > { %3806 = vst.msk [vmem:[#allocation4 + $0x50] sm:$0xff] %vm3795_vm3, %v3720_v44  ;;  %5574 = vmatmul.mubr.msk.f32.gmra.mrb[24].mxu1 %vm4262_vm5, %v4223_v22  ;;  %v3722_v20 = vpop.permute.xlu0 %3721 }
 0x36d   : > { %3350 = vrot.lane.b32.xlu1 %v3845_v57, %s5768_s12  ;;  %3807 = vst.msk [vmem:[#allocation4 + $0x58] sm:$0xff] %vm3795_vm3, %v3722_v20 }
 0x36e   : > { %2775 = vrot.lane.b32.xlu0 %v3845_v57, %s5762_s18 }
 0x36f   : > { %v3144_v50 = vpop.permute.xlu1 %3143 }
 0x370   : > { %3228 = vst.msk [vmem:[#allocation4 + $0x60] sm:$0xff] %vm3215_vm8, %v3144_v50  ;;  %v3146_v61 = vpop.permute.xlu0 %3145  ;;  %v4040_v50 = vld [vmem:[#allocation3 + $0x112] sm:$0xff] }
 0x371   : > { %4119 = vrot.lane.b32.xlu1 %v4038_v55, %s5772_s29  ;;  %3229 = vst.msk [vmem:[#allocation4 + $0x68] sm:$0xff] %vm3215_vm8, %v3146_v61 }
 0x372   : > { %3543 = vrot.lane.b32.xlu0 %v4038_v55, %s5769_s19 }
 0x373   : > { %v3913_v39 = vpop.permute.xlu1 %3912 }
 0x374   : > { %3999 = vst.msk [vmem:[#allocation4 + $0x50] sm:$0xff] %vm3988_vm13, %v3913_v39  ;;  %v3915_v7 = vpop.permute.xlu0 %3914 }
 0x375   : > { %2966 = vrot.lane.b32.xlu1 %v4037_v37, %s5764_s20  ;;  %4000 = vst.msk [vmem:[#allocation4 + $0x58] sm:$0xff] %vm3988_vm13, %v3915_v7 }
 0x376   : > { %2968 = vrot.lane.b32.xlu0 %v4038_v55, %s5764_s20 }
 0x377   : > { %v3337_v36 = vpop.permute.xlu1 %3336 }
 0x378   : > { %3421 = vst.msk [vmem:[#allocation4 + $0x60] sm:$0xff] %vm3408_vm9, %v3337_v36  ;;  %v2762_v63 = vpop.permute.xlu0 %2761  ;;  %v5539_v56 = vpop.f32.mrb[12].mxu1 }
 0x379   : > { %3735 = vrot.lane.b32.xlu1 %v7403_v27, %s5770_s26  ;;  %2844 = vst.msk [vmem:[#allocation4 + $0x70] sm:$0xff] %vm2829_vm6, %v2762_v63  ;;  %v2407_v48 = vadd.f32 %v7292_v42, %v5539_v56  ;;  %v2401_v28 = vpop.f32.mrb[13].mxu1 }
 0x37a   : > { %3737 = vrot.lane.b32.xlu0 %v7405_v40, %s5770_s26  ;;  %v2402_v59 = vadd.f32 %v7292_v42, %v2401_v28  ;;  %v3848_v28 = vld [vmem:[#allocation3 + $0x121] sm:$0xff] }
 0x37b   : > { %v4106_v33 = vpop.permute.xlu1 %4105  ;;  %vm2449_vm14 = vcmp.ge.f32.partialorder %v2407_v48, 0.0  ;;  %v2481_v32 = vmul.f32 0.01, %v2407_v48 }
 0x37c   : > { %4192 = vst.msk [vmem:[#allocation4 + $0x50] sm:$0xff] %vm4181_vm4, %v4106_v33  ;;  %vm2448_vm15 = vcmp.ge.f32.partialorder %v2402_v59, 0.0  ;;  %v2480_v35 = vmul.f32 0.01, %v2402_v59  ;;  %v3530_v41 = vpop.permute.xlu0 %3529 }
 0x37d   : > { %3159 = vrot.lane.b32.xlu1 %v7403_v27, %s5766_s22  ;;  %v2513_v51 = vsel %vm2449_vm14, %v2407_v48, %v2481_v32  ;;  %3614 = vst.msk [vmem:[#allocation4 + $0x60] sm:$0xff] %vm3601_vm11, %v3530_v41  ;;  %v3847_v27 = vld [vmem:[#allocation3 + $0x111] sm:$0xff]  ;;  %v4041_v41 = vld [vmem:[#allocation3 + $0x122] sm:$0xff] }
 0x37e   : > { %2602 = vst.msk [vmem:[#allocation3 + $0x171] sm:$0xff] %vm2516_vm12, %v2513_v51  ;;  %v2512_v23 = vsel %vm2448_vm15, %v2402_v59, %v2480_v35  ;;  %3161 = vrot.lane.b32.xlu0 %v7405_v40, %s5766_s22  ;;  %v3849_v59 = vld [vmem:[#allocation3 + $0x129] sm:$0xff] }
 0x37f   : > { %v3339_v47 = vpop.permute.xlu1 %3338  ;;  %2601 = vst.msk [vmem:[#allocation3 + $0x169] sm:$0xff] %vm2516_vm12, %v2512_v23 }
 0x380   : > { %3422 = vst.msk [vmem:[#allocation4 + $0x68] sm:$0xff] %vm3408_vm9, %v3339_v47  ;;  %v2764_v30 = vpop.permute.xlu0 %2763 }
 0x381   : > { %3928 = vrot.lane.b32.xlu1 %v3846_v29, %s5771_s17  ;;  %2845 = vst.msk [vmem:[#allocation4 + $0x78] sm:$0xff] %vm2829_vm6, %v2764_v30 }
 0x382   : > { %3930 = vrot.lane.b32.xlu0 %v3847_v27, %s5771_s17 }
 0x383   : > { %v4108_v18 = vpop.permute.xlu1 %4107  ;;  %v4224_v52 = vld [vmem:[#allocation4 + $0x50] sm:$0xff] }
 0x384   : > { %4193 = vst.msk [vmem:[#allocation4 + $0x58] sm:$0xff] %vm4181_vm4, %v4108_v18  ;;  %5576 = vmatprep.mubr.msk.f32.mxu1 %vm4262_vm5, %v4224_v52  ;;  %v3532_v40 = vpop.permute.xlu0 %3531 }
 0x385   : > { %3352 = vrot.lane.b32.xlu1 %v3846_v29, %s5768_s12  ;;  %3615 = vst.msk [vmem:[#allocation4 + $0x68] sm:$0xff] %vm3601_vm11, %v3532_v40 }
 0x386   : > { %2777 = vrot.lane.b32.xlu0 %v3846_v29, %s5762_s18  ;;  %v7586_v25 = vld [vmem:[#allocation3 + $0x168] sm:$0xff]  ;;  %v7588_v60 = vld [vmem:[#allocation3 + $0x170] sm:$0xff] }
 0x387   : > { %v2955_v19 = vpop.permute.xlu1 %2954  ;;  %2667 = vst.msk [vmem:[#allocation4 + $0xf0] sm:$0xff] %vm2516_vm12, %v7586_v25  ;;  %2668 = vst.msk [vmem:[#allocation4 + $0xf8] sm:$0xff] %vm2516_vm12, %v7588_v60 }
 0x388   : > { %3037 = vst.msk [vmem:[#allocation4 + $0x70] sm:$0xff] %vm3022_vm7, %v2955_v19  ;;  %v2957_v46 = vpop.permute.xlu0 %2956 }
 0x389   : > { %4121 = vrot.lane.b32.xlu1 %v4039_v62, %s5772_s29  ;;  %3038 = vst.msk [vmem:[#allocation4 + $0x78] sm:$0xff] %vm3022_vm7, %v2957_v46 }
 0x38a   : > { %3545 = vrot.lane.b32.xlu0 %v4039_v62, %s5769_s19 }
 0x38b   : > { %v5542_v57 = vpop.f32.mrb[14].mxu1  ;;  %v3724_v58 = vpop.permute.xlu1 %3723  ;;  %v4225_v24 = vld [vmem:[#allocation4 + $0x58] sm:$0xff] }
 0x38c   : > { %v2417_v38 = vadd.f32 %v7292_v42, %v5542_v57  ;;  %3808 = vst.msk [vmem:[#allocation4 + $0x60] sm:$0xff] %vm3795_vm3, %v3724_v58  ;;  %v2411_v54 = vpop.f32.mrb[15].mxu1  ;;  %5577 = vmatmul.mubr.msk.f32.gmra.mrb[26].mxu1 %vm4262_vm5, %v4225_v24  ;;  %v3726_v37 = vpop.permute.xlu0 %3725 }
 0x38d   : > { %v2412_v53 = vadd.f32 %v7292_v42, %v2411_v54  ;;  %3354 = vrot.lane.b32.xlu1 %v3847_v27, %s5768_s12  ;;  %3809 = vst.msk [vmem:[#allocation4 + $0x68] sm:$0xff] %vm3795_vm3, %v3726_v37  ;;  %v3850_v54 = vld [vmem:[#allocation3 + $0x139] sm:$0xff] }
 0x38e   : > { %vm2451_vm10 = vcmp.ge.f32.partialorder %v2417_v38, 0.0  ;;  %v2483_v43 = vmul.f32 0.01, %v2417_v38  ;;  %2779 = vrot.lane.b32.xlu0 %v3847_v27, %s5762_s18  ;;  %v4042_v27 = vld [vmem:[#allocation3 + $0x12a] sm:$0xff] }
 0x38f   : > { %vm2450_vm1 = vcmp.ge.f32.partialorder %v2412_v53, 0.0  ;;  %v2482_v44 = vmul.f32 0.01, %v2412_v53  ;;  %v3148_v22 = vpop.permute.xlu1 %3147 }
 0x390   : > { %v2515_v20 = vsel %vm2451_vm10, %v2417_v38, %v2483_v43  ;;  %3230 = vst.msk [vmem:[#allocation4 + $0x70] sm:$0xff] %vm3215_vm8, %v3148_v22  ;;  %v3150_v42 = vpop.permute.xlu0 %3149  ;;  %v4043_v22 = vld [vmem:[#allocation3 + $0x13a] sm:$0xff] }
 0x391   : > { %2604 = vst.msk [vmem:[#allocation3 + $0x189] sm:$0xff] %vm2516_vm12, %v2515_v20  ;;  %v2514_v55 = vsel %vm2450_vm1, %v2412_v53, %v2482_v44  ;;  %4123 = vrot.lane.b32.xlu1 %v4040_v50, %s5772_s29 }
 0x392   : > { %2603 = vst.msk [vmem:[#allocation3 + $0x181] sm:$0xff] %vm2516_vm12, %v2514_v55  ;;  %3547 = vrot.lane.b32.xlu0 %v4040_v50, %s5769_s19 }
 0x393   : > { %3231 = vst.msk [vmem:[#allocation4 + $0x78] sm:$0xff] %vm3215_vm8, %v3150_v42  ;;  %v3917_v61 = vpop.permute.xlu1 %3916 }
 0x394   : > { %4001 = vst.msk [vmem:[#allocation4 + $0x60] sm:$0xff] %vm3988_vm13, %v3917_v61  ;;  %v3919_v39 = vpop.permute.xlu0 %3918 }
 0x395   : > { %2970 = vrot.lane.b32.xlu1 %v4039_v62, %s5764_s20  ;;  %4002 = vst.msk [vmem:[#allocation4 + $0x68] sm:$0xff] %vm3988_vm13, %v3919_v39  ;;  %v4044_v39 = vld [vmem:[#allocation3 + $0x142] sm:$0xff] }
 0x396   : > { %2972 = vrot.lane.b32.xlu0 %v4040_v50, %s5764_s20 }
 0x397   : > { %v3341_v7 = vpop.permute.xlu1 %3340 }
 0x398   : > { %3423 = vst.msk [vmem:[#allocation4 + $0x70] sm:$0xff] %vm3408_vm9, %v3341_v7  ;;  %v2766_v36 = vpop.permute.xlu0 %2765 }
 0x399   : > { %3739 = vrot.lane.b32.xlu1 %v7449_v49, %s5770_s26  ;;  %2846 = vst.msk [vmem:[#allocation4 + $0x80] sm:$0xff] %vm2829_vm6, %v2766_v36 }
 0x39a   : > { %3741 = vrot.lane.b32.xlu0 %v7451_v0, %s5770_s26 }
 0x39b   : > { %v4110_v63 = vpop.permute.xlu1 %4109 }
 0x39c   : > { %4194 = vst.msk [vmem:[#allocation4 + $0x60] sm:$0xff] %vm4181_vm4, %v4110_v63  ;;  %v3534_v56 = vpop.permute.xlu0 %3533 }
 0x39d   : > { %3163 = vrot.lane.b32.xlu1 %v7449_v49, %s5766_s22  ;;  %3616 = vst.msk [vmem:[#allocation4 + $0x70] sm:$0xff] %vm3601_vm11, %v3534_v56 }
 0x39e   : > { %3165 = vrot.lane.b32.xlu0 %v7451_v0, %s5766_s22 }
 0x39f   : > { %v3343_v48 = vpop.permute.xlu1 %3342 }
 0x3a0   : > { %3424 = vst.msk [vmem:[#allocation4 + $0x78] sm:$0xff] %vm3408_vm9, %v3343_v48  ;;  %v2768_v33 = vpop.permute.xlu0 %2767 }
 0x3a1   : > { %3932 = vrot.lane.b32.xlu1 %v3848_v28, %s5771_s17  ;;  %2847 = vst.msk [vmem:[#allocation4 + $0x88] sm:$0xff] %vm2829_vm6, %v2768_v33 }
 0x3a2   : > { %3934 = vrot.lane.b32.xlu0 %v3849_v59, %s5771_s17 }
 0x3a3   : > { %v4112_v32 = vpop.permute.xlu1 %4111  ;;  %v4226_v49 = vld [vmem:[#allocation4 + $0x60] sm:$0xff] }
 0x3a4   : > { %4195 = vst.msk [vmem:[#allocation4 + $0x68] sm:$0xff] %vm4181_vm4, %v4112_v32  ;;  %5579 = vmatprep.mubr.msk.f32.mxu1 %vm4262_vm5, %v4226_v49  ;;  %v3536_v0 = vpop.permute.xlu0 %3535 }
 0x3a5   : > { %3356 = vrot.lane.b32.xlu1 %v3848_v28, %s5768_s12  ;;  %3617 = vst.msk [vmem:[#allocation4 + $0x78] sm:$0xff] %vm3601_vm11, %v3536_v0  ;;  %v3852_v0 = vld [vmem:[#allocation3 + $0x151] sm:$0xff] }
 0x3a6   : > { %2781 = vrot.lane.b32.xlu0 %v3848_v28, %s5762_s18 }
 0x3a7   : > { %v2959_v35 = vpop.permute.xlu1 %2958 }
 0x3a8   : > { %3039 = vst.msk [vmem:[#allocation4 + $0x80] sm:$0xff] %vm3022_vm7, %v2959_v35  ;;  %v2961_v51 = vpop.permute.xlu0 %2960 }
 0x3a9   : > { %4125 = vrot.lane.b32.xlu1 %v4041_v41, %s5772_s29  ;;  %3040 = vst.msk [vmem:[#allocation4 + $0x88] sm:$0xff] %vm3022_vm7, %v2961_v51 }
 0x3aa   : > { %3549 = vrot.lane.b32.xlu0 %v4041_v41, %s5769_s19 }
 0x3ab   : > { %v3728_v23 = vpop.permute.xlu1 %3727  ;;  %v4227_v47 = vld [vmem:[#allocation4 + $0x68] sm:$0xff] }
 0x3ac   : > { %3810 = vst.msk [vmem:[#allocation4 + $0x70] sm:$0xff] %vm3795_vm3, %v3728_v23  ;;  %5580 = vmatmul.mubr.msk.f32.gmra.mrb[28].mxu1 %vm4262_vm5, %v4227_v47  ;;  %v3730_v29 = vpop.permute.xlu0 %3729  ;;  %v4045_v47 = vld [vmem:[#allocation3 + $0x152] sm:$0xff] }
 0x3ad   : > { %3358 = vrot.lane.b32.xlu1 %v3849_v59, %s5768_s12  ;;  %3811 = vst.msk [vmem:[#allocation4 + $0x78] sm:$0xff] %vm3795_vm3, %v3730_v29 }
 0x3ae   : > { %2783 = vrot.lane.b32.xlu0 %v3849_v59, %s5762_s18 }
 0x3af   : > { %v3152_v30 = vpop.permute.xlu1 %3151 }
 0x3b0   : > { %3232 = vst.msk [vmem:[#allocation4 + $0x80] sm:$0xff] %vm3215_vm8, %v3152_v30  ;;  %v3154_v18 = vpop.permute.xlu0 %3153 }
 0x3b1   : > { %4127 = vrot.lane.b32.xlu1 %v4042_v27, %s5772_s29  ;;  %3233 = vst.msk [vmem:[#allocation4 + $0x88] sm:$0xff] %vm3215_vm8, %v3154_v18 }
 0x3b2   : > { %3551 = vrot.lane.b32.xlu0 %v4042_v27, %s5769_s19 }
 0x3b3   : > { %v3921_v52 = vpop.permute.xlu1 %3920 }
 0x3b4   : > { %4003 = vst.msk [vmem:[#allocation4 + $0x70] sm:$0xff] %vm3988_vm13, %v3921_v52  ;;  %v3923_v40 = vpop.permute.xlu0 %3922 }
 0x3b5   : > { %2974 = vrot.lane.b32.xlu1 %v4041_v41, %s5764_s20  ;;  %4004 = vst.msk [vmem:[#allocation4 + $0x78] sm:$0xff] %vm3988_vm13, %v3923_v40  ;;  %v4046_v40 = vld [vmem:[#allocation3 + $0x15a] sm:$0xff] }
 0x3b6   : > { %2976 = vrot.lane.b32.xlu0 %v4042_v27, %s5764_s20 }
 0x3b7   : > { %v3345_v19 = vpop.permute.xlu1 %3344 }
 0x3b8   : > { %3425 = vst.msk [vmem:[#allocation4 + $0x80] sm:$0xff] %vm3408_vm9, %v3345_v19  ;;  %v2770_v62 = vpop.permute.xlu0 %2769 }
 0x3b9   : > { %3743 = vrot.lane.b32.xlu1 %v7495_v34, %s5770_s26  ;;  %2848 = vst.msk [vmem:[#allocation4 + $0x90] sm:$0xff] %vm2829_vm6, %v2770_v62 }
 0x3ba   : > { %3745 = vrot.lane.b32.xlu0 %v7497_v31, %s5770_s26 }
 0x3bb   : > { %v4114_v46 = vpop.permute.xlu1 %4113 }
 0x3bc   : > { %4196 = vst.msk [vmem:[#allocation4 + $0x70] sm:$0xff] %vm4181_vm4, %v4114_v46  ;;  %v3538_v57 = vpop.permute.xlu0 %3537 }
 0x3bd   : > { %3167 = vrot.lane.b32.xlu1 %v7495_v34, %s5766_s22  ;;  %3618 = vst.msk [vmem:[#allocation4 + $0x80] sm:$0xff] %vm3601_vm11, %v3538_v57  ;;  %v3851_v34 = vld [vmem:[#allocation3 + $0x141] sm:$0xff] }
 0x3be   : > { %3169 = vrot.lane.b32.xlu0 %v7497_v31, %s5766_s22 }
 0x3bf   : > { %v7663_v58 = vpop.f32.mrb[16].mxu1  ;;  %v3347_v24 = vpop.permute.xlu1 %3346 }
 0x3c0   : > { %3426 = vst.msk [vmem:[#allocation4 + $0x88] sm:$0xff] %vm3408_vm9, %v3347_v24  ;;  %v7668_v38 = vpop.f32.mrb[17].mxu1  ;;  %v2772_v53 = vpop.permute.xlu0 %2771 }
 0x3c1   : > { %3936 = vrot.lane.b32.xlu1 %v3850_v54, %s5771_s17  ;;  %2849 = vst.msk [vmem:[#allocation4 + $0x98] sm:$0xff] %vm2829_vm6, %v2772_v53 }
 0x3c2   : > { %3938 = vrot.lane.b32.xlu0 %v3851_v34, %s5771_s17 }
 0x3c3   : > { %v4116_v37 = vpop.permute.xlu1 %4115  ;;  %v4228_v43 = vld [vmem:[#allocation4 + $0x70] sm:$0xff] }
 0x3c4   : > { %4197 = vst.msk [vmem:[#allocation4 + $0x78] sm:$0xff] %vm4181_vm4, %v4116_v37  ;;  %5582 = vmatprep.mubr.msk.f32.mxu1 %vm4262_vm5, %v4228_v43  ;;  %v3540_v31 = vpop.permute.xlu0 %3539 }
 0x3c5   : > { %3360 = vrot.lane.b32.xlu1 %v3850_v54, %s5768_s12  ;;  %3619 = vst.msk [vmem:[#allocation4 + $0x88] sm:$0xff] %vm3601_vm11, %v3540_v31  ;;  %v3854_v31 = vld [vmem:[#allocation3 + $0x169] sm:$0xff] }
 0x3c6   : > { %2785 = vrot.lane.b32.xlu0 %v3850_v54, %s5762_s18 }
 0x3c7   : > { %v2963_v44 = vpop.permute.xlu1 %2962 }
 0x3c8   : > { %3041 = vst.msk [vmem:[#allocation4 + $0x90] sm:$0xff] %vm3022_vm7, %v2963_v44  ;;  %v2965_v20 = vpop.permute.xlu0 %2964 }
 0x3c9   : > { %4129 = vrot.lane.b32.xlu1 %v4043_v22, %s5772_s29  ;;  %3042 = vst.msk [vmem:[#allocation4 + $0x98] sm:$0xff] %vm3022_vm7, %v2965_v20 }
 0x3ca   : > { %3553 = vrot.lane.b32.xlu0 %v4043_v22, %s5769_s19 }
 0x3cb   : > { %v3732_v50 = vpop.permute.xlu1 %3731  ;;  %v4229_v55 = vld [vmem:[#allocation4 + $0x78] sm:$0xff] }
 0x3cc   : > { %3812 = vst.msk [vmem:[#allocation4 + $0x80] sm:$0xff] %vm3795_vm3, %v3732_v50  ;;  %5583 = vmatmul.mubr.msk.f32.gmra.mrb[30].mxu1 %vm4262_vm5, %v4229_v55  ;;  %v3734_v42 = vpop.permute.xlu0 %3733  ;;  %v4047_v55 = vld [vmem:[#allocation3 + $0x16a] sm:$0xff] }
 0x3cd   : > { %3362 = vrot.lane.b32.xlu1 %v3851_v34, %s5768_s12  ;;  %3813 = vst.msk [vmem:[#allocation4 + $0x88] sm:$0xff] %vm3795_vm3, %v3734_v42 }
 0x3ce   : > { %2787 = vrot.lane.b32.xlu0 %v3851_v34, %s5762_s18 }
 0x3cf   : > { %v3156_v61 = vpop.permute.xlu1 %3155 }
 0x3d0   : > { %3234 = vst.msk [vmem:[#allocation4 + $0x90] sm:$0xff] %vm3215_vm8, %v3156_v61  ;;  %v3158_v7 = vpop.permute.xlu0 %3157 }
 0x3d1   : > { %4131 = vrot.lane.b32.xlu1 %v4044_v39, %s5772_s29  ;;  %3235 = vst.msk [vmem:[#allocation4 + $0x98] sm:$0xff] %vm3215_vm8, %v3158_v7 }
 0x3d2   : > { %3555 = vrot.lane.b32.xlu0 %v4044_v39, %s5769_s19 }
 0x3d3   : > { %v3925_v36 = vpop.permute.xlu1 %3924 }
 0x3d4   : > { %4005 = vst.msk [vmem:[#allocation4 + $0x80] sm:$0xff] %vm3988_vm13, %v3925_v36  ;;  %v3927_v63 = vpop.permute.xlu0 %3926 }
 0x3d5   : > { %2978 = vrot.lane.b32.xlu1 %v4043_v22, %s5764_s20  ;;  %4006 = vst.msk [vmem:[#allocation4 + $0x88] sm:$0xff] %vm3988_vm13, %v3927_v63  ;;  %v4048_v63 = vld [vmem:[#allocation3 + $0x172] sm:$0xff] }
 0x3d6   : > { %2980 = vrot.lane.b32.xlu0 %v4044_v39, %s5764_s20 }
 0x3d7   : > { %v3349_v56 = vpop.permute.xlu1 %3348 }
 0x3d8   : > { %3427 = vst.msk [vmem:[#allocation4 + $0x90] sm:$0xff] %vm3408_vm9, %v3349_v56  ;;  %v2774_v48 = vpop.permute.xlu0 %2773 }
 0x3d9   : > { %3747 = vrot.lane.b32.xlu1 %v7540_v21, %s5770_s26  ;;  %2850 = vst.msk [vmem:[#allocation4 + $0xa0] sm:$0xff] %vm2829_vm6, %v2774_v48 }
 0x3da   : > { %3749 = vrot.lane.b32.xlu0 %v7542_v26, %s5770_s26 }
 0x3db   : > { %v4118_v28 = vpop.permute.xlu1 %4117 }
 0x3dc   : > { %4198 = vst.msk [vmem:[#allocation4 + $0x80] sm:$0xff] %vm4181_vm4, %v4118_v28  ;;  %v3542_v33 = vpop.permute.xlu0 %3541 }
 0x3dd   : > { %3171 = vrot.lane.b32.xlu1 %v7540_v21, %s5766_s22  ;;  %3620 = vst.msk [vmem:[#allocation4 + $0x90] sm:$0xff] %vm3601_vm11, %v3542_v33  ;;  %v3853_v21 = vld [vmem:[#allocation3 + $0x159] sm:$0xff] }
 0x3de   : > { %3173 = vrot.lane.b32.xlu0 %v7542_v26, %s5766_s22 }
 0x3df   : > { %v3351_v59 = vpop.permute.xlu1 %3350  ;;  %v7705_v32 = vpop.f32.mrb[18].mxu1 }
 0x3e0   : > { %3428 = vst.msk [vmem:[#allocation4 + $0x98] sm:$0xff] %vm3408_vm9, %v3351_v59  ;;  %v7710_v49 = vpop.f32.mrb[19].mxu1  ;;  %v2776_v35 = vpop.permute.xlu0 %2775  ;;  %v3663_v59 = vld [vmem:[#allocation3 + $0x180] sm:$0xff] }
 0x3e1   : > { %3940 = vrot.lane.b32.xlu1 %v3852_v0, %s5771_s17  ;;  %2851 = vst.msk [vmem:[#allocation4 + $0xa8] sm:$0xff] %vm2829_vm6, %v2776_v35  ;;  %v3664_v35 = vld [vmem:[#allocation3 + $0x188] sm:$0xff] }
 0x3e2   : > { %3942 = vrot.lane.b32.xlu0 %v3853_v21, %s5771_s17 }
 0x3e3   : > { %v4120_v41 = vpop.permute.xlu1 %4119  ;;  %v4230_v51 = vld [vmem:[#allocation4 + $0x80] sm:$0xff] }
 0x3e4   : > { %4199 = vst.msk [vmem:[#allocation4 + $0x88] sm:$0xff] %vm4181_vm4, %v4120_v41  ;;  %5585 = vmatprep.mubr.msk.f32.mxu1 %vm4262_vm5, %v4230_v51  ;;  %v3544_v26 = vpop.permute.xlu0 %3543 }
 0x3e5   : > { %3364 = vrot.lane.b32.xlu1 %v3852_v0, %s5768_s12  ;;  %3621 = vst.msk [vmem:[#allocation4 + $0x98] sm:$0xff] %vm3601_vm11, %v3544_v26 }
 0x3e6   : > { %2789 = vrot.lane.b32.xlu0 %v3852_v0, %s5762_s18 }
 0x3e7   : > { %v2967_v23 = vpop.permute.xlu1 %2966 }
 0x3e8   : > { %3043 = vst.msk [vmem:[#allocation4 + $0xa0] sm:$0xff] %vm3022_vm7, %v2967_v23  ;;  %v2969_v29 = vpop.permute.xlu0 %2968 }
 0x3e9   : > { %4133 = vrot.lane.b32.xlu1 %v4045_v47, %s5772_s29  ;;  %3044 = vst.msk [vmem:[#allocation4 + $0xa8] sm:$0xff] %vm3022_vm7, %v2969_v29 }
 0x3ea   : > { %3557 = vrot.lane.b32.xlu0 %v4045_v47, %s5769_s19 }
 0x3eb   : > { %v3736_v30 = vpop.permute.xlu1 %3735  ;;  %v4231_v27 = vld [vmem:[#allocation4 + $0x88] sm:$0xff] }
 0x3ec   : > { %3814 = vst.msk [vmem:[#allocation4 + $0x90] sm:$0xff] %vm3795_vm3, %v3736_v30  ;;  %5586 = vmatmul.mubr.msk.f32.gmra.mrb[32].mxu1 %vm4262_vm5, %v4231_v27  ;;  %v3738_v18 = vpop.permute.xlu0 %3737  ;;  %v3857_v30 = vld [vmem:[#allocation3 + $0x189] sm:$0xff] }
 0x3ed   : > { %3366 = vrot.lane.b32.xlu1 %v3853_v21, %s5768_s12  ;;  %3815 = vst.msk [vmem:[#allocation4 + $0x98] sm:$0xff] %vm3795_vm3, %v3738_v18 }
 0x3ee   : > { %2791 = vrot.lane.b32.xlu0 %v3853_v21, %s5762_s18 }
 0x3ef   : > { %v3160_v52 = vpop.permute.xlu1 %3159 }
 0x3f0   : > { %3236 = vst.msk [vmem:[#allocation4 + $0xa0] sm:$0xff] %vm3215_vm8, %v3160_v52  ;;  %v3162_v19 = vpop.permute.xlu0 %3161 }
 0x3f1   : > { %4135 = vrot.lane.b32.xlu1 %v4046_v40, %s5772_s29  ;;  %3237 = vst.msk [vmem:[#allocation4 + $0xa8] sm:$0xff] %vm3215_vm8, %v3162_v19  ;;  %v4049_v19 = vld [vmem:[#allocation3 + $0x182] sm:$0xff] }
 0x3f2   : > { %3559 = vrot.lane.b32.xlu0 %v4046_v40, %s5769_s19 }
 0x3f3   : > { %v3929_v62 = vpop.permute.xlu1 %3928 }
 0x3f4   : > { %4007 = vst.msk [vmem:[#allocation4 + $0x90] sm:$0xff] %vm3988_vm13, %v3929_v62  ;;  %v3931_v46 = vpop.permute.xlu0 %3930 }
 0x3f5   : > { %2982 = vrot.lane.b32.xlu1 %v4045_v47, %s5764_s20  ;;  %4008 = vst.msk [vmem:[#allocation4 + $0x98] sm:$0xff] %vm3988_vm13, %v3931_v46  ;;  %v3856_v47 = vld [vmem:[#allocation3 + $0x181] sm:$0xff]  ;;  %v4050_v46 = vld [vmem:[#allocation3 + $0x18a] sm:$0xff] }
 0x3f6   : > { %2984 = vrot.lane.b32.xlu0 %v4046_v40, %s5764_s20 }
 0x3f7   : > { %v3353_v57 = vpop.permute.xlu1 %3352 }
 0x3f8   : > { %3429 = vst.msk [vmem:[#allocation4 + $0xa0] sm:$0xff] %vm3408_vm9, %v3353_v57  ;;  %v2778_v24 = vpop.permute.xlu0 %2777 }
 0x3f9   : > { %3751 = vrot.lane.b32.xlu1 %v7586_v25, %s5770_s26  ;;  %2852 = vst.msk [vmem:[#allocation4 + $0xb0] sm:$0xff] %vm2829_vm6, %v2778_v24 }
 0x3fa   : > { %3753 = vrot.lane.b32.xlu0 %v7588_v60, %s5770_s26 }
 0x3fb   : > { %v4122_v54 = vpop.permute.xlu1 %4121 }
 0x3fc   : > { %4200 = vst.msk [vmem:[#allocation4 + $0x90] sm:$0xff] %vm4181_vm4, %v4122_v54  ;;  %v3546_v53 = vpop.permute.xlu0 %3545  ;;  %v3665_v54 = vld [vmem:[#allocation3 + $0x198] sm:$0xff] }
 0x3fd   : > { %3175 = vrot.lane.b32.xlu1 %v7586_v25, %s5766_s22  ;;  %3622 = vst.msk [vmem:[#allocation4 + $0xa0] sm:$0xff] %vm3601_vm11, %v3546_v53  ;;  %v3855_v25 = vld [vmem:[#allocation3 + $0x171] sm:$0xff] }
 0x3fe   : > { %3177 = vrot.lane.b32.xlu0 %v7588_v60, %s5766_s22 }
 0x3ff   : > { %v3355_v34 = vpop.permute.xlu1 %3354  ;;  %v7749_v37 = vpop.f32.mrb[20].mxu1 }
 0x400   : > { %3430 = vst.msk [vmem:[#allocation4 + $0xa8] sm:$0xff] %vm3408_vm9, %v3355_v34  ;;  %v7752_v43 = vpop.f32.mrb[21].mxu1  ;;  %v2780_v44 = vpop.permute.xlu0 %2779 }
 0x401   : > { %3944 = vrot.lane.b32.xlu1 %v3854_v31, %s5771_s17  ;;  %2853 = vst.msk [vmem:[#allocation4 + $0xb8] sm:$0xff] %vm2829_vm6, %v2780_v44 }
 0x402   : > { %3946 = vrot.lane.b32.xlu0 %v3855_v25, %s5771_s17 }
 0x403   : > { %v4124_v22 = vpop.permute.xlu1 %4123  ;;  %v4232_v20 = vld [vmem:[#allocation4 + $0x90] sm:$0xff] }
 0x404   : > { %4201 = vst.msk [vmem:[#allocation4 + $0x98] sm:$0xff] %vm4181_vm4, %v4124_v22  ;;  %5588 = vmatprep.mubr.msk.f32.mxu1 %vm4262_vm5, %v4232_v20  ;;  %v3548_v60 = vpop.permute.xlu0 %3547  ;;  %v4051_v20 = vld [vmem:[#allocation3 + $0x19a] sm:$0xff] }
 0x405   : > { %3368 = vrot.lane.b32.xlu1 %v3854_v31, %s5768_s12  ;;  %3623 = vst.msk [vmem:[#allocation4 + $0xa8] sm:$0xff] %vm3601_vm11, %v3548_v60 }
 0x406   : > { %2793 = vrot.lane.b32.xlu0 %v3854_v31, %s5762_s18  ;;  %v3858_v31 = vld [vmem:[#allocation3 + $0x199] sm:$0xff] }
 0x407   : > { %v2971_v50 = vpop.permute.xlu1 %2970 }
 0x408   : > { %3045 = vst.msk [vmem:[#allocation4 + $0xb0] sm:$0xff] %vm3022_vm7, %v2971_v50  ;;  %v2973_v42 = vpop.permute.xlu0 %2972  ;;  %v3859_v50 = vld [vmem:[#allocation3 + $0x1a1] sm:$0xff] }
 0x409   : > { %4137 = vrot.lane.b32.xlu1 %v4047_v55, %s5772_s29  ;;  %3046 = vst.msk [vmem:[#allocation4 + $0xb8] sm:$0xff] %vm3022_vm7, %v2973_v42 }
 0x40a   : > { %3561 = vrot.lane.b32.xlu0 %v4047_v55, %s5769_s19 }
 0x40b   : > { %v3740_v61 = vpop.permute.xlu1 %3739  ;;  %v4233_v39 = vld [vmem:[#allocation4 + $0x98] sm:$0xff] }
 0x40c   : > { %3816 = vst.msk [vmem:[#allocation4 + $0xa0] sm:$0xff] %vm3795_vm3, %v3740_v61  ;;  %5589 = vmatmul.mubr.msk.f32.gmra.mrb[34].mxu1 %vm4262_vm5, %v4233_v39  ;;  %v3742_v7 = vpop.permute.xlu0 %3741  ;;  %v4052_v61 = vld [vmem:[#allocation3 + $0x1a2] sm:$0xff] }
 0x40d   : > { %3370 = vrot.lane.b32.xlu1 %v3855_v25, %s5768_s12  ;;  %3817 = vst.msk [vmem:[#allocation4 + $0xa8] sm:$0xff] %vm3795_vm3, %v3742_v7 }
 0x40e   : > { %2795 = vrot.lane.b32.xlu0 %v3855_v25, %s5762_s18  ;;  %v3666_v25 = vld [vmem:[#allocation3 + $0x1a0] sm:$0xff]  ;;  %s4655_s18 = sld [smem:[#allocation5]] }
 0x40f   : > { %v3164_v36 = vpop.permute.xlu1 %3163 }
 0x410   : > { %3238 = vst.msk [vmem:[#allocation4 + $0xb0] sm:$0xff] %vm3215_vm8, %v3164_v36  ;;  %v3166_v56 = vpop.permute.xlu0 %3165 }
 0x411   : > { %4139 = vrot.lane.b32.xlu1 %v4048_v63, %s5772_s29  ;;  %3239 = vst.msk [vmem:[#allocation4 + $0xb8] sm:$0xff] %vm3215_vm8, %v3166_v56 }
 0x412   : > { %3563 = vrot.lane.b32.xlu0 %v4048_v63, %s5769_s19 }
 0x413   : > { %v3933_v48 = vpop.permute.xlu1 %3932 }
 0x414   : > { %4009 = vst.msk [vmem:[#allocation4 + $0xa0] sm:$0xff] %vm3988_vm13, %v3933_v48  ;;  %v3935_v28 = vpop.permute.xlu0 %3934 }
 0x415   : > { %2986 = vrot.lane.b32.xlu1 %v4047_v55, %s5764_s20  ;;  %4010 = vst.msk [vmem:[#allocation4 + $0xa8] sm:$0xff] %vm3988_vm13, %v3935_v28 }
 0x416   : > { %2988 = vrot.lane.b32.xlu0 %v4048_v63, %s5764_s20  ;;  %s5330_s20 = sld [smem:[#allocation5 + $0x1]] }
 0x417   : > { %v3357_v33 = vpop.permute.xlu1 %3356 }
 0x418   : > { %3431 = vst.msk [vmem:[#allocation4 + $0xb0] sm:$0xff] %vm3408_vm9, %v3357_v33  ;;  %v2782_v0 = vpop.permute.xlu0 %2781 }
 0x419   : > { %3755 = vrot.lane.b32.xlu1 %v3663_v59, %s5770_s26  ;;  %2854 = vst.msk [vmem:[#allocation4 + $0xc0] sm:$0xff] %vm2829_vm6, %v2782_v0 }
 0x41a   : > { %3757 = vrot.lane.b32.xlu0 %v3664_v35, %s5770_s26 }
 0x41b   : > { %v4126_v21 = vpop.permute.xlu1 %4125 }
 0x41c   : > { %4202 = vst.msk [vmem:[#allocation4 + $0xa0] sm:$0xff] %vm4181_vm4, %v4126_v21  ;;  %v3550_v41 = vpop.permute.xlu0 %3549 }
 0x41d   : > { %3179 = vrot.lane.b32.xlu1 %v3663_v59, %s5766_s22  ;;  %3624 = vst.msk [vmem:[#allocation4 + $0xb0] sm:$0xff] %vm3601_vm11, %v3550_v41 }
 0x41e   : > { %3181 = vrot.lane.b32.xlu0 %v3664_v35, %s5766_s22  ;;  %s5331_s22 = sld [smem:[#allocation5 + $0x2]] }
 0x41f   : > { %v3359_v51 = vpop.permute.xlu1 %3358  ;;  %v7787_v26 = vpop.f32.mrb[22].mxu1 }
 0x420   : > { %3432 = vst.msk [vmem:[#allocation4 + $0xb8] sm:$0xff] %vm3408_vm9, %v3359_v51  ;;  %v7790_v23 = vpop.f32.mrb[23].mxu1  ;;  %v2784_v29 = vpop.permute.xlu0 %2783 }
 0x421   : > { %3948 = vrot.lane.b32.xlu1 %v3856_v47, %s5771_s17  ;;  %2855 = vst.msk [vmem:[#allocation4 + $0xc8] sm:$0xff] %vm2829_vm6, %v2784_v29 }
 0x422   : > { %3950 = vrot.lane.b32.xlu0 %v3857_v30, %s5771_s17 }
 0x423   : > { %v4128_v27 = vpop.permute.xlu1 %4127  ;;  %v4234_v18 = vld [vmem:[#allocation4 + $0xa0] sm:$0xff] }
 0x424   : > { %4203 = vst.msk [vmem:[#allocation4 + $0xa8] sm:$0xff] %vm4181_vm4, %v4128_v27  ;;  %5591 = vmatprep.mubr.msk.f32.mxu1 %vm4262_vm5, %v4234_v18  ;;  %v3552_v52 = vpop.permute.xlu0 %3551 }
 0x425   : > { %3372 = vrot.lane.b32.xlu1 %v3856_v47, %s5768_s12  ;;  %3625 = vst.msk [vmem:[#allocation4 + $0xb8] sm:$0xff] %vm3601_vm11, %v3552_v52 }
 0x426   : > { %3374 = vrot.lane.b32.xlu0 %v3857_v30, %s5768_s12 }
 0x427   : > { %v2975_v40 = vpop.permute.xlu1 %2974 }
 0x428   : > { %3047 = vst.msk [vmem:[#allocation4 + $0xc0] sm:$0xff] %vm3022_vm7, %v2975_v40  ;;  %v2977_v62 = vpop.permute.xlu0 %2976 }
 0x429   : > { %4141 = vrot.lane.b32.xlu1 %v4049_v19, %s5772_s29  ;;  %3048 = vst.msk [vmem:[#allocation4 + $0xc8] sm:$0xff] %vm3022_vm7, %v2977_v62 }
 0x42a   : > { %4143 = vrot.lane.b32.xlu0 %v4050_v46, %s5772_s29 }
 0x42b   : > { %v3744_v57 = vpop.permute.xlu1 %3743  ;;  %v4235_v24 = vld [vmem:[#allocation4 + $0xa8] sm:$0xff] }
 0x42c   : > { %3818 = vst.msk [vmem:[#allocation4 + $0xb0] sm:$0xff] %vm3795_vm3, %v3744_v57  ;;  %5592 = vmatmul.mubr.msk.f32.gmra.mrb[36].mxu1 %vm4262_vm5, %v4235_v24  ;;  %v3746_v53 = vpop.permute.xlu0 %3745 }
 0x42d   : > { %3565 = vrot.lane.b32.xlu1 %v4049_v19, %s5769_s19  ;;  %3819 = vst.msk [vmem:[#allocation4 + $0xb8] sm:$0xff] %vm3795_vm3, %v3746_v53 }
 0x42e   : > { %3759 = vrot.lane.b32.xlu0 %v3665_v54, %s5770_s26 }
 0x42f   : > { %v3168_v34 = vpop.permute.xlu1 %3167 }
 0x430   : > { %3240 = vst.msk [vmem:[#allocation4 + $0xc0] sm:$0xff] %vm3215_vm8, %v3168_v34  ;;  %v3170_v44 = vpop.permute.xlu0 %3169 }
 0x431   : > { %3567 = vrot.lane.b32.xlu1 %v4050_v46, %s5769_s19  ;;  %3241 = vst.msk [vmem:[#allocation4 + $0xc8] sm:$0xff] %vm3215_vm8, %v3170_v44 }
 0x432   : > { %3952 = vrot.lane.b32.xlu0 %v3858_v31, %s5771_s17 }
 0x433   : > { %v3937_v22 = vpop.permute.xlu1 %3936 }
 0x434   : > { %4011 = vst.msk [vmem:[#allocation4 + $0xb0] sm:$0xff] %vm3988_vm13, %v3937_v22  ;;  %v3939_v60 = vpop.permute.xlu0 %3938 }
 0x435   : > { %3761 = vrot.lane.b32.xlu1 %v3666_v25, %s5770_s26  ;;  %4012 = vst.msk [vmem:[#allocation4 + $0xb8] sm:$0xff] %vm3988_vm13, %v3939_v60 }
 0x436   : > { %4145 = vrot.lane.b32.xlu0 %v4051_v20, %s5772_s29 }
 0x437   : > { %v3361_v55 = vpop.permute.xlu1 %3360 }
 0x438   : > { %3433 = vst.msk [vmem:[#allocation4 + $0xc0] sm:$0xff] %vm3408_vm9, %v3361_v55  ;;  %v2786_v42 = vpop.permute.xlu0 %2785 }
 0x439   : > { %3954 = vrot.lane.b32.xlu1 %v3859_v50, %s5771_s17  ;;  %2856 = vst.msk [vmem:[#allocation4 + $0xd0] sm:$0xff] %vm2829_vm6, %v2786_v42 }
 0x43b   : > { %v4130_v39 = vpop.permute.xlu1 %4129 }
 0x43c   : > { %4204 = vst.msk [vmem:[#allocation4 + $0xb0] sm:$0xff] %vm4181_vm4, %v4130_v39  ;;  %v3554_v7 = vpop.permute.xlu0 %3553 }
 0x43d   : > { %4147 = vrot.lane.b32.xlu1 %v4052_v61, %s5772_s29  ;;  %3626 = vst.msk [vmem:[#allocation4 + $0xc0] sm:$0xff] %vm3601_vm11, %v3554_v7 }
 0x43f   : > { %v3363_v36 = vpop.permute.xlu1 %3362  ;;  %v7823_v63 = vpop.f32.mrb[24].mxu1 }
 0x440   : > { %3434 = vst.msk [vmem:[#allocation4 + $0xc8] sm:$0xff] %vm3408_vm9, %v3363_v36  ;;  %v7826_v56 = vpop.f32.mrb[25].mxu1  ;;  %v2788_v48 = vpop.permute.xlu0 %2787 }
 0x441   : > { %2857 = vst.msk [vmem:[#allocation4 + $0xd8] sm:$0xff] %vm2829_vm6, %v2788_v48 }
 0x443   : > { %v4132_v28 = vpop.permute.xlu1 %4131  ;;  %v4236_v33 = vld [vmem:[#allocation4 + $0xb0] sm:$0xff] }
 0x444   : > { %4205 = vst.msk [vmem:[#allocation4 + $0xb8] sm:$0xff] %vm4181_vm4, %v4132_v28  ;;  %5594 = vmatprep.mubr.msk.f32.mxu1 %vm4262_vm5, %v4236_v33  ;;  %v3556_v59 = vpop.permute.xlu0 %3555 }
 0x445   : > { %3627 = vst.msk [vmem:[#allocation4 + $0xc8] sm:$0xff] %vm3601_vm11, %v3556_v59 }
 0x447   : > { %v2979_v0 = vpop.permute.xlu1 %2978 }
 0x448   : > { %3049 = vst.msk [vmem:[#allocation4 + $0xd0] sm:$0xff] %vm3022_vm7, %v2979_v0  ;;  %v2981_v35 = vpop.permute.xlu0 %2980 }
 0x449   : > { %3050 = vst.msk [vmem:[#allocation4 + $0xd8] sm:$0xff] %vm3022_vm7, %v2981_v35 }
 0x44b   : > { %v3748_v21 = vpop.permute.xlu1 %3747  ;;  %v4237_v41 = vld [vmem:[#allocation4 + $0xb8] sm:$0xff] }
 0x44c   : > { %3820 = vst.msk [vmem:[#allocation4 + $0xc0] sm:$0xff] %vm3795_vm3, %v3748_v21  ;;  %5595 = vmatmul.mubr.msk.f32.gmra.mrb[38].mxu1 %vm4262_vm5, %v4237_v41  ;;  %v3750_v51 = vpop.permute.xlu0 %3749 }
 0x44d   : > { %3821 = vst.msk [vmem:[#allocation4 + $0xc8] sm:$0xff] %vm3795_vm3, %v3750_v51 }
 0x44f   : > { %v3172_v47 = vpop.permute.xlu1 %3171 }
 0x450   : > { %3242 = vst.msk [vmem:[#allocation4 + $0xd0] sm:$0xff] %vm3215_vm8, %v3172_v47  ;;  %v3174_v29 = vpop.permute.xlu0 %3173 }
 0x451   : > { %3243 = vst.msk [vmem:[#allocation4 + $0xd8] sm:$0xff] %vm3215_vm8, %v3174_v29 }
 0x453   : > { %v3941_v30 = vpop.permute.xlu1 %3940 }
 0x454   : > { %4013 = vst.msk [vmem:[#allocation4 + $0xc0] sm:$0xff] %vm3988_vm13, %v3941_v30  ;;  %v3943_v27 = vpop.permute.xlu0 %3942 }
 0x455   : > { %4014 = vst.msk [vmem:[#allocation4 + $0xc8] sm:$0xff] %vm3988_vm13, %v3943_v27 }
 0x457   : > { %v3365_v18 = vpop.permute.xlu1 %3364 }
 0x458   : > { %3435 = vst.msk [vmem:[#allocation4 + $0xd0] sm:$0xff] %vm3408_vm9, %v3365_v18  ;;  %v2790_v52 = vpop.permute.xlu0 %2789 }
 0x459   : > { %2858 = vst.msk [vmem:[#allocation4 + $0xe0] sm:$0xff] %vm2829_vm6, %v2790_v52 }
 0x45b   : > { %v4134_v40 = vpop.permute.xlu1 %4133 }
 0x45c   : > { %4206 = vst.msk [vmem:[#allocation4 + $0xc0] sm:$0xff] %vm4181_vm4, %v4134_v40  ;;  %v3558_v19 = vpop.permute.xlu0 %3557 }
 0x45d   : > { %3628 = vst.msk [vmem:[#allocation4 + $0xd0] sm:$0xff] %vm3601_vm11, %v3558_v19 }
 0x45f   : > { %v3367_v62 = vpop.permute.xlu1 %3366  ;;  %v7845_v46 = vpop.f32.mrb[26].mxu1 }
 0x460   : > { %3436 = vst.msk [vmem:[#allocation4 + $0xd8] sm:$0xff] %vm3408_vm9, %v3367_v62  ;;  %v7848_v57 = vpop.f32.mrb[27].mxu1  ;;  %v2792_v24 = vpop.permute.xlu0 %2791 }
 0x461   : > { %2859 = vst.msk [vmem:[#allocation4 + $0xe8] sm:$0xff] %vm2829_vm6, %v2792_v24 }
 0x463   : > { %v4136_v54 = vpop.permute.xlu1 %4135  ;;  %v4238_v53 = vld [vmem:[#allocation4 + $0xc0] sm:$0xff] }
 0x464   : > { %4207 = vst.msk [vmem:[#allocation4 + $0xc8] sm:$0xff] %vm4181_vm4, %v4136_v54  ;;  %5597 = vmatprep.mubr.msk.f32.mxu1 %vm4262_vm5, %v4238_v53  ;;  %v3560_v34 = vpop.permute.xlu0 %3559 }
 0x465   : > { %3629 = vst.msk [vmem:[#allocation4 + $0xd8] sm:$0xff] %vm3601_vm11, %v3560_v34 }
 0x467   : > { %v2983_v31 = vpop.permute.xlu1 %2982 }
 0x468   : > { %3051 = vst.msk [vmem:[#allocation4 + $0xe0] sm:$0xff] %vm3022_vm7, %v2983_v31  ;;  %v2985_v44 = vpop.permute.xlu0 %2984 }
 0x469   : > { %3052 = vst.msk [vmem:[#allocation4 + $0xe8] sm:$0xff] %vm3022_vm7, %v2985_v44 }
 0x46b   : > { %v3752_v25 = vpop.permute.xlu1 %3751  ;;  %v4239_v22 = vld [vmem:[#allocation4 + $0xc8] sm:$0xff] }
 0x46c   : > { %3822 = vst.msk [vmem:[#allocation4 + $0xd0] sm:$0xff] %vm3795_vm3, %v3752_v25  ;;  %5598 = vmatmul.mubr.msk.f32.gmra.mrb[40].mxu1 %vm4262_vm5, %v4239_v22  ;;  %v3754_v20 = vpop.permute.xlu0 %3753 }
 0x46d   : > { %3823 = vst.msk [vmem:[#allocation4 + $0xd8] sm:$0xff] %vm3795_vm3, %v3754_v20 }
 0x46f   : > { %v3176_v60 = vpop.permute.xlu1 %3175 }
 0x470   : > { %3244 = vst.msk [vmem:[#allocation4 + $0xe0] sm:$0xff] %vm3215_vm8, %v3176_v60  ;;  %v3178_v50 = vpop.permute.xlu0 %3177 }
 0x471   : > { %3245 = vst.msk [vmem:[#allocation4 + $0xe8] sm:$0xff] %vm3215_vm8, %v3178_v50 }
 0x473   : > { %v3945_v55 = vpop.permute.xlu1 %3944 }
 0x474   : > { %4015 = vst.msk [vmem:[#allocation4 + $0xd0] sm:$0xff] %vm3988_vm13, %v3945_v55  ;;  %v3947_v42 = vpop.permute.xlu0 %3946 }
 0x475   : > { %4016 = vst.msk [vmem:[#allocation4 + $0xd8] sm:$0xff] %vm3988_vm13, %v3947_v42 }
 0x477   : > { %v3369_v61 = vpop.permute.xlu1 %3368 }
 0x478   : > { %3437 = vst.msk [vmem:[#allocation4 + $0xe0] sm:$0xff] %vm3408_vm9, %v3369_v61  ;;  %v2794_v39 = vpop.permute.xlu0 %2793 }
 0x479   : > { %2860 = vst.msk [vmem:[#allocation4 + $0xf0] sm:$0xff] %vm2829_vm6, %v2794_v39 }
 0x47b   : > { %v4138_v7 = vpop.permute.xlu1 %4137 }
 0x47c   : > { %4208 = vst.msk [vmem:[#allocation4 + $0xd0] sm:$0xff] %vm4181_vm4, %v4138_v7  ;;  %v3562_v36 = vpop.permute.xlu0 %3561 }
 0x47d   : > { %3630 = vst.msk [vmem:[#allocation4 + $0xe0] sm:$0xff] %vm3601_vm11, %v3562_v36 }
 0x47f   : > { %v3371_v48 = vpop.permute.xlu1 %3370  ;;  %v7867_v28 = vpop.f32.mrb[28].mxu1 }
 0x480   : > { %3438 = vst.msk [vmem:[#allocation4 + $0xe8] sm:$0xff] %vm3408_vm9, %v3371_v48  ;;  %v7870_v33 = vpop.f32.mrb[29].mxu1  ;;  %v2796_v59 = vpop.permute.xlu0 %2795 }
 0x481   : > { %2861 = vst.msk [vmem:[#allocation4 + $0xf8] sm:$0xff] %vm2829_vm6, %v2796_v59 }
 0x483   : > { %v4140_v0 = vpop.permute.xlu1 %4139  ;;  %v4240_v35 = vld [vmem:[#allocation4 + $0xd0] sm:$0xff] }
 0x484   : > { %4209 = vst.msk [vmem:[#allocation4 + $0xd8] sm:$0xff] %vm4181_vm4, %v4140_v0  ;;  %5600 = vmatprep.mubr.msk.f32.mxu1 %vm4262_vm5, %v4240_v35  ;;  %v3564_v21 = vpop.permute.xlu0 %3563  ;;  %v4658_v35 = vlaneseq }
 0x485   : > { %3631 = vst.msk [vmem:[#allocation4 + $0xe8] sm:$0xff] %vm3601_vm11, %v3564_v21 }
 0x487   : > { %v2987_v41 = vpop.permute.xlu1 %2986 }
 0x488   : > { %3053 = vst.msk [vmem:[#allocation4 + $0xf0] sm:$0xff] %vm3022_vm7, %v2987_v41  ;;  %v2989_v51 = vpop.permute.xlu0 %2988 }
 0x489   : > { %3054 = vst.msk [vmem:[#allocation4 + $0xf8] sm:$0xff] %vm3022_vm7, %v2989_v51  ;;  %v4659_v51 = vand.u32 127, %v4658_v35 }
 0x48b   : > { %v3756_v47 = vpop.permute.xlu1 %3755  ;;  %v4241_v29 = vld [vmem:[#allocation4 + $0xd8] sm:$0xff] }
 0x48c   : > { %3824 = vst.msk [vmem:[#allocation4 + $0xe0] sm:$0xff] %vm3795_vm3, %v3756_v47  ;;  %5601 = vmatmul.mubr.msk.f32.gmra.mrb[42].mxu1 %vm4262_vm5, %v4241_v29  ;;  %v3758_v30 = vpop.permute.xlu0 %3757  ;;  %v7917_v47 = vshrl.u32 %v4658_v35, 7 }
 0x48d   : > { %3825 = vst.msk [vmem:[#allocation4 + $0xe8] sm:$0xff] %vm3795_vm3, %v3758_v30  ;;  %v4664_v30 = vstv %s4655_s18 }
 0x48e   : > { %v4662_v29 = vsub.s32 %v4659_v51, %v7917_v47 }
 0x48f   : > { %v3180_v27 = vpop.permute.xlu1 %3179 }
 0x490   : > { %3246 = vst.msk [vmem:[#allocation4 + $0xf0] sm:$0xff] %vm3215_vm8, %v3180_v27  ;;  %v3182_v18 = vpop.permute.xlu0 %3181  ;;  %vm4663_vm6 = vcmp.eq.s32.totalorder %v4662_v29, 1  ;;  %vm4666_vm7 = vcmp.eq.s32.totalorder %v4662_v29, 0 }
 0x491   : > { %3247 = vst.msk [vmem:[#allocation4 + $0xf8] sm:$0xff] %vm3215_vm8, %v3182_v18  ;;  %v4665_v27 = vsel %vm4663_vm6, %v4664_v30, 0.0  ;;  %v4667_v18 = vstv %s5330_s20  ;;  %vm4670_vm8 = vcmp.eq.s32.totalorder %v4662_v29, 4294967295 }
 0x493   : > { %v3949_v52 = vpop.permute.xlu1 %3948 }
 0x494   : > { %4017 = vst.msk [vmem:[#allocation4 + $0xe0] sm:$0xff] %vm3988_vm13, %v3949_v52  ;;  %v3951_v40 = vpop.permute.xlu0 %3950  ;;  %v4671_v52 = vstv %s5331_s22 }
 0x495   : > { %4018 = vst.msk [vmem:[#allocation4 + $0xe8] sm:$0xff] %vm3988_vm13, %v3951_v40  ;;  %v4668_v40 = vsel %vm4666_vm7, %v4667_v18, 0.0 }
 0x497   : > { %v3373_v19 = vpop.permute.xlu1 %3372 }
 0x498   : > { %3439 = vst.msk [vmem:[#allocation4 + $0xf0] sm:$0xff] %vm3408_vm9, %v3373_v19  ;;  %v3375_v62 = vpop.permute.xlu0 %3374  ;;  %v4672_v19 = vsel %vm4670_vm8, %v4671_v52, 0.0 }
 0x499   : > { %3440 = vst.msk [vmem:[#allocation4 + $0xf8] sm:$0xff] %vm3408_vm9, %v3375_v62  ;;  %v4669_v62 = vadd.f32 %v4668_v40, %v4665_v27  ;;  %vm5773_vm9 = vmmov 0  }
 0x49a   : > { %5611 = vmatprep.mubr.msk.f32.mxu0 %vm5773_vm9, %v8415_v45 }
 0x49b   : > { %v4142_v24 = vpop.permute.xlu1 %4141 }
 0x49c   : > { %4210 = vst.msk [vmem:[#allocation4 + $0xe0] sm:$0xff] %vm4181_vm4, %v4142_v24  ;;  %v4144_v54 = vpop.permute.xlu0 %4143  ;;  %v4673_v24 = vadd.f32 %v4672_v19, %v4669_v62 }
 0x49d   : > { %4211 = vst.msk [vmem:[#allocation4 + $0xe8] sm:$0xff] %vm4181_vm4, %v4144_v54 }
 0x49e   : > { %5610 = vmatpush3.msra.mxu0 %v4673_v24 }
 0x49f   : > { %v3566_v53 = vpop.permute.xlu1 %3565  ;;  %v7889_v34 = vpop.f32.mrb[30].mxu1 }
 0x4a0   : > { %3632 = vst.msk [vmem:[#allocation4 + $0xf0] sm:$0xff] %vm3601_vm11, %v3566_v53  ;;  %v7892_v31 = vpop.f32.mrb[31].mxu1  ;;  %v3760_v44 = vpop.permute.xlu0 %3759 }
 0x4a1   : > { %3826 = vst.msk [vmem:[#allocation4 + $0xf0] sm:$0xff] %vm3795_vm3, %v3760_v44  ;;  %v7927_v44 = vld [vmem:[%s8374_s5] sm:$0xf] }
 0x4a2   : > { %5614 = vmatprep.subr.msk.mxu0 %vm2191_vm2, %v7927_v44 }
 0x4a3   : > { %v3568_v25 = vpop.permute.xlu1 %3567  ;;  %v4242_v22 = vld [vmem:[#allocation4 + $0xe0] sm:$0xff] }
 0x4a4   : > { %3633 = vst.msk [vmem:[#allocation4 + $0xf8] sm:$0xff] %vm3601_vm11, %v3568_v25  ;;  %5603 = vmatprep.mubr.msk.f32.mxu1 %vm4262_vm5, %v4242_v22  ;;  %v4243_v20 = vld [vmem:[#allocation4 + $0xe8] sm:$0xff]  ;;  %v3953_v60 = vpop.permute.xlu0 %3952  ;;  %v7935_v25 = vld [vmem:[%s8373_s4] ss:$0 sm:$0xff] }
 0x4a5   : > { %5604 = vmatmul.mubr.msk.f32.gmra.mrb[44].mxu1 %vm4262_vm5, %v4243_v20  ;;  %4019 = vst.msk [vmem:[#allocation4 + $0xf0] sm:$0xff] %vm3988_vm13, %v3953_v60  ;;  %v7939_v22 = vadd.f32 %v7663_v58, %v7935_v25  ;;  %v7943_v20 = vadd.f32 %v7935_v25, %v7668_v38  ;;  %v7947_v60 = vadd.f32 %v7935_v25, %v7710_v49 }
 0x4a6   : > { %v7957_v58 = vadd.f32 %v7705_v32, %v7935_v25  ;;  %v7961_v38 = vadd.f32 %v7935_v25, %v7752_v43  ;;  %v7971_v29 = vadd.f32 %v7749_v37, %v7935_v25  ;;  %v7975_v32 = vadd.f32 %v7935_v25, %v7790_v23 }
 0x4a7   : > { %v3762_v50 = vpop.permute.xlu1 %3761  ;;  %v4585_v45 = vsel %vm2516_vm12, %v7939_v22, 0.0  ;;  %v7983_v52 = vadd.f32 %v7787_v26, %v7935_v25  ;;  %v7987_v37 = vadd.f32 %v7935_v25, %v7826_v56  ;;  %v7995_v24 = vadd.f32 %v7823_v63, %v7935_v25 }
 0x4a8   : > { %3827 = vst.msk [vmem:[#allocation4 + $0xf8] sm:$0xff] %vm3795_vm3, %v3762_v50  ;;  %v4146_v55 = vpop.permute.xlu0 %4145  ;;  %v4584_v50 = vsel %vm2516_vm12, %v7943_v20, 0.0  ;;  %v4593_v30 = vsel %vm2516_vm12, %v7971_v29, 0.0  ;;  %v4595_v27 = vsel %vm2516_vm12, %v7975_v32, 0.0  ;;  %v7999_v26 = vadd.f32 %v7935_v25, %v7848_v57 }
 0x4a9   : > { %4212 = vst.msk [vmem:[#allocation4 + $0xf0] sm:$0xff] %vm4181_vm4, %v4146_v55  ;;  %v4587_v55 = vsel %vm2516_vm12, %v7947_v60, 0.0  ;;  %v4597_v23 = vsel %vm2516_vm12, %v7983_v52, 0.0  ;;  %v4599_v19 = vsel %vm2516_vm12, %v7987_v37, 0.0  ;;  %v4601_v56 = vsel %vm2516_vm12, %v7995_v24, 0.0 }
 0x4aa   : > { %v8011_v63 = vadd.f32 %v7935_v25, %v7870_v33 }
 0x4ab   : > { %v3955_v42 = vpop.permute.xlu1 %3954 }
 0x4ac   : > { %4020 = vst.msk [vmem:[#allocation4 + $0xf8] sm:$0xff] %vm3988_vm13, %v3955_v42  ;;  %v4586_v42 = vadd.f32 %v4585_v45, %v4584_v50  ;;  %v4603_v50 = vsel %vm2516_vm12, %v7999_v26, 0.0 }
 0x4ae   : > { %v4588_v49 = vadd.f32 %v4587_v55, %v4586_v42  ;;  %v8007_v42 = vadd.f32 %v7845_v46, %v7935_v25  ;;  %v8023_v46 = vadd.f32 %v7935_v25, %v7892_v31 }
 0x4af   : > { %v4148_v61 = vpop.permute.xlu1 %4147 }
 0x4b0   : > { %4213 = vst.msk [vmem:[#allocation4 + $0xf8] sm:$0xff] %vm4181_vm4, %v4148_v61  ;;  %v4244_v39 = vld [vmem:[#allocation4 + $0xf0] sm:$0xff]  ;;  %v4589_v61 = vsel %vm2516_vm12, %v7957_v58, 0.0  ;;  %v4605_v57 = vsel %vm2516_vm12, %v8007_v42, 0.0 }
 0x4b1   : > { %5606 = vmatprep.mubr.msk.f32.mxu1 %vm4262_vm5, %v4244_v39  ;;  %v4591_v39 = vsel %vm2516_vm12, %v7961_v38, 0.0  ;;  %v4590_v35 = vadd.f32 %v4589_v61, %v4588_v49  ;;  %v4607_v61 = vsel %vm2516_vm12, %v8011_v63, 0.0 }
 0x4b3   : > { %v4592_v43 = vadd.f32 %v4591_v39, %v4590_v35  ;;  %v8019_v35 = vadd.f32 %v7867_v28, %v7935_v25 }
 0x4b5   : > { %v4594_v18 = vadd.f32 %v4593_v30, %v4592_v43  ;;  %v4609_v33 = vsel %vm2516_vm12, %v8019_v35, 0.0  ;;  %v4611_v30 = vsel %vm2516_vm12, %v8023_v46, 0.0 }
 0x4b7   : > { %v4245_v7 = vld [vmem:[#allocation4 + $0xf8] sm:$0xff]  ;;  %v4596_v40 = vadd.f32 %v4595_v27, %v4594_v18  ;;  %v8031_v18 = vadd.f32 %v7889_v34, %v7935_v25 }
 0x4b8   : > { %5607 = vmatmul.mubr.msk.f32.gmra.mrb[46].mxu1 %vm4262_vm5, %v4245_v7 }
 0x4b9   : > { %v4598_v62 = vadd.f32 %v4597_v23, %v4596_v40 }
 0x4bb   : > { %v4600_v45 = vadd.f32 %v4599_v19, %v4598_v62  ;;  %v4613_v19 = vsel %vm2516_vm12, %v8031_v18, 0.0 }
 0x4bd   : > { %v4602_v55 = vadd.f32 %v4601_v56, %v4600_v45 }
 0x4bf   : > { %v7905_v36 = vpop.f32.mrb[32].mxu1  ;;  %v4604_v49 = vadd.f32 %v4603_v50, %v4602_v55 }
 0x4c0   : > { %v7907_v48 = vpop.f32.mrb[33].mxu1  ;;  %v8043_v56 = vadd.f32 %v7905_v36, %v7935_v25 }
 0x4c1   : > { %v4606_v39 = vadd.f32 %v4605_v57, %v4604_v49  ;;  %v8035_v28 = vadd.f32 %v7935_v25, %v7907_v48 }
 0x4c2   : > { %v4617_v50 = vsel %vm2516_vm12, %v8043_v56, 0.0 }
 0x4c3   : > { %v4608_v43 = vadd.f32 %v4607_v61, %v4606_v39  ;;  %v4615_v62 = vsel %vm2516_vm12, %v8035_v28, 0.0 }
 0x4c5   : > { %v4610_v27 = vadd.f32 %v4609_v33, %v4608_v43 }
 0x4c7   : > { %v4612_v23 = vadd.f32 %v4611_v30, %v4610_v27 }
 0x4c9   : > { %v4614_v45 = vadd.f32 %v4613_v19, %v4612_v23 }
 0x4cb   : > { %v4616_v48 = vadd.f32 %v4615_v62, %v4614_v45 }
 0x4cd   : > { %v4618_v49 = vadd.f32 %v4617_v50, %v4616_v48 }
 0x4df   : > { %v7909_v59 = vpop.f32.mrb[34].mxu1 }
 0x4e0   : > { %v7911_v0 = vpop.f32.mrb[35].mxu1  ;;  %v8055_v57 = vadd.f32 %v7909_v59, %v7935_v25 }
 0x4e1   : > { %v8047_v34 = vadd.f32 %v7935_v25, %v7911_v0 }
 0x4e2   : > { %v4621_v0 = vsel %vm2516_vm12, %v8055_v57, 0.0 }
 0x4e3   : > { %v4619_v55 = vsel %vm2516_vm12, %v8047_v34, 0.0 }
 0x4e4   : > { %v4620_v61 = vadd.f32 %v4619_v55, %v4618_v49 }
 0x4e6   : > { %v4622_v43 = vadd.f32 %v4621_v0, %v4620_v61 }
 0x4ff   : > { %v7913_v21 = vpop.f32.mrb[36].mxu1 }
 0x500   : > { %v7915_v41 = vpop.f32.mrb[37].mxu1  ;;  %v8067_v33 = vadd.f32 %v7913_v21, %v7935_v25 }
 0x501   : > { %v8059_v36 = vadd.f32 %v7935_v25, %v7915_v41 }
 0x502   : > { %v4625_v41 = vsel %vm2516_vm12, %v8067_v33, 0.0 }
 0x503   : > { %v4623_v39 = vsel %vm2516_vm12, %v8059_v36, 0.0 }
 0x504   : > { %v4624_v30 = vadd.f32 %v4623_v39, %v4622_v43 }
 0x506   : > { %v4626_v23 = vadd.f32 %v4625_v41, %v4624_v30 }
 0x51f   : > { %v7920_v54 = vpop.f32.mrb[38].mxu1 }
 0x520   : > { %v7922_v53 = vpop.f32.mrb[39].mxu1  ;;  %v8079_v19 = vadd.f32 %v7920_v54, %v7935_v25 }
 0x521   : > { %v8071_v59 = vadd.f32 %v7935_v25, %v7922_v53 }
 0x522   : > { %v4629_v53 = vsel %vm2516_vm12, %v8079_v19, 0.0 }
 0x523   : > { %v4627_v27 = vsel %vm2516_vm12, %v8071_v59, 0.0 }
 0x524   : > { %v4628_v21 = vadd.f32 %v4627_v27, %v4626_v23 }
 0x526   : > { %v4630_v55 = vadd.f32 %v4629_v53, %v4628_v21 }
 0x53f   : > { %v7967_v7 = vpop.f32.mrb[40].mxu1 }
 0x540   : > { %v4545_v51 = vpop.f32.mrb[41].mxu1  ;;  %v8090_v49 = vadd.f32 %v7967_v7, %v7935_v25 }
 0x541   : > { %v8082_v62 = vadd.f32 %v7935_v25, %v4545_v51 }
 0x542   : > { %v4633_v51 = vsel %vm2516_vm12, %v8090_v49, 0.0 }
 0x543   : > { %v4631_v50 = vsel %vm2516_vm12, %v8082_v62, 0.0 }
 0x544   : > { %v4632_v61 = vadd.f32 %v4631_v50, %v4630_v55 }
 0x546   : > { %v4634_v39 = vadd.f32 %v4633_v51, %v4632_v61 }
 0x55f   : > { %v5602_v40 = vpop.f32.mrb[42].mxu1 }
 0x560   : > { %v4555_v31 = vpop.f32.mrb[43].mxu1  ;;  %v8100_v43 = vadd.f32 %v5602_v40, %v7935_v25 }
 0x561   : > { %v8093_v54 = vadd.f32 %v7935_v25, %v4555_v31 }
 0x562   : > { %v4637_v7 = vsel %vm2516_vm12, %v8100_v43, 0.0 }
 0x563   : > { %v4635_v0 = vsel %vm2516_vm12, %v8093_v54, 0.0 }
 0x564   : > { %v4636_v41 = vadd.f32 %v4635_v0, %v4634_v39 }
 0x566   : > { %v4638_v27 = vadd.f32 %v4637_v7, %v4636_v41 }
 0x578   : > { %v5605_v45 = vpop.f32.mrb[44].mxu1 }
 0x579   : > { %v4565_v48 = vpop.f32.mrb[45].mxu1  ;;  %v8110_v23 = vadd.f32 %v5605_v45, %v7935_v25 }
 0x57a   : > { %v8103_v30 = vadd.f32 %v7935_v25, %v4565_v48 }
 0x57b   : > { %8417 = vst [vmem:[#allocation25_spill] sm:$0xff] %v8110_v23  ;;  %v4641_v40 = vsel %vm2516_vm12, %v8110_v23, 0.0 }
 0x57c   : > { %8416 = vst [vmem:[#allocation24_spill] sm:$0xff] %v8103_v30  ;;  %v4639_v31 = vsel %vm2516_vm12, %v8103_v30, 0.0 }
 0x57d   : > { %v4640_v21 = vadd.f32 %v4639_v31, %v4638_v27 }
 0x57f   : > { %v4642_v61 = vadd.f32 %v4641_v40, %v4640_v21 }
 0x58b   : > { %v5608_v53 = vpop.f32.mrb[46].mxu1 }
 0x58c   : > { %v4575_v50 = vpop.f32.mrb[47].mxu1  ;;  %v8115_v48 = vadd.f32 %v5608_v53, %v7935_v25 }
 0x58d   : > { %v8118_v55 = vadd.f32 %v7935_v25, %v4575_v50  ;;  %v8433_v25 = vld [vmem:[#allocation23_spill] sm:$0xff] }
 0x58e   : > { %v4645_v45 = vsel %vm2516_vm12, %v8115_v48, 0.0 }
 0x58f   : > { %v4643_v51 = vsel %vm2516_vm12, %v8118_v55, 0.0 }
 0x590   : > { %v4644_v0 = vadd.f32 %v4643_v51, %v4642_v61 }
 0x592   : > { %v4646_v39 = vadd.f32 %v4645_v45, %v4644_v0 }
 0x594   : > { %v4647_v41 = vrot.slane %v4646_v39, 4 }
 0x596   : > { %v4648_v7 = vadd.f32 %v4647_v41, %v4646_v39 }
 0x598   : > { %v4649_v31 = vrot.slane %v4648_v7, 2 }
 0x59a   : > { %v4650_v27 = vadd.f32 %v4649_v31, %v4648_v7 }
 0x59c   : > { %v4651_v30 = vrot.slane %v4650_v27, 1 }
 0x59e   : > { %v4652_v23 = vadd.f32 %v4651_v30, %v4650_v27 }
 0x5a0   : > { %v4654_v53 = vmul.f32 0.00390625, %v4652_v23 }
 0x5a2   : > { %5612 = vmatmul.mubr.msk.f32.vlgmr.msra.gmra.mrb[16].mxu0 %vm2516_vm12, %v4654_v53  ;;  %v5087_v53 = vsub.s32 0, %v7917_v47 }
 0x5a3   : > { %5615 = vmatpush3.msk.msra.mxu0 %vm2191_vm2, %v7927_v44  ;;  %5616 = vmatprep.mubr.msk.f32.mxu0 %vm320_vm0, %v5970_v1  ;;  %v8418_v1 = vld [vmem:[#allocation8_spill] sm:$0xff]  ;;  %v8432_v44 = vld [vmem:[#allocation21_spill] sm:$0xff] }
 0x5a6   : > { %5617 = vmatmul.mubr.msk.f32.vlgmr.msra.gmra.mrb[18].mxu0 %vm320_vm0, %v5976_v3  ;;  %v8420_v3 = vld [vmem:[#allocation9_spill] sm:$0xff] }
 0x5a7   : > { %5619 = vmatprep.mubr.msk.f32.mxu0 %vm320_vm0, %v5973_v2  ;;  %v8419_v2 = vld [vmem:[#allocation10_spill] sm:$0xff] }
 0x5aa   : > { %5620 = vmatmul.mubr.msk.f32.gmra.mrb[20].mxu0 %vm320_vm0, %v5988_v5  ;;  %v8422_v5 = vld [vmem:[#allocation11_spill] sm:$0xff] }
 0x5ab   : > { %5622 = vmatprep.mubr.msk.f32.mxu0 %vm320_vm0, %v5985_v4  ;;  %v8421_v4 = vld [vmem:[#allocation12_spill] sm:$0xff] }
 0x5ae   : > { %5623 = vmatmul.mubr.msk.f32.gmra.mrb[22].mxu0 %vm320_vm0, %v6000_v9  ;;  %v8424_v9 = vld [vmem:[#allocation13_spill] sm:$0xff] }
 0x5af   : > { %5625 = vmatprep.mubr.msk.f32.mxu0 %vm320_vm0, %v5991_v6  ;;  %v8423_v6 = vld [vmem:[#allocation14_spill] sm:$0xff] }
 0x5b2   : > { %5626 = vmatmul.mubr.msk.f32.gmra.mrb[24].mxu0 %vm320_vm0, %v6009_v11  ;;  %v8426_v11 = vld [vmem:[#allocation15_spill] sm:$0xff] }
 0x5b3   : > { %5628 = vmatprep.mubr.msk.f32.mxu0 %vm320_vm0, %v6006_v10  ;;  %v8425_v10 = vld [vmem:[#allocation16_spill] sm:$0xff] }
 0x5b6   : > { %5629 = vmatmul.mubr.msk.f32.gmra.mrb[26].mxu0 %vm320_vm0, %v6021_v13  ;;  %v8428_v13 = vld [vmem:[#allocation17_spill] sm:$0xff] }
 0x5b7   : > { %5631 = vmatprep.mubr.msk.f32.mxu0 %vm320_vm0, %v6012_v12  ;;  %v8427_v12 = vld [vmem:[#allocation18_spill] sm:$0xff] }
 0x5ba   : > { %5632 = vmatmul.mubr.msk.f32.gmra.mrb[28].mxu0 %vm320_vm0, %v6027_v15  ;;  %v8430_v15 = vld [vmem:[#allocation19_spill] sm:$0xff] }
 0x5bb   : > { %5634 = vmatprep.mubr.msk.f32.mxu0 %vm320_vm0, %v6024_v14  ;;  %v8429_v14 = vld [vmem:[#allocation20_spill] sm:$0xff] }
 0x5be   : > { %5635 = vmatmul.mubr.msk.f32.gmra.mrb[30].mxu0 %vm320_vm0, %v6039_v17  ;;  %v8431_v17 = vld [vmem:[#allocation22_spill] sm:$0xff] }
 0x5bf   : > { %5637 = vmatprep.mubr.msk.f32.mxu0 %vm320_vm0, %v8418_v1 }
 0x5c2   : > { %5638 = vmatmul.mubr.msk.f32.gmra.mrb[32].mxu0 %vm320_vm0, %v8419_v2 }
 0x5c3   : > { %5640 = vmatprep.mubr.msk.f32.mxu0 %vm320_vm0, %v8420_v3 }
 0x5c6   : > { %5641 = vmatmul.mubr.msk.f32.gmra.mrb[34].mxu0 %vm320_vm0, %v8421_v4 }
 0x5c7   : > { %5643 = vmatprep.mubr.msk.f32.mxu0 %vm320_vm0, %v8422_v5 }
 0x5ca   : > { %5644 = vmatmul.mubr.msk.f32.gmra.mrb[36].mxu0 %vm320_vm0, %v8423_v6 }
 0x5cb   : > { %5646 = vmatprep.mubr.msk.f32.mxu0 %vm320_vm0, %v8424_v9 }
 0x5ce   : > { %5647 = vmatmul.mubr.msk.f32.gmra.mrb[38].mxu0 %vm320_vm0, %v8425_v10 }
 0x5cf   : > { %5649 = vmatprep.mubr.msk.f32.mxu0 %vm320_vm0, %v8426_v11 }
 0x5d2   : > { %5650 = vmatmul.mubr.msk.f32.gmra.mrb[40].mxu0 %vm320_vm0, %v8427_v12 }
 0x5d3   : > { %5652 = vmatprep.mubr.msk.f32.mxu0 %vm320_vm0, %v8428_v13 }
 0x5d6   : > { %5653 = vmatmul.mubr.msk.f32.gmra.mrb[42].mxu0 %vm320_vm0, %v8429_v14 }
 0x5d7   : > { %5655 = vmatprep.mubr.msk.f32.mxu0 %vm320_vm0, %v8430_v15 }
 0x5da   : > { %5656 = vmatmul.mubr.msk.f32.gmra.mrb[44].mxu0 %vm320_vm0, %v8431_v17 }
 0x5db   : > { %5658 = vmatprep.mubr.msk.f32.mxu0 %vm320_vm0, %v8432_v44 }
 0x5de   : > { %5659 = vmatmul.mubr.msk.f32.gmra.mrb[46].mxu0 %vm320_vm0, %v8433_v25 }
 0x5df   : > { %5661 = vmatprep.mubr.msk.f32.mxu0 %vm320_vm0, %v6780_v8 }
 0x5e2   : > { %5662 = vmatmul.mubr.msk.f32.gmra.mrb[48].mxu0 %vm320_vm0, %v6788_v16  ;;  %v8194_v16 = vld [vmem:[%s8375_s6] ss:$0 sm:$0xff] }
 0x675   : > { %v4743_v30 = vpop.f32.mrb[16].mxu0 }
 0x676   : > { %v5333_v23 = vmul.f32 -1.442695, %v4743_v30  ;;  %v5613_v21 = vpop.f32.mrb[17].mxu0 }
 0x678   : > { %5727 = vpow2.f32 %v5333_v23 }
 0x679   : > { %v5618_v50 = vpop.f32.mrb[18].mxu0 }
 0x67a   : > { %v4926_v40 = vpop.f32.mrb[19].mxu0  ;;  %v4932_v2 = vadd.f32 %v5618_v50, %v8194_v16 }
 0x67b   : > { %v4927_v5 = vadd.f32 %v8194_v16, %v4926_v40 }
 0x67d   : > { %v5621_v61 = vpop.f32.mrb[20].mxu0 }
 0x67e   : > { %v4936_v51 = vpop.f32.mrb[21].mxu0  ;;  %v4942_v6 = vadd.f32 %v5621_v61, %v8194_v16 }
 0x67f   : > { %v4937_v9 = vadd.f32 %v8194_v16, %v4936_v51 }
 0x681   : > { %v5624_v0 = vpop.f32.mrb[22].mxu0 }
 0x682   : > { %v5728_v45 = vpop.eup %5727  ;;  %v4946_v39 = vpop.f32.mrb[23].mxu0  ;;  %v4952_v10 = vadd.f32 %v5624_v0, %v8194_v16 }
 0x683   : > { %v4750_v41 = vadd.f32 1.0, %v5728_v45  ;;  %v4947_v12 = vadd.f32 %v8194_v16, %v4946_v39 }
 0x685   : > { %5729 = vrcp.f32 %v4750_v41  ;;  %v5627_v7 = vpop.f32.mrb[24].mxu0 }
 0x686   : > { %v4956_v31 = vpop.f32.mrb[25].mxu0  ;;  %v4962_v47 = vadd.f32 %v5627_v7, %v8194_v16 }
 0x687   : > { %v4957_v13 = vadd.f32 %v8194_v16, %v4956_v31 }
 0x689   : > { %v5630_v27 = vpop.f32.mrb[26].mxu0 }
 0x68a   : > { %v4966_v8 = vpop.f32.mrb[27].mxu0  ;;  %v4972_v14 = vadd.f32 %v5630_v27, %v8194_v16 }
 0x68b   : > { %v4967_v15 = vadd.f32 %v8194_v16, %v4966_v8 }
 0x68d   : > { %v5633_v1 = vpop.f32.mrb[28].mxu0 }
 0x68e   : > { %v4976_v3 = vpop.f32.mrb[29].mxu0  ;;  %v4982_v17 = vadd.f32 %v5633_v1, %v8194_v16 }
 0x68f   : > { %v5730_v4 = vpop.eup %5729  ;;  %v4977_v44 = vadd.f32 %v8194_v16, %v4976_v3 }
 0x690   : > { %v8202_v11 = vrot.slane %v5730_v4, %v5087_v53 }
 0x691   : > { %v5636_v25 = vpop.f32.mrb[30].mxu0 }
 0x692   : > { %v5090_v30 = vmul.f32 %v8202_v11, %v7939_v22  ;;  %v5089_v23 = vmul.f32 %v8202_v11, %v7943_v20  ;;  %v5092_v21 = vmul.f32 %v8202_v11, %v7957_v58  ;;  %v5091_v50 = vmul.f32 %v8202_v11, %v7947_v60  ;;  %v4986_v40 = vpop.f32.mrb[31].mxu0 }
 0x693   : > { %v5094_v22 = vmul.f32 %v8202_v11, %v7971_v29  ;;  %v5093_v20 = vmul.f32 %v8202_v11, %v7961_v38  ;;  %v5096_v60 = vmul.f32 %v8202_v11, %v7983_v52  ;;  %v5095_v58 = vmul.f32 %v8202_v11, %v7975_v32 }
 0x694   : > { %v5122_v61 = vadd.f32 %v5090_v30, %v4932_v2  ;;  %v5121_v51 = vadd.f32 %v5089_v23, %v4927_v5  ;;  %v5124_v0 = vadd.f32 %v5092_v21, %v4942_v6  ;;  %v5123_v45 = vadd.f32 %v5091_v50, %v4937_v9 }
 0x695   : > { %v5126_v39 = vadd.f32 %v5094_v22, %v4952_v10  ;;  %v5125_v41 = vadd.f32 %v5093_v20, %v4947_v12  ;;  %v5128_v29 = vadd.f32 %v5096_v60, %v4962_v47  ;;  %v5127_v7 = vadd.f32 %v5095_v58, %v4957_v13  ;;  %v5639_v31 = vpop.f32.mrb[32].mxu0 }
 0x696   : > { %5154 = vst.msk [vmem:[%s8224_s23 + $0x8] sm:$0xff] %vm2516_vm12, %v5122_v61  ;;  %5153 = vst.msk [vmem:[%s8224_s23] sm:$0xff] %vm2516_vm12, %v5121_v51  ;;  %v5098_v38 = vmul.f32 %v8202_v11, %v7995_v24  ;;  %v5097_v32 = vmul.f32 %v8202_v11, %v7987_v37  ;;  %v5100_v52 = vmul.f32 %v8202_v11, %v8007_v42  ;;  %v4996_v8 = vpop.f32.mrb[33].mxu0 }
 0x697   : > { %5156 = vst.msk [vmem:[%s8224_s23 + $0x18] sm:$0xff] %vm2516_vm12, %v5124_v0  ;;  %5155 = vst.msk [vmem:[%s8224_s23 + $0x10] sm:$0xff] %vm2516_vm12, %v5123_v45  ;;  %v5099_v27 = vmul.f32 %v8202_v11, %v7999_v26  ;;  %v4992_v37 = vadd.f32 %v5636_v25, %v8194_v16  ;;  %v5102_v24 = vmul.f32 %v8202_v11, %v8019_v35 }
 0x698   : > { %5158 = vst.msk [vmem:[%s8224_s23 + $0x28] sm:$0xff] %vm2516_vm12, %v5126_v39  ;;  %5157 = vst.msk [vmem:[%s8224_s23 + $0x20] sm:$0xff] %vm2516_vm12, %v5125_v41  ;;  %v4987_v26 = vadd.f32 %v8194_v16, %v4986_v40  ;;  %v5101_v42 = vmul.f32 %v8202_v11, %v8011_v63  ;;  %v5130_v53 = vadd.f32 %v5098_v38, %v4972_v14 }
 0x699   : > { %5160 = vst.msk [vmem:[%s8224_s23 + $0x38] sm:$0xff] %vm2516_vm12, %v5128_v29  ;;  %5159 = vst.msk [vmem:[%s8224_s23 + $0x30] sm:$0xff] %vm2516_vm12, %v5127_v7  ;;  %v5129_v1 = vadd.f32 %v5097_v32, %v4967_v15  ;;  %v5132_v2 = vadd.f32 %v5100_v52, %v4982_v17  ;;  %v5131_v3 = vadd.f32 %v5099_v27, %v4977_v44  ;;  %v5642_v10 = vpop.f32.mrb[34].mxu0 }
 0x69a   : > { %v5134_v4 = vadd.f32 %v5102_v24, %v4992_v37  ;;  %v5133_v5 = vadd.f32 %v5101_v42, %v4987_v26  ;;  %v5002_v6 = vadd.f32 %v5639_v31, %v8194_v16  ;;  %v5104_v9 = vmul.f32 %v8202_v11, %v8031_v18  ;;  %5162 = vst.msk [vmem:[%s8224_s23 + $0x48] sm:$0xff] %vm2516_vm12, %v5130_v53  ;;  %v5006_v47 = vpop.f32.mrb[35].mxu0 }
 0x69b   : > { %5161 = vst.msk [vmem:[%s8224_s23 + $0x40] sm:$0xff] %vm2516_vm12, %v5129_v1  ;;  %5164 = vst.msk [vmem:[%s8224_s23 + $0x58] sm:$0xff] %vm2516_vm12, %v5132_v2  ;;  %v4997_v63 = vadd.f32 %v8194_v16, %v4996_v8  ;;  %v5103_v35 = vmul.f32 %v8202_v11, %v8023_v46  ;;  %v5012_v12 = vadd.f32 %v5642_v10, %v8194_v16 }
 0x69c   : > { %5163 = vst.msk [vmem:[%s8224_s23 + $0x50] sm:$0xff] %vm2516_vm12, %v5131_v3  ;;  %v5106_v18 = vmul.f32 %v8202_v11, %v8043_v56  ;;  %5166 = vst.msk [vmem:[%s8224_s23 + $0x68] sm:$0xff] %vm2516_vm12, %v5134_v4  ;;  %v5136_v13 = vadd.f32 %v5104_v9, %v5002_v6  ;;  %v5007_v14 = vadd.f32 %v8194_v16, %v5006_v47  ;;  %v8434_v4 = vld [vmem:[#allocation25_spill] sm:$0xff]  ;;  %v8435_v9 = vld [vmem:[#allocation24_spill] sm:$0xff] }
 0x69d   : > { %5165 = vst.msk [vmem:[%s8224_s23 + $0x60] sm:$0xff] %vm2516_vm12, %v5133_v5  ;;  %v5105_v15 = vmul.f32 %v8202_v11, %v8035_v28  ;;  %v5135_v17 = vadd.f32 %v5103_v35, %v4997_v63  ;;  %v5645_v25 = vpop.f32.mrb[36].mxu0  ;;  %v5108_v30 = vmul.f32 %v8202_v11, %v8055_v57  ;;  %v5107_v21 = vmul.f32 %v8202_v11, %v8047_v34 }
 0x69e   : > { %v5138_v46 = vadd.f32 %v5106_v18, %v5012_v12  ;;  %5168 = vst.msk [vmem:[%s8224_s23 + $0x78] sm:$0xff] %vm2516_vm12, %v5136_v13  ;;  %v5022_v56 = vadd.f32 %v5645_v25, %v8194_v16  ;;  %v5016_v23 = vpop.f32.mrb[37].mxu0  ;;  %v5110_v57 = vmul.f32 %v8202_v11, %v8067_v33  ;;  %v5109_v34 = vmul.f32 %v8202_v11, %v8059_v36 }
 0x69f   : > { %v5137_v44 = vadd.f32 %v5105_v15, %v5007_v14  ;;  %5167 = vst.msk [vmem:[%s8224_s23 + $0x70] sm:$0xff] %vm2516_vm12, %v5135_v17  ;;  %v5017_v28 = vadd.f32 %v8194_v16, %v5016_v23  ;;  %v5112_v33 = vmul.f32 %v8202_v11, %v8079_v19  ;;  %v5111_v36 = vmul.f32 %v8202_v11, %v8071_v59 }
 0x6a0   : > { %5170 = vst.msk [vmem:[%s8224_s23 + $0x88] sm:$0xff] %vm2516_vm12, %v5138_v46  ;;  %v5140_v50 = vadd.f32 %v5108_v30, %v5022_v56  ;;  %v5114_v19 = vmul.f32 %v8202_v11, %v8090_v49  ;;  %v5113_v59 = vmul.f32 %v8202_v11, %v8082_v62  ;;  %v5116_v49 = vmul.f32 %v8202_v11, %v8100_v43 }
 0x6a1   : > { %5169 = vst.msk [vmem:[%s8224_s23 + $0x80] sm:$0xff] %vm2516_vm12, %v5137_v44  ;;  %v5139_v40 = vadd.f32 %v5107_v21, %v5017_v28  ;;  %v5648_v22 = vpop.f32.mrb[38].mxu0  ;;  %v5115_v62 = vmul.f32 %v8202_v11, %v8093_v54  ;;  %v5118_v43 = vmul.f32 %v8202_v11, %v8434_v4  ;;  %v5117_v54 = vmul.f32 %v8202_v11, %v8435_v9 }
 0x6a2   : > { %5172 = vst.msk [vmem:[%s8224_s23 + $0x98] sm:$0xff] %vm2516_vm12, %v5140_v50  ;;  %v5032_v20 = vadd.f32 %v5648_v22, %v8194_v16  ;;  %v5026_v60 = vpop.f32.mrb[39].mxu0  ;;  %v5120_v18 = vmul.f32 %v8202_v11, %v8115_v48  ;;  %v5119_v14 = vmul.f32 %v8202_v11, %v8118_v55 }
 0x6a3   : > { %5171 = vst.msk [vmem:[%s8224_s23 + $0x90] sm:$0xff] %vm2516_vm12, %v5139_v40  ;;  %v5027_v58 = vadd.f32 %v8194_v16, %v5026_v60 }
 0x6a4   : > { %v5142_v61 = vadd.f32 %v5110_v57, %v5032_v20 }
 0x6a5   : > { %v5141_v51 = vadd.f32 %v5109_v34, %v5027_v58  ;;  %v5651_v0 = vpop.f32.mrb[40].mxu0 }
 0x6a6   : > { %5174 = vst.msk [vmem:[%s8224_s23 + $0xa8] sm:$0xff] %vm2516_vm12, %v5142_v61  ;;  %v5042_v45 = vadd.f32 %v5651_v0, %v8194_v16  ;;  %v5036_v39 = vpop.f32.mrb[41].mxu0 }
 0x6a7   : > { %5173 = vst.msk [vmem:[%s8224_s23 + $0xa0] sm:$0xff] %vm2516_vm12, %v5141_v51  ;;  %v5037_v41 = vadd.f32 %v8194_v16, %v5036_v39 }
 0x6a8   : > { %v5144_v29 = vadd.f32 %v5112_v33, %v5042_v45 }
 0x6a9   : > { %v5143_v7 = vadd.f32 %v5111_v36, %v5037_v41  ;;  %v5654_v31 = vpop.f32.mrb[42].mxu0 }
 0x6aa   : > { %5176 = vst.msk [vmem:[%s8224_s23 + $0xb8] sm:$0xff] %vm2516_vm12, %v5144_v29  ;;  %v5052_v38 = vadd.f32 %v5654_v31, %v8194_v16  ;;  %v5046_v32 = vpop.f32.mrb[43].mxu0 }
 0x6ab   : > { %5175 = vst.msk [vmem:[%s8224_s23 + $0xb0] sm:$0xff] %vm2516_vm12, %v5143_v7  ;;  %v5047_v52 = vadd.f32 %v8194_v16, %v5046_v32 }
 0x6ac   : > { %v5146_v27 = vadd.f32 %v5114_v19, %v5052_v38 }
 0x6ad   : > { %v5145_v8 = vadd.f32 %v5113_v59, %v5047_v52  ;;  %v5657_v37 = vpop.f32.mrb[44].mxu0 }
 0x6ae   : > { %5178 = vst.msk [vmem:[%s8224_s23 + $0xc8] sm:$0xff] %vm2516_vm12, %v5146_v27  ;;  %v5062_v24 = vadd.f32 %v5657_v37, %v8194_v16  ;;  %v5056_v26 = vpop.f32.mrb[45].mxu0 }
 0x6af   : > { %5177 = vst.msk [vmem:[%s8224_s23 + $0xc0] sm:$0xff] %vm2516_vm12, %v5145_v8  ;;  %v5057_v42 = vadd.f32 %v8194_v16, %v5056_v26 }
 0x6b0   : > { %v5148_v53 = vadd.f32 %v5116_v49, %v5062_v24 }
 0x6b1   : > { %v5147_v1 = vadd.f32 %v5115_v62, %v5057_v42  ;;  %v5660_v2 = vpop.f32.mrb[46].mxu0 }
 0x6b2   : > { %5180 = vst.msk [vmem:[%s8224_s23 + $0xd8] sm:$0xff] %vm2516_vm12, %v5148_v53  ;;  %v5072_v3 = vadd.f32 %v5660_v2, %v8194_v16  ;;  %v5066_v5 = vpop.f32.mrb[47].mxu0 }
 0x6b3   : > { %5179 = vst.msk [vmem:[%s8224_s23 + $0xd0] sm:$0xff] %vm2516_vm12, %v5147_v1  ;;  %v5067_v6 = vadd.f32 %v8194_v16, %v5066_v5 }
 0x6b4   : > { %v5150_v10 = vadd.f32 %v5118_v43, %v5072_v3 }
 0x6b5   : > { %v5149_v63 = vadd.f32 %v5117_v54, %v5067_v6  ;;  %v5663_v35 = vpop.f32.mrb[48].mxu0 }
 0x6b6   : > { %5182 = vst.msk [vmem:[%s8224_s23 + $0xe8] sm:$0xff] %vm2516_vm12, %v5150_v10  ;;  %v5082_v12 = vadd.f32 %v5663_v35, %v8194_v16  ;;  %v5076_v47 = vpop.f32.mrb[49].mxu0 }
 0x6b7   : > { %5181 = vst.msk [vmem:[%s8224_s23 + $0xe0] sm:$0xff] %vm2516_vm12, %v5149_v63  ;;  %v5077_v13 = vadd.f32 %v8194_v16, %v5076_v47 }
 0x6b8   : > { %v5152_v15 = vadd.f32 %v5120_v18, %v5082_v12 }
 0x6b9   : > { %v5151_v17 = vadd.f32 %v5119_v14, %v5077_v13 }
 0x6ba   : > { %5184 = vst.msk [vmem:[%s8224_s23 + $0xf8] sm:$0xff] %vm2516_vm12, %v5152_v15 }
 0x6bb   : > { %5183 = vst.msk [vmem:[%s8224_s23 + $0xf0] sm:$0xff] %vm2516_vm12, %v5151_v17 }
 0x6bc PF: > { %s19_s27 = sadd.s32 1, %s5757_s27  }
 0x6bd   : > { %p16_p1 = scmp.ge.s32.totalorder %s19_s27, 4  }
 0x6bf   :  { %18 = sbr.rel (!%p16_p1) target bundleno = 1 (0x1), region = 91 }
 0x6c6   :  { %5206 = vsyncpa [#allocation6], 1 }
 0x6c7   :  { %5208 = vsyncpa [#allocation6 + $0x1], 1 }

</bundles_post_ra>
